<compile_context>
chip_gen: v6e
topology: v6e:2x2x1
jax: 0.10.0
libtpu: 0.0.40
codegen_flags: <defaults>
</compile_context>

<pallas_src>
import functools
import math

import jax
import jax.numpy as jnp
from jax.experimental import pallas as pl
from jax.experimental.pallas import tpu as pltpu

NEG_SLOPE = 0.01          # PyTorch LeakyReLU default
BN_EPS = 1e-5
C1, C2, C3 = 16, 128, 64  # channel progression 1 -> 16 -> 128 -> 64


def _round_up(x, m):
    return (x + m - 1) // m * m


def _pick_block_batch(B, P, max_rows=4096):
    """Largest divisor of B with BT*P <= max_rows rows per step, keeping >= 2 grid
    steps whenever B >= 2 (so both v7x TensorCores get work)."""
    if P > max_rows:
        raise ValueError(
            f"signal too long for the single-L-block kernel (P={P} > {max_rows}); "
            "needs an L-tile grid axis with a 3-row halo")
    best = 1
    for d in range(1, B + 1):
        if B % d == 0 and d * P <= max_rows and (B // d >= 2 or B == 1):
            best = d
    return best


def _vmem_limit_bytes():
    """~3/4 of physical VMEM (96 MiB on v5e/v6e, 48 MiB on v7x), capped at 100 MiB."""
    cap = 64 * 1024 * 1024
    try:
        cap = int(getattr(pltpu.get_tpu_info(), "vmem_capacity_bytes", cap))
    except Exception:
        pass
    return max(32 * 1024 * 1024, min(cap * 3 // 4, 100 * 1024 * 1024))


def _encoder_kernel(x_ref, w1_ref, s1_ref, w2_ref, s2_ref, w3_ref, s3_ref, o_ref,
                    *, L, M, P):
    """One grid step: BT = M // P batch elements flattened to M = BT * P rows.

    Invariant: inside every P-row batch slab, rows [0, len) hold the activation and
    rows [len, P) are exactly zero, so sublane rolls implement the conv 'same' zero
    padding and the MaxPool1d(2,1) shift without leaking data across slab boundaries.
    """
    f32 = jnp.float32
    bf16 = jnp.bfloat16

    # Per-slab row index + per-layer 0/1 masks, built in-kernel (no aux inputs).
    # idx, slab, P are exact f32 integers; the +0.5 offset keeps the floor ~0.5/P away
    # from any rounding boundary, so rowpos = idx mod P is exact for M <= ~1e6.
    idx = jax.lax.broadcasted_iota(jnp.int32, (M, 1), 0).astype(f32)
    slab = jnp.floor((idx + 0.5) * (1.0 / P))
    rowpos = idx - slab * P
    m1 = (rowpos < (L - 1)).astype(f32)
    m2 = (rowpos < (L - 2)).astype(f32)
    m3 = (rowpos < (L - 3)).astype(f32)

    def leaky(v):
        return jnp.where(v > 0, v, NEG_SLOPE * v)

    def pool(v):
        # MaxPool1d(2, 1): out[i] = max(v[i], v[i+1]); roll(M-1) == roll(-1).
        return jnp.maximum(v, pltpu.roll(v, shift=M - 1, axis=0))

    # ---- layer 1: 1 -> 16.  Taps via sublane rolls of the (M,1) signal; VPU broadcast.
    xc = x_ref[...]                                        # x[i]      (M, 1) f32
    xl = pltpu.roll(xc, shift=1, axis=0)                   # x[i-1]  (left 'same' pad = 0)
    xr = pltpu.roll(xc, shift=M - 1, axis=0)               # x[i+1]  (right pad row = 0)
    y = xl * w1_ref[0:1, :] + xc * w1_ref[1:2, :] + xr * w1_ref[2:3, :]
    a = pool(leaky(y + s1_ref[...])) * m1                  # (M, 16) f32, rows >= L-1 == 0

    # ---- layer 2: 16 -> 128.  Single fused (M,48)@(48,128) bf16 MXU matmul.
    lhs2 = jnp.concatenate(
        [pltpu.roll(a, shift=1, axis=0).astype(bf16),      # tap 0: a[i-1]
         a.astype(bf16),                                   # tap 1: a[i]
         pltpu.roll(a, shift=M - 1, axis=0).astype(bf16)], # tap 2: a[i+1]
        axis=1)                                            # (M, 48) bf16
    y = jnp.dot(lhs2, w2_ref[...], preferred_element_type=f32)
    a = pool(leaky(y + s2_ref[...])) * m2                  # (M, 128) f32, rows >= L-2 == 0

    # ---- layer 3: 128 -> 64.  Fused im2col: one (M,384)@(384,64) bf16 matmul.
    lhs3 = jnp.concatenate(
        [pltpu.roll(a, shift=1, axis=0).astype(bf16),
         a.astype(bf16),
         pltpu.roll(a, shift=M - 1, axis=0).astype(bf16)],
        axis=1)                                            # (M, 384) bf16
    y = jnp.dot(lhs3, w3_ref[...], preferred_element_type=f32)
    o_ref[...] = pool(leaky(y + s3_ref[...])) * m3         # (M, 64) f32, no channel pad


def signal_encoder_wide(x_ncl, params):
    """x_ncl: (B, 1, L) float32 (PyTorch NCL).  Returns (B, 64, L - 3)."""
    B, cin, L = x_ncl.shape
    assert cin == 1 and L >= 4
    Lout = L - 3
    P = _round_up(L + 1, 8)          # per-element row count; >= 1 zero pad row per slab
    BT = _pick_block_batch(B, P)     # batch elements folded per grid step
    G = B // BT
    M = BT * P                       # rows per grid step / per matmul

    (w1, s1), (w2, s2), (w3, s3) = params

    # Single zero-padded signal column; pad rows [L, P) are exactly zero.
    x = x_ncl[:, 0, :].astype(jnp.float32)                 # (B, L)
    x = jnp.pad(x, ((0, 0), (0, P - L)))                   # (B, P)
    x_col = x.reshape(B * P, 1)

    kernel = functools.partial(_encoder_kernel, L=L, M=M, P=P)

    out = pl.pallas_call(
        kernel,
        out_shape=jax.ShapeDtypeStruct((B * P, C3), jnp.float32),
        grid_spec=pltpu.PrefetchScalarGridSpec(
            num_scalar_prefetch=0,
            grid=(G,),
            in_specs=[
                pl.BlockSpec((M, 1), lambda g: (g, 0)),      # signal column
                pl.BlockSpec(w1.shape, lambda g: (0, 0)),    # (3, 16)    f32
                pl.BlockSpec(s1.shape, lambda g: (0, 0)),    # (1, 16)    f32
                pl.BlockSpec(w2.shape, lambda g: (0, 0)),    # (48, 128)  bf16 (fused)
                pl.BlockSpec(s2.shape, lambda g: (0, 0)),    # (1, 128)   f32
                pl.BlockSpec(w3.shape, lambda g: (0, 0)),    # (384, 64)  bf16 (fused)
                pl.BlockSpec(s3.shape, lambda g: (0, 0)),    # (1, 64)    f32
            ],
            out_specs=pl.BlockSpec((M, C3), lambda g: (g, 0)),
        ),
        compiler_params=pltpu.CompilerParams(
            dimension_semantics=("parallel",),
            vmem_limit_bytes=_vmem_limit_bytes(),
        ),
    )(x_col, w1, s1, w2, s2, w3, s3)

    out = out.reshape(B, P, C3)[:, :Lout, :]   # drop zero pad rows
    # TODO(synk): downstream could consume (B, Lout, 64) directly and skip this transpose.
    return jnp.transpose(out, (0, 2, 1))       # (B, 64, L - 3), NCL


def _make_layer(key, cin, cout):
    """PyTorch-style Conv1d + BatchNorm1d params with BN (inference) folded in."""
    kw, kb = jax.random.split(key)
    bound = 1.0 / math.sqrt(cin * 3)                  # PyTorch Conv1d default init bound
    w = jax.random.uniform(kw, (3, cin, cout), jnp.float32, -bound, bound)
    b = jax.random.uniform(kb, (cout,), jnp.float32, -bound, bound)
    gamma = jnp.ones((cout,), jnp.float32)            # BN default init / running stats
    beta = jnp.zeros((cout,), jnp.float32)
    rmean = jnp.zeros((cout,), jnp.float32)
    rvar = jnp.ones((cout,), jnp.float32)
    scale = gamma / jnp.sqrt(rvar + BN_EPS)
    w_folded = w * scale[None, None, :]               # fold BN scale into conv weight
    shift = beta + scale * (b - rmean)                # fold conv bias + BN shift
    return w_folded, shift


def init_params(key):
    """Folded parameters in the layouts the kernel consumes."""
    k1, k2, k3 = jax.random.split(key, 3)
    w1, s1 = _make_layer(k1, 1, C1)
    w2, s2 = _make_layer(k2, C1, C2)
    w3, s3 = _make_layer(k3, C2, C3)
    # layer 1: (3, 16) f32 taps (Cin = 1), VPU broadcast path
    p1 = (w1.reshape(3, C1), s1.reshape(1, C1))
    # layer 2: fused tap-major im2col weight (48, 128) bf16
    p2 = (w2.reshape(3 * C1, C2).astype(jnp.bfloat16), s2.reshape(1, C2))
    # layer 3: fused tap-major im2col weight (384, 64) bf16 (no channel padding)
    p3 = (w3.reshape(3 * C2, C3).astype(jnp.bfloat16), s3.reshape(1, C3))
    return [p1, p2, p3]


def reference(x_ncl, params):
    """Pure-JAX reference using the same folded params and matmul dtypes."""
    (w1, s1), (w2, s2), (w3, s3) = params
    a = jnp.transpose(x_ncl, (0, 2, 1)).astype(jnp.float32)   # (B, L, 1)

    def layer(a, w_fused, shift, in_dtype):
        _, Lc, _ = a.shape
        ap = jnp.pad(a, ((0, 0), (1, 1), (0, 0)))
        lhs = jnp.concatenate([ap[:, t:t + Lc, :] for t in range(3)], axis=-1)
        y = jnp.einsum("blk,kc->blc", lhs.astype(in_dtype), w_fused,
                       preferred_element_type=jnp.float32)
        y = y + shift[0][None, None, :]
        y = jnp.where(y > 0, y, NEG_SLOPE * y)
        return jnp.maximum(y[:, :Lc - 1, :], y[:, 1:Lc, :])

    a = layer(a, w1, s1, jnp.float32)     # (B, L-1, 16)
    a = layer(a, w2, s2, jnp.bfloat16)    # (B, L-2, 128)
    a = layer(a, w3, s3, jnp.bfloat16)    # (B, L-3, 64)
    return jnp.transpose(a, (0, 2, 1))    # (B, 64, L-3)


if __name__ == "__main__":
    key = jax.random.PRNGKey(0)
    k_x, k_p = jax.random.split(key)

    B, L = 8, 64
    x = jax.random.normal(k_x, (B, 1, L), jnp.float32)         # PyTorch NCL input
    params = init_params(k_p)

    encoder = jax.jit(signal_encoder_wide)
    out = jax.block_until_ready(encoder(x, params))
    ref = jax.block_until_ready(jax.jit(reference)(x, params))

    assert out.shape == (B, C3, L - 3), out.shape
    max_err = float(jnp.max(jnp.abs(out - ref)))
    assert jnp.allclose(out, ref, atol=3e-3, rtol=3e-3), max_err

    print("KERNEL_OK")
</pallas_src>

<mosaic_0001>
module attributes {stable_mosaic.version = 11 : i64} {
  func.func @_encoder_kernel(%arg0: i32, %arg1: memref<288x1xf32, #tpu.memory_space<vmem>>, %arg2: memref<3x16xf32, #tpu.memory_space<vmem>>, %arg3: memref<1x16xf32, #tpu.memory_space<vmem>>, %arg4: memref<48x128xbf16, #tpu.memory_space<vmem>>, %arg5: memref<1x128xf32, #tpu.memory_space<vmem>>, %arg6: memref<384x64xbf16, #tpu.memory_space<vmem>>, %arg7: memref<1x64xf32, #tpu.memory_space<vmem>>, %arg8: memref<288x64xf32, #tpu.memory_space<vmem>>) attributes {dimension_semantics = [#tpu.dimension_semantics<parallel>], iteration_bounds = array<i64: 2>, scalar_prefetch = 0 : i64, scratch_operands = 0 : i64, tpu.core_type = #tpu.core_type<tc>, window_params = [{transform_indices = @transform_0, window_bounds = array<i64: 288, 1>}, {pipeline_mode = #tpu.pipeline_mode<synchronous>, transform_indices = @transform_1, window_bounds = array<i64: 3, 16>}, {pipeline_mode = #tpu.pipeline_mode<synchronous>, transform_indices = @transform_2, window_bounds = array<i64: 1, 16>}, {pipeline_mode = #tpu.pipeline_mode<synchronous>, transform_indices = @transform_3, window_bounds = array<i64: 48, 128>}, {pipeline_mode = #tpu.pipeline_mode<synchronous>, transform_indices = @transform_4, window_bounds = array<i64: 1, 128>}, {pipeline_mode = #tpu.pipeline_mode<synchronous>, transform_indices = @transform_5, window_bounds = array<i64: 384, 64>}, {pipeline_mode = #tpu.pipeline_mode<synchronous>, transform_indices = @transform_6, window_bounds = array<i64: 1, 64>}, {transform_indices = @transform_7, window_bounds = array<i64: 288, 64>}]} {
    %0 = tpu.iota {dimensions = array<i32: 0>} : vector<288x1xi32>
    %1 = arith.sitofp %0 : vector<288x1xi32> to vector<288x1xf32>
    %cst = arith.constant 5.000000e-01 : f32
    %2 = vector.broadcast %cst : f32 to vector<288x1xf32>
    %3 = arith.addf %1, %2 : vector<288x1xf32>
    %cst_0 = arith.constant 0.013888889 : f32
    %4 = vector.broadcast %cst_0 : f32 to vector<288x1xf32>
    %5 = arith.mulf %3, %4 : vector<288x1xf32>
    %6 = math.floor %5 : vector<288x1xf32>
    %cst_1 = arith.constant 7.200000e+01 : f32
    %7 = vector.broadcast %cst_1 : f32 to vector<288x1xf32>
    %8 = arith.mulf %6, %7 : vector<288x1xf32>
    %9 = arith.subf %1, %8 : vector<288x1xf32>
    %cst_2 = arith.constant 6.300000e+01 : f32
    %10 = vector.broadcast %cst_2 : f32 to vector<288x1xf32>
    %11 = arith.cmpf olt, %9, %10 : vector<288x1xf32>
    %12 = arith.extui %11 : vector<288x1xi1> to vector<288x1xi32>
    %13 = arith.sitofp %12 : vector<288x1xi32> to vector<288x1xf32>
    %cst_3 = arith.constant 6.200000e+01 : f32
    %14 = vector.broadcast %cst_3 : f32 to vector<288x1xf32>
    %15 = arith.cmpf olt, %9, %14 : vector<288x1xf32>
    %16 = arith.extui %15 : vector<288x1xi1> to vector<288x1xi32>
    %17 = arith.sitofp %16 : vector<288x1xi32> to vector<288x1xf32>
    %cst_4 = arith.constant 6.100000e+01 : f32
    %18 = vector.broadcast %cst_4 : f32 to vector<288x1xf32>
    %19 = arith.cmpf olt, %9, %18 : vector<288x1xf32>
    %20 = arith.extui %19 : vector<288x1xi1> to vector<288x1xi32>
    %21 = arith.sitofp %20 : vector<288x1xi32> to vector<288x1xf32>
    %c0 = arith.constant 0 : index
    %c0_5 = arith.constant 0 : index
    %22 = vector.load %arg1[%c0, %c0_5] : memref<288x1xf32, #tpu.memory_space<vmem>>, vector<288x1xf32>
    %c1_i32 = arith.constant 1 : i32
    %23 = tpu.dynamic_rotate %22 by %c1_i32 dim 0 : vector<288x1xf32>, i32 -> vector<288x1xf32>
    %c287_i32 = arith.constant 287 : i32
    %24 = tpu.dynamic_rotate %22 by %c287_i32 dim 0 : vector<288x1xf32>, i32 -> vector<288x1xf32>
    %c0_6 = arith.constant 0 : index
    %c0_7 = arith.constant 0 : index
    %25 = vector.load %arg2[%c0_6, %c0_7] : memref<3x16xf32, #tpu.memory_space<vmem>>, vector<1x16xf32>
    %26 = vector.broadcast %23 : vector<288x1xf32> to vector<288x16xf32>
    %27 = vector.broadcast %25 : vector<1x16xf32> to vector<288x16xf32>
    %28 = arith.mulf %26, %27 : vector<288x16xf32>
    %c1 = arith.constant 1 : index
    %c0_8 = arith.constant 0 : index
    %29 = vector.load %arg2[%c1, %c0_8] : memref<3x16xf32, #tpu.memory_space<vmem>>, vector<1x16xf32>
    %30 = vector.broadcast %22 : vector<288x1xf32> to vector<288x16xf32>
    %31 = vector.broadcast %29 : vector<1x16xf32> to vector<288x16xf32>
    %32 = arith.mulf %30, %31 : vector<288x16xf32>
    %33 = arith.addf %28, %32 : vector<288x16xf32>
    %c2 = arith.constant 2 : index
    %c0_9 = arith.constant 0 : index
    %34 = vector.load %arg2[%c2, %c0_9] : memref<3x16xf32, #tpu.memory_space<vmem>>, vector<1x16xf32>
    %35 = vector.broadcast %24 : vector<288x1xf32> to vector<288x16xf32>
    %36 = vector.broadcast %34 : vector<1x16xf32> to vector<288x16xf32>
    %37 = arith.mulf %35, %36 : vector<288x16xf32>
    %38 = arith.addf %33, %37 : vector<288x16xf32>
    %c0_10 = arith.constant 0 : index
    %c0_11 = arith.constant 0 : index
    %39 = vector.load %arg3[%c0_10, %c0_11] : memref<1x16xf32, #tpu.memory_space<vmem>>, vector<1x16xf32>
    %40 = vector.broadcast %39 : vector<1x16xf32> to vector<288x16xf32>
    %41 = arith.addf %38, %40 : vector<288x16xf32>
    %cst_12 = arith.constant 0.000000e+00 : f32
    %42 = vector.broadcast %cst_12 : f32 to vector<288x16xf32>
    %43 = arith.cmpf ogt, %41, %42 : vector<288x16xf32>
    %cst_13 = arith.constant 0.00999999977 : f32
    %44 = vector.broadcast %cst_13 : f32 to vector<288x16xf32>
    %45 = arith.mulf %44, %41 : vector<288x16xf32>
    %46 = arith.select %43, %41, %45 : vector<288x16xi1>, vector<288x16xf32>
    %c287_i32_14 = arith.constant 287 : i32
    %47 = tpu.dynamic_rotate %46 by %c287_i32_14 dim 0 : vector<288x16xf32>, i32 -> vector<288x16xf32>
    %48 = arith.maximumf %46, %47 : vector<288x16xf32>
    %49 = vector.broadcast %13 : vector<288x1xf32> to vector<288x16xf32>
    %50 = arith.mulf %48, %49 : vector<288x16xf32>
    %c1_i32_15 = arith.constant 1 : i32
    %51 = tpu.dynamic_rotate %50 by %c1_i32_15 dim 0 : vector<288x16xf32>, i32 -> vector<288x16xf32>
    %52 = arith.truncf %51 : vector<288x16xf32> to vector<288x16xbf16>
    %53 = arith.truncf %50 : vector<288x16xf32> to vector<288x16xbf16>
    %c287_i32_16 = arith.constant 287 : i32
    %54 = tpu.dynamic_rotate %50 by %c287_i32_16 dim 0 : vector<288x16xf32>, i32 -> vector<288x16xf32>
    %55 = arith.truncf %54 : vector<288x16xf32> to vector<288x16xbf16>
    %56 = tpu.concatenate %52, %53, %55 in 1 : vector<288x16xbf16>, vector<288x16xbf16>, vector<288x16xbf16> -> vector<288x48xbf16>
    %c0_17 = arith.constant 0 : index
    %c0_18 = arith.constant 0 : index
    %57 = vector.load %arg4[%c0_17, %c0_18] : memref<48x128xbf16, #tpu.memory_space<vmem>>, vector<48x128xbf16>
    %cst_19 = arith.constant dense<0.000000e+00> : vector<288x128xf32>
    %58 = tpu.matmul %56, %57, %cst_19 {dimension_numbers = #tpu.dot_dimension_numbers<[1], [0], [0], [1], [0, 0, 1, 1], [], []>} : vector<288x48xbf16>, vector<48x128xbf16>, vector<288x128xf32> -> vector<288x128xf32>
    %c0_20 = arith.constant 0 : index
    %c0_21 = arith.constant 0 : index
    %59 = vector.load %arg5[%c0_20, %c0_21] : memref<1x128xf32, #tpu.memory_space<vmem>>, vector<1x128xf32>
    %60 = vector.broadcast %59 : vector<1x128xf32> to vector<288x128xf32>
    %61 = arith.addf %58, %60 : vector<288x128xf32>
    %cst_22 = arith.constant 0.000000e+00 : f32
    %62 = vector.broadcast %cst_22 : f32 to vector<288x128xf32>
    %63 = arith.cmpf ogt, %61, %62 : vector<288x128xf32>
    %cst_23 = arith.constant 0.00999999977 : f32
    %64 = vector.broadcast %cst_23 : f32 to vector<288x128xf32>
    %65 = arith.mulf %64, %61 : vector<288x128xf32>
    %66 = arith.select %63, %61, %65 : vector<288x128xi1>, vector<288x128xf32>
    %c287_i32_24 = arith.constant 287 : i32
    %67 = tpu.dynamic_rotate %66 by %c287_i32_24 dim 0 : vector<288x128xf32>, i32 -> vector<288x128xf32>
    %68 = arith.maximumf %66, %67 : vector<288x128xf32>
    %69 = vector.broadcast %17 : vector<288x1xf32> to vector<288x128xf32>
    %70 = arith.mulf %68, %69 : vector<288x128xf32>
    %c1_i32_25 = arith.constant 1 : i32
    %71 = tpu.dynamic_rotate %70 by %c1_i32_25 dim 0 : vector<288x128xf32>, i32 -> vector<288x128xf32>
    %72 = arith.truncf %71 : vector<288x128xf32> to vector<288x128xbf16>
    %73 = arith.truncf %70 : vector<288x128xf32> to vector<288x128xbf16>
    %c287_i32_26 = arith.constant 287 : i32
    %74 = tpu.dynamic_rotate %70 by %c287_i32_26 dim 0 : vector<288x128xf32>, i32 -> vector<288x128xf32>
    %75 = arith.truncf %74 : vector<288x128xf32> to vector<288x128xbf16>
    %76 = tpu.concatenate %72, %73, %75 in 1 : vector<288x128xbf16>, vector<288x128xbf16>, vector<288x128xbf16> -> vector<288x384xbf16>
    %c0_27 = arith.constant 0 : index
    %c0_28 = arith.constant 0 : index
    %77 = vector.load %arg6[%c0_27, %c0_28] : memref<384x64xbf16, #tpu.memory_space<vmem>>, vector<384x64xbf16>
    %cst_29 = arith.constant dense<0.000000e+00> : vector<288x64xf32>
    %78 = tpu.matmul %76, %77, %cst_29 {dimension_numbers = #tpu.dot_dimension_numbers<[1], [0], [0], [1], [0, 0, 1, 1], [], []>} : vector<288x384xbf16>, vector<384x64xbf16>, vector<288x64xf32> -> vector<288x64xf32>
    %c0_30 = arith.constant 0 : index
    %c0_31 = arith.constant 0 : index
    %79 = vector.load %arg7[%c0_30, %c0_31] : memref<1x64xf32, #tpu.memory_space<vmem>>, vector<1x64xf32>
    %80 = vector.broadcast %79 : vector<1x64xf32> to vector<288x64xf32>
    %81 = arith.addf %78, %80 : vector<288x64xf32>
    %cst_32 = arith.constant 0.000000e+00 : f32
    %82 = vector.broadcast %cst_32 : f32 to vector<288x64xf32>
    %83 = arith.cmpf ogt, %81, %82 : vector<288x64xf32>
    %cst_33 = arith.constant 0.00999999977 : f32
    %84 = vector.broadcast %cst_33 : f32 to vector<288x64xf32>
    %85 = arith.mulf %84, %81 : vector<288x64xf32>
    %86 = arith.select %83, %81, %85 : vector<288x64xi1>, vector<288x64xf32>
    %c287_i32_34 = arith.constant 287 : i32
    %87 = tpu.dynamic_rotate %86 by %c287_i32_34 dim 0 : vector<288x64xf32>, i32 -> vector<288x64xf32>
    %88 = arith.maximumf %86, %87 : vector<288x64xf32>
    %89 = vector.broadcast %21 : vector<288x1xf32> to vector<288x64xf32>
    %90 = arith.mulf %88, %89 : vector<288x64xf32>
    %c0_35 = arith.constant 0 : index
    %c0_36 = arith.constant 0 : index
    %91 = vector.load %arg8[%c0_35, %c0_36] : memref<288x64xf32, #tpu.memory_space<vmem>>, vector<288x64xf32>
    tpu.vector_store %arg8[%c0_35, %c0_36], %90 {strides = array<i32>} : memref<288x64xf32, #tpu.memory_space<vmem>>, vector<288x64xf32>,
    return
  }
  func.func @transform_0(%arg0: i32) -> (i32, i32) {
    %c0_i32 = arith.constant 0 : i32
    %c0_i32_0 = arith.constant 0 : i32
    return %arg0, %c0_i32 : i32, i32
  }
  func.func @transform_1(%arg0: i32) -> (i32, i32) {
    %c0_i32 = arith.constant 0 : i32
    %c0_i32_0 = arith.constant 0 : i32
    %c0_i32_1 = arith.constant 0 : i32
    return %c0_i32, %c0_i32_0 : i32, i32
  }
  func.func @transform_2(%arg0: i32) -> (i32, i32) {
    %c0_i32 = arith.constant 0 : i32
    %c0_i32_0 = arith.constant 0 : i32
    %c0_i32_1 = arith.constant 0 : i32
    return %c0_i32, %c0_i32_0 : i32, i32
  }
  func.func @transform_3(%arg0: i32) -> (i32, i32) {
    %c0_i32 = arith.constant 0 : i32
    %c0_i32_0 = arith.constant 0 : i32
    %c0_i32_1 = arith.constant 0 : i32
    return %c0_i32, %c0_i32_0 : i32, i32
  }
  func.func @transform_4(%arg0: i32) -> (i32, i32) {
    %c0_i32 = arith.constant 0 : i32
    %c0_i32_0 = arith.constant 0 : i32
    %c0_i32_1 = arith.constant 0 : i32
    return %c0_i32, %c0_i32_0 : i32, i32
  }
  func.func @transform_5(%arg0: i32) -> (i32, i32) {
    %c0_i32 = arith.constant 0 : i32
    %c0_i32_0 = arith.constant 0 : i32
    %c0_i32_1 = arith.constant 0 : i32
    return %c0_i32, %c0_i32_0 : i32, i32
  }
  func.func @transform_6(%arg0: i32) -> (i32, i32) {
    %c0_i32 = arith.constant 0 : i32
    %c0_i32_0 = arith.constant 0 : i32
    %c0_i32_1 = arith.constant 0 : i32
    return %c0_i32, %c0_i32_0 : i32, i32
  }
  func.func @transform_7(%arg0: i32) -> (i32, i32) {
    %c0_i32 = arith.constant 0 : i32
    %c0_i32_0 = arith.constant 0 : i32
    return %arg0, %c0_i32 : i32, i32
  }
}

</mosaic_0001>

<bundles_post_ra>
// kernel: signal_encoder_wide.1
= control target key start
LH: loop header
LB: loop body
LE: loop exit
PB: predicated region body
PF: predicated region fallthrough
CT: control target
= control target key end

     0   :  { %s4472_s24 = smov 0   ;;  %s7849_s0 = inlined_call_operand.vmem [shape: f32[576,1], index: 0, kind: input, shape index: {}]   ;;  %s7850_s1 = inlined_call_operand.vmem [shape: f32[3,16], index: 1, kind: input, shape index: {}]   ;;  %s7851_s2 = inlined_call_operand.vmem [shape: f32[1,16], index: 2, kind: input, shape index: {}]   ;;  %s7852_s3 = inlined_call_operand.vmem [shape: bf16[48,128], index: 3, kind: input, shape index: {}]   ;;  %s7853_s4 = inlined_call_operand.vmem [shape: f32[1,128], index: 4, kind: input, shape index: {}]   ;;  %s7854_s5 = inlined_call_operand.vmem [shape: bf16[384,64], index: 5, kind: input, shape index: {}]   ;;  %s7855_s6 = inlined_call_operand.vmem [shape: f32[1,64], index: 6, kind: input, shape index: {}]   ;;  %s7856_s7 = inlined_call_operand.vmem [shape: f32[576,64], index: 7, kind: output, shape index: {}]  }
   0x1 LB: > { %s4063_s25 = sadd.s32 4294967295, %s4426_s24   ;;  %p4067_p0 = scmp.ge.s32.totalorder %s4426_s24, 1  ;;  %s4426_s24 = sphi %s4472_s24, %s17_s24  }
   0x2   : > { %p238_p1 = scmp.lt.s32.totalorder %s4426_s24, 3 }
   0x4   : > { %p239_p2 = pnand %p4067_p0, %p238_p1 }
   0x6   : > { %242 = sbr.rel (%p239_p2) target bundleno = 1072 (0x430), region = 48 }
   0xb   : > { %s270_s26 = smul.u32 36, %s4063_s25  ;;  %v7857_v0 = vmov 0   ;;  %v283_v1 = vlaneseq  ;;  %s4430_s16 = smov 16  }
   0xc   : > { %4385 = vset.pattern.permute.xlu1 %v7857_v0  ;;  %4384 = vset.pattern.permute.xlu0 %v7857_v0  ;;  %s4431_s17 = smov 32  }
   0xd   : > { %p271_p3 = scmp.lt.s32.totalorder %s270_s26, 71  ;;  %3364 = vmatprep.subr.bf16.mxu1 %v7857_v0  ;;  %v4486_v2 = vshrl.u32 %v283_v1, 7 }
   0xf   : > { %s8401_s26 = smov (!%p271_p3, %s270_s26), 71  ;;  %vm932_vm0 = vcmp.lt.s32.totalorder %v4486_v2, 1  ;;  %vm1005_vm1 = vcmp.lt.s32.totalorder %v4486_v2, 7 }
  0x10   : > { %s4068_s27 = sshll.u32 %s8401_s26, 3 }
  0x11   : > { %s4493_s30 = scalar_lea.vmem %s7849_s0, %s4068_s27  ;;  %s7577_s8 = scalar_lea.vmem %s7856_s7, %s4068_s27 }
  0x12   : > { %v861_v3 = vld [vmem:[%s4493_s30 + $0x8] sm:$0xff]  ;;  %v4497_v4 = vld [vmem:[%s4493_s30] sm:$0xff]  ;;  %v862_v5 = vld [vmem:[%s4493_s30 + $0x10] sm:$0xff] }
  0x13   : > { %1271 = vperm.xlu1 %4385, %v861_v3   ;;  %1266 = vperm.xlu0 %4384, %v4497_v4   ;;  %v4502_v6 = vld [vmem:[%s4493_s30 + $0x118] sm:$0xff]  ;;  %v897_v7 = vrot.slane %v861_v3, 7  ;;  %v896_v8 = vrot.slane %v4497_v4, 7  ;;  %v898_v10 = vrot.slane %v862_v5, 7  ;;  %v864_v15 = vld [vmem:[%s4493_s30 + $0x20] sm:$0xff]  ;;  %v865_v16 = vld [vmem:[%s4493_s30 + $0x28] sm:$0xff] }
  0x14   : > { %v863_v9 = vld [vmem:[%s4493_s30 + $0x18] sm:$0xff]  ;;  %v931_v11 = vrot.slane %v4502_v6, 7  ;;  %v900_v19 = vrot.slane %v864_v15, 7  ;;  %v901_v20 = vrot.slane %v865_v16, 7  ;;  %v970_v23 = vrot.slane %v861_v3, 1  ;;  %v866_v30 = vld [vmem:[%s4493_s30 + $0x30] sm:$0xff] }
  0x15   : > { %v899_v12 = vrot.slane %v863_v9, 7  ;;  %v966_v13 = vsel %vm932_vm0, %v897_v7, %v898_v10  ;;  %v967_v18 = vsel %vm932_vm0, %v896_v8, %v897_v7  ;;  %v7859_v24 = vrot.slane %v4497_v4, 1  ;;  %v867_v35 = vld [vmem:[%s4493_s30 + $0x38] sm:$0xff]  ;;  %v868_v42 = vld [vmem:[%s4493_s30 + $0x40] sm:$0xff]  ;;  %v869_v43 = vld [vmem:[%s4493_s30 + $0x48] sm:$0xff] }
  0x16   : > { %v968_v14 = vsel %vm932_vm0, %v931_v11, %v896_v8  ;;  %v963_v21 = vsel %vm932_vm0, %v900_v19, %v901_v20  ;;  %v971_v25 = vrot.slane %v862_v5, 1  ;;  %v972_v26 = vrot.slane %v863_v9, 1  ;;  %v870_v50 = vld [vmem:[%s4493_s30 + $0x50] sm:$0xff]  ;;  %v871_v55 = vld [vmem:[%s4493_s30 + $0x58] sm:$0xff]  ;;  %v872_v62 = vld [vmem:[%s4493_s30 + $0x60] sm:$0xff] }
  0x17   : > { %1281 = vperm.xlu1 %4385, %v863_v9   ;;  %1276 = vperm.xlu0 %4384, %v862_v5   ;;  %v965_v17 = vsel %vm932_vm0, %v898_v10, %v899_v12  ;;  %v964_v22 = vsel %vm932_vm0, %v899_v12, %v900_v19  ;;  %v1040_v28 = vsel %vm1005_vm1, %v7859_v24, %v970_v23  ;;  %v973_v29 = vrot.slane %v864_v15, 1  ;;  %v873_v63 = vld [vmem:[%s4493_s30 + $0x68] sm:$0xff]  ;;  %v4569_v5 = vld [vmem:[%s4493_s30 + $0x110] sm:$0xff]  ;;  %v875_v19 = vld [vmem:[%s4493_s30 + $0x78] sm:$0xff] }
  0x18   : > { %v1039_v27 = vsel %vm1005_vm1, %v970_v23, %v971_v25  ;;  %v1038_v32 = vsel %vm1005_vm1, %v971_v25, %v972_v26  ;;  %v974_v33 = vrot.slane %v865_v16, 1  ;;  %v975_v34 = vrot.slane %v866_v30, 1 }
  0x19   : > { %v1037_v31 = vsel %vm1005_vm1, %v972_v26, %v973_v29  ;;  %v902_v38 = vrot.slane %v866_v30, 7  ;;  %v903_v39 = vrot.slane %v867_v35, 7  ;;  %v904_v44 = vrot.slane %v868_v42, 7  ;;  %v876_v26 = vld [vmem:[%s4493_s30 + $0x80] sm:$0xff] }
  0x1a   : > { %v1035_v36 = vsel %vm1005_vm1, %v974_v33, %v975_v34  ;;  %v1036_v37 = vsel %vm1005_vm1, %v973_v29, %v974_v33  ;;  %v905_v45 = vrot.slane %v869_v43, 7  ;;  %v976_v48 = vrot.slane %v867_v35, 1 }
  0x1b   : > { %1055 = vperm.xlu1 %4385, %v966_v13   ;;  %1045 = vperm.xlu0 %4384, %v968_v14   ;;  %v961_v40 = vsel %vm932_vm0, %v902_v38, %v903_v39  ;;  %v962_v41 = vsel %vm932_vm0, %v901_v20, %v902_v38  ;;  %v960_v47 = vsel %vm932_vm0, %v903_v39, %v904_v44  ;;  %v977_v49 = vrot.slane %v868_v42, 1  ;;  %v874_v14 = vld [vmem:[%s4493_s30 + $0x70] sm:$0xff] }
  0x1c   : > { %v959_v46 = vsel %vm932_vm0, %v904_v44, %v905_v45  ;;  %v1034_v52 = vsel %vm1005_vm1, %v975_v34, %v976_v48  ;;  %v978_v53 = vrot.slane %v869_v43, 1  ;;  %v979_v54 = vrot.slane %v870_v50, 1 }
  0x1d   : > { %v1033_v51 = vsel %vm1005_vm1, %v976_v48, %v977_v49  ;;  %v906_v58 = vrot.slane %v870_v50, 7  ;;  %v907_v59 = vrot.slane %v871_v55, 7  ;;  %v908_v1 = vrot.slane %v872_v62, 7 }
  0x1e   : > { %v1031_v56 = vsel %vm1005_vm1, %v978_v53, %v979_v54  ;;  %v1032_v57 = vsel %vm1005_vm1, %v977_v49, %v978_v53  ;;  %v909_v3 = vrot.slane %v873_v63, 7  ;;  %v7860_v7 = vrot.slane %v4569_v5, 7 }
  0x1f   : > { %1060 = vperm.xlu1 %4385, %v965_v17   ;;  %1050 = vperm.xlu0 %4384, %v967_v18   ;;  %v957_v60 = vsel %vm932_vm0, %v906_v58, %v907_v59  ;;  %v958_v61 = vsel %vm932_vm0, %v905_v45, %v906_v58  ;;  %v956_v9 = vsel %vm932_vm0, %v907_v59, %v908_v1  ;;  %v980_v12 = vrot.slane %v871_v55, 1  ;;  %v4627_v45 = vld [vmem:[%s4493_s30 + $0xa0] sm:$0xff] }
  0x20   : > { %v955_v8 = vsel %vm932_vm0, %v908_v1, %v909_v3  ;;  %v4582_v10 = vsel %vm932_vm0, %v7860_v7, %v931_v11  ;;  %v981_v13 = vrot.slane %v872_v62, 1  ;;  %v982_v17 = vrot.slane %v873_v63, 1 }
  0x21   : > { %8025 = vst [vmem:[#allocation2_spill] sm:$0xff] %v4582_v10  ;;  %v983_v18 = vrot.slane %v874_v14, 1  ;;  %v4608_v33 = vadd.s32 16, %v4486_v2  ;;  %v984_v34 = vrot.slane %v875_v19, 1  ;;  %v320_v38 = vcvt.s32.f32 %v4486_v2 }
  0x22   : > { %v1028_v20 = vsel %vm1005_vm1, %v981_v13, %v982_v17  ;;  %v4618_v39 = vadd.s32 24, %v4486_v2  ;;  %v4915_v10 = vadd.s32 104, %v4486_v2 }
  0x23   : > { %1070 = vperm.xlu1 %4385, %v963_v21   ;;  %1065 = vperm.xlu0 %4384, %v964_v22   ;;  %v1027_v11 = vsel %vm1005_vm1, %v982_v17, %v983_v18  ;;  %v910_v21 = vrot.slane %v874_v14, 7  ;;  %v911_v22 = vrot.slane %v875_v19, 7  ;;  %v356_v53 = vadd.f32 0.5, %v320_v38 }
  0x25   : > { %v953_v23 = vsel %vm932_vm0, %v910_v21, %v911_v22  ;;  %v954_v25 = vsel %vm932_vm0, %v909_v3, %v910_v21  ;;  %v4660_v3 = vld [vmem:[%s4493_s30 + $0xb8] sm:$0xff] }
  0x27   : > { %1291 = vperm.xlu1 %4385, %v865_v16   ;;  %1286 = vperm.xlu0 %4384, %v864_v15   ;;  %v1029_v15 = vsel %vm1005_vm1, %v980_v12, %v981_v13  ;;  %v1030_v16 = vsel %vm1005_vm1, %v979_v54, %v980_v12  ;;  %v323_v54 = vcvt.s32.f32 %v4618_v39  ;;  %v4668_v13 = vld [vmem:[%s4493_s30 + $0xc0] sm:$0xff] }
  0x2b   : > { %1528 = vperm.xlu1 %4385, %v1039_v27   ;;  %1523 = vperm.xlu0 %4384, %v1040_v28   ;;  %v877_v27 = vld [vmem:[%s4493_s30 + $0x88] sm:$0xff]  ;;  %v912_v28 = vrot.slane %v876_v26, 7 }
  0x2c   : > { %v913_v29 = vrot.slane %v877_v27, 7 }
  0x2f   : > { %1538 = vperm.xlu1 %4385, %v1037_v31   ;;  %1533 = vperm.xlu0 %4384, %v1038_v32   ;;  %v952_v31 = vsel %vm932_vm0, %v911_v22, %v912_v28  ;;  %v4605_v32 = vadd.s32 8, %v4486_v2 }
  0x33   : > { %1548 = vperm.xlu1 %4385, %v1035_v36   ;;  %1543 = vperm.xlu0 %4384, %v1036_v37   ;;  %v4614_v36 = vadd.s32 32, %v4486_v2  ;;  %v985_v37 = vrot.slane %v876_v26, 1 }
  0x35   : > { %v324_v49 = vcvt.s32.f32 %v4614_v36  ;;  %v4819_v36 = vadd.s32 80, %v4486_v2 }
  0x37   : > { %1080 = vperm.xlu1 %4385, %v961_v40   ;;  %1075 = vperm.xlu0 %4384, %v962_v41   ;;  %v4621_v40 = vld [vmem:[%s4493_s30 + $0x98] sm:$0xff]  ;;  %v321_v41 = vcvt.s32.f32 %v4605_v32 }
  0x3b   : > { %1301 = vperm.xlu1 %4385, %v867_v35   ;;  %1296 = vperm.xlu0 %4384, %v866_v30   ;;  %v951_v30 = vsel %vm932_vm0, %v912_v28, %v913_v29  ;;  %v4611_v35 = vld [vmem:[%s4493_s30 + $0x90] sm:$0xff] }
  0x3c   : > { %v987_v44 = vrot.slane %v4611_v35, 1  ;;  %v914_v48 = vrot.slane %v4611_v35, 7 }
  0x3f   : > { %1090 = vperm.xlu1 %4385, %v959_v46   ;;  %1085 = vperm.xlu0 %4384, %v960_v47   ;;  %v4630_v46 = vld [vmem:[%s4493_s30 + $0xa8] sm:$0xff]  ;;  %v1026_v47 = vsel %vm1005_vm1, %v983_v18, %v984_v34 }
  0x43   : > { %1311 = vperm.xlu1 %4385, %v869_v43   ;;  %1306 = vperm.xlu0 %4384, %v868_v42   ;;  %v322_v42 = vcvt.s32.f32 %v4608_v33  ;;  %v986_v43 = vrot.slane %v877_v27, 1 }
  0x45   : > { %v358_v58 = vadd.f32 0.5, %v322_v42  ;;  %v1023_v59 = vsel %vm1005_vm1, %v986_v43, %v987_v44 }
  0x47   : > { %1558 = vperm.xlu1 %4385, %v1033_v51   ;;  %1553 = vperm.xlu0 %4384, %v1034_v52   ;;  %v915_v51 = vrot.slane %v4621_v40, 7  ;;  %v4640_v52 = vld [vmem:[%s4493_s30 + $0xb0] sm:$0xff] }
  0x48   : > { %v991_v1 = vrot.slane %v4640_v52, 1  ;;  %v918_v12 = vrot.slane %v4640_v52, 7 }
  0x49   : > { %v949_v17 = vsel %vm932_vm0, %v914_v48, %v915_v51 }
  0x4b   : > { %1568 = vperm.xlu1 %4385, %v1031_v56   ;;  %1563 = vperm.xlu0 %4384, %v1032_v57   ;;  %v917_v56 = vrot.slane %v4630_v46, 7  ;;  %v357_v57 = vadd.f32 0.5, %v321_v41 }
  0x4f   : > { %1100 = vperm.xlu1 %4385, %v957_v60   ;;  %1095 = vperm.xlu0 %4384, %v958_v61   ;;  %v988_v60 = vrot.slane %v4621_v40, 1  ;;  %v989_v61 = vrot.slane %v4627_v45, 1 }
  0x51   : > { %v4685_v21 = vsel %vm1005_vm1, %v988_v60, %v989_v61  ;;  %v4689_v22 = vsel %vm1005_vm1, %v987_v44, %v988_v60  ;;  %v4730_v60 = vld [vmem:[%s4493_s30 + $0xd8] sm:$0xff] }
  0x53   : > { %1321 = vperm.xlu1 %4385, %v871_v55   ;;  %1316 = vperm.xlu0 %4384, %v870_v50   ;;  %v1025_v50 = vsel %vm1005_vm1, %v984_v34, %v985_v37  ;;  %v916_v55 = vrot.slane %v4627_v45, 7 }
  0x55   : > { %v4679_v18 = vsel %vm932_vm0, %v916_v55, %v917_v56 }
  0x57   : > { %1110 = vperm.xlu1 %4385, %v955_v8   ;;  %1105 = vperm.xlu0 %4384, %v956_v9   ;;  %v360_v8 = vadd.f32 0.5, %v324_v49  ;;  %v950_v9 = vsel %vm932_vm0, %v913_v29, %v914_v48  ;;  %v4711_v48 = vadd.s32 40, %v4486_v2 }
  0x59   : > { %v396_v28 = vmul.f32 0.013888889, %v360_v8 }
  0x5b   : > { %1331 = vperm.xlu1 %4385, %v873_v63   ;;  %1326 = vperm.xlu0 %4384, %v872_v62   ;;  %v1024_v62 = vsel %vm1005_vm1, %v985_v37, %v986_v43  ;;  %v990_v63 = vrot.slane %v4630_v46, 1  ;;  %v992_v43 = vrot.slane %v4660_v3, 1 }
  0x5d   : > { %v4700_v29 = vsel %vm1005_vm1, %v989_v61, %v990_v63 }
  0x5f   : > { %1578 = vperm.xlu1 %4385, %v1029_v15   ;;  %1573 = vperm.xlu0 %4384, %v1030_v16   ;;  %v392_v15 = vmul.f32 0.013888889, %v356_v53  ;;  %v359_v16 = vadd.f32 0.5, %v323_v54  ;;  %v4721_v53 = vadd.s32 48, %v4486_v2 }
  0x61   : > { %v428_v34 = vfloor.f32 %v392_v15  ;;  %v395_v37 = vmul.f32 0.013888889, %v359_v16  ;;  %v7863_v0 = vcvt.s32.f32 %v4721_v53 }
  0x63   : > { %1588 = vperm.xlu1 %4385, %v1027_v11   ;;  %1583 = vperm.xlu0 %4384, %v1028_v20   ;;  %v394_v11 = vmul.f32 0.013888889, %v358_v58  ;;  %v948_v20 = vsel %vm932_vm0, %v915_v51, %v916_v55  ;;  %v4718_v51 = vadd.s32 64, %v4486_v2  ;;  %v4724_v55 = vadd.s32 56, %v4486_v2 }
  0x64   : > { %v431_v8 = vfloor.f32 %v395_v37  ;;  %v362_v32 = vadd.f32 0.5, %v7863_v0 }
  0x66   : > { %v467_v24 = vmul.f32 72.0, %v431_v8  ;;  %v4811_v8 = vadd.s32 96, %v4486_v2 }
  0x67   : > { %1120 = vperm.xlu1 %4385, %v953_v23   ;;  %1115 = vperm.xlu0 %4384, %v954_v25   ;;  %v919_v23 = vrot.slane %v4660_v3, 7  ;;  %v4694_v25 = vsel %vm1005_vm1, %v990_v63, %v991_v1  ;;  %v464_v63 = vmul.f32 72.0, %v428_v34  ;;  %v4760_v34 = vsel %vm1005_vm1, %v991_v1, %v992_v43 }
  0x6b   : > { %1341 = vperm.xlu1 %4385, %v875_v19   ;;  %1336 = vperm.xlu0 %4384, %v874_v14   ;;  %v4671_v14 = vld [vmem:[%s4493_s30 + $0xc8] sm:$0xff]  ;;  %v393_v19 = vmul.f32 0.013888889, %v357_v57 }
  0x6c   : > { %v994_v57 = vrot.slane %v4671_v14, 1 }
  0x6d   : > { %v429_v44 = vfloor.f32 %v393_v19  ;;  %v923_v19 = vrot.slane %v4730_v60, 7 }
  0x6f   : > { %1130 = vperm.xlu1 %4385, %v951_v30   ;;  %1125 = vperm.xlu0 %4384, %v952_v31   ;;  %v4704_v30 = vsel %vm932_vm0, %v917_v56, %v918_v12  ;;  %v4707_v31 = vld [vmem:[%s4493_s30 + $0xd0] sm:$0xff]  ;;  %v993_v56 = vrot.slane %v4668_v13, 1  ;;  %v465_v15 = vmul.f32 72.0, %v429_v44 }
  0x70   : > { %v7866_v58 = vrot.slane %v4707_v31, 1 }
  0x72   : > { %v4766_v37 = vsel %vm1005_vm1, %v994_v57, %v7866_v58 }
  0x73   : > { %1351 = vperm.xlu1 %4385, %v877_v27   ;;  %1346 = vperm.xlu0 %4384, %v876_v26   ;;  %v920_v26 = vrot.slane %v4668_v13, 7  ;;  %v921_v27 = vrot.slane %v4671_v14, 7 }
  0x75   : > { %v4734_v61 = vsel %vm932_vm0, %v920_v26, %v921_v27 }
  0x77   : > { %1598 = vperm.xlu1 %4385, %v1025_v50   ;;  %1593 = vperm.xlu0 %4384, %v1026_v47   ;;  %v430_v47 = vfloor.f32 %v394_v11  ;;  %v4715_v50 = vsel %vm932_vm0, %v918_v12, %v919_v23  ;;  %v4742_v12 = vld [vmem:[%s4493_s30 + $0xe0] sm:$0xff]  ;;  %v4747_v11 = vld [vmem:[%s4493_s30 + $0xe8] sm:$0xff] }
  0x78   : > { %8026 = vst [vmem:[#allocation3_spill] sm:$0xff] %v4742_v12  ;;  %8027 = vst [vmem:[#allocation4_spill] sm:$0xff] %v4747_v11  ;;  %v7861_v1 = vrot.slane %v4747_v11, 7 }
  0x79   : > { %v466_v16 = vmul.f32 72.0, %v430_v47  ;;  %v4775_v47 = vsub.f32 %v320_v38, %v464_v63  ;;  %v4808_v63 = vadd.s32 72, %v4486_v2 }
  0x7b   : > { %1608 = vperm.xlu1 %4385, %v1023_v59   ;;  %1603 = vperm.xlu0 %4384, %v1024_v62   ;;  %v432_v59 = vfloor.f32 %v396_v28  ;;  %v4738_v62 = vsel %vm932_vm0, %v919_v23, %v920_v26  ;;  %v7865_v28 = vcvt.s32.f32 %v4718_v51  ;;  %v7862_v23 = vcvt.s32.f32 %v4724_v55  ;;  %8028 = vst [vmem:[#allocation5_spill] sm:$0xff] %v4775_v47 }
  0x7c   : > { %v4756_v26 = vsel %vm1005_vm1, %v992_v43, %v993_v56  ;;  %v4780_v43 = vsub.f32 %v321_v41, %v465_v15  ;;  %vm536_vm2 = vcmp.lt.f32.partialorder %v4775_v47, 63.0  ;;  %v996_v15 = vrot.slane %v4730_v60, 1 }
  0x7d   : > { %v468_v44 = vmul.f32 72.0, %v432_v59  ;;  %v4784_v59 = vsub.f32 %v322_v42, %v466_v16  ;;  %v364_v38 = vadd.f32 0.5, %v7865_v28  ;;  %v363_v41 = vadd.f32 0.5, %v7862_v23 }
  0x7e   : > { %8029 = vst [vmem:[#allocation6_spill] sm:$0xff] %v4780_v43  ;;  %vm537_vm3 = vcmp.lt.f32.partialorder %v4780_v43, 63.0  ;;  %v7867_v16 = vmov 0.0   ;;  %v8043_v43 = vrot.slane %v4707_v31, 1 }
  0x7f   : > { %1140 = vperm.xlu1 %4385, %v949_v17   ;;  %1135 = vperm.xlu0 %4384, %v950_v9   ;;  %v922_v9 = vrot.slane %v4707_v31, 7  ;;  %v7864_v17 = vcvt.s32.f32 %v4711_v48  ;;  %8030 = vst [vmem:[#allocation7_spill] sm:$0xff] %v4784_v59  ;;  %v4801_v33 = vsub.f32 %v324_v49, %v468_v44  ;;  %vm538_vm4 = vcmp.lt.f32.partialorder %v4784_v59, 63.0  ;;  %v4912_v59 = vld [vmem:[%s4493_s30 + $0x108] sm:$0xff] }
  0x80   : > { %v400_v39 = vmul.f32 0.013888889, %v364_v38  ;;  %v4843_v44 = vsel %vm536_vm2, 1.0, %v7867_v16  ;;  %v4902_v47 = vsel %vm1005_vm1, %v8043_v43, %v996_v15 }
  0x81   : > { %8031 = vst [vmem:[#allocation8_spill] sm:$0xff] %v4801_v33  ;;  %v4805_v42 = vsel %vm932_vm0, %v921_v27, %v922_v9  ;;  %vm540_vm5 = vcmp.lt.f32.partialorder %v4801_v33, 63.0  ;;  %8034 = vst [vmem:[#allocation11_spill] sm:$0xff] %v4843_v44 }
  0x82   : > { %v436_v23 = vfloor.f32 %v400_v39  ;;  %v4871_v38 = vsel %vm540_vm5, 1.0, %v7867_v16  ;;  %8044 = vst [vmem:[#allocation19_spill] sm:$0xff] %v4902_v47 }
  0x83   : > { %1361 = vperm.xlu1 %4385, %v4621_v40   ;;  %1356 = vperm.xlu0 %4384, %v4611_v35   ;;  %v4770_v40 = vsel %vm1005_vm1, %v993_v56, %v994_v57  ;;  %v924_v35 = vrot.slane %v4742_v12, 7  ;;  %v361_v56 = vadd.f32 0.5, %v7864_v17  ;;  %v4790_v57 = vsel %vm932_vm0, %v922_v9, %v923_v19  ;;  %8037 = vst [vmem:[#allocation14_spill] sm:$0xff] %v4871_v38 }
  0x84   : > { %v399_v9 = vmul.f32 0.013888889, %v363_v41  ;;  %v4860_v41 = vsel %vm538_vm4, 1.0, %v7867_v16 }
  0x85   : > { %v4825_v49 = vsel %vm932_vm0, %v924_v35, %v7861_v1  ;;  %v397_v27 = vmul.f32 0.013888889, %v361_v56  ;;  %v7878_v56 = vcvt.s32.f32 %v4811_v8  ;;  %8036 = vst [vmem:[#allocation13_spill] sm:$0xff] %v4860_v41 }
  0x86   : > { %v435_v28 = vfloor.f32 %v399_v9  ;;  %v4894_v9 = vadd.s32 112, %v4486_v2 }
  0x87   : > { %1150 = vperm.xlu1 %4385, %v4679_v18   ;;  %1145 = vperm.xlu0 %4384, %v948_v20   ;;  %v4816_v18 = vsub.f32 %v323_v54, %v467_v24  ;;  %v4828_v20 = vld [vmem:[%s4493_s30 + $0xf0] sm:$0xff]  ;;  %v4834_v24 = vsel %vm932_vm0, %v923_v19, %v924_v35  ;;  %v398_v54 = vmul.f32 0.013888889, %v362_v32  ;;  %v7869_v19 = vcvt.s32.f32 %v4808_v63 }
  0x88   : > { %8033 = vst [vmem:[#allocation10_spill] sm:$0xff] %v4834_v24  ;;  %v997_v35 = vrot.slane %v4742_v12, 1  ;;  %v4855_v32 = vsel %vm537_vm3, 1.0, %v7867_v16  ;;  %v433_v0 = vfloor.f32 %v397_v27  ;;  %v4879_v27 = vadd.s32 88, %v4486_v2 }
  0x89   : > { %8032 = vst [vmem:[#allocation9_spill] sm:$0xff] %v4816_v18  ;;  %vm539_vm6 = vcmp.lt.f32.partialorder %v4816_v18, 63.0  ;;  %8035 = vst [vmem:[#allocation12_spill] sm:$0xff] %v4855_v32  ;;  %v434_v17 = vfloor.f32 %v398_v54  ;;  %v368_v54 = vadd.f32 0.5, %v7878_v56  ;;  %v8045_v33 = vrot.slane %v4828_v20, 1 }
  0x8a   : > { %v4874_v58 = vsel %vm539_vm6, 1.0, %v7867_v16  ;;  %v4883_v39 = vsel %vm1005_vm1, %v996_v15, %v997_v35  ;;  %v8042_v16 = vcvt.s32.f32 %v4819_v36  ;;  %v926_v56 = vrot.slane %v4828_v20, 7 }
  0x8b   : > { %1371 = vperm.xlu1 %4385, %v4630_v46   ;;  %1366 = vperm.xlu0 %4384, %v4627_v45   ;;  %v998_v46 = vrot.slane %v4747_v11, 1  ;;  %8038 = vst [vmem:[#allocation15_spill] sm:$0xff] %v4874_v58  ;;  %v365_v45 = vadd.f32 0.5, %v7869_v19  ;;  %8039 = vst [vmem:[#allocation16_spill] sm:$0xff] %v4883_v39  ;;  %v472_v58 = vmul.f32 72.0, %v436_v23  ;;  %v469_v43 = vmul.f32 72.0, %v433_v0 }
  0x8c   : > { %v366_v19 = vadd.f32 0.5, %v8042_v16  ;;  %v470_v15 = vmul.f32 72.0, %v434_v17  ;;  %v471_v41 = vmul.f32 72.0, %v435_v28  ;;  %v404_v39 = vmul.f32 0.013888889, %v368_v54 }
  0x8d   : > { %v4908_v18 = vsel %vm1005_vm1, %v998_v46, %v8045_v33  ;;  %v401_v38 = vmul.f32 0.013888889, %v365_v45  ;;  %v4930_v0 = vsel %vm1005_vm1, %v997_v35, %v998_v46  ;;  %v4937_v17 = vadd.s32 120, %v4486_v2 }
  0x8e   : > { %v4862_v7 = vpop.permute.xlu1 %1271  ;;  %v4864_v1 = vpop.permute.xlu0 %1266  ;;  %8046 = vst [vmem:[#allocation20_spill] sm:$0xff] %v4908_v18  ;;  %v402_v23 = vmul.f32 0.013888889, %v366_v19  ;;  %8047 = vst [vmem:[#allocation21_spill] sm:$0xff] %v4930_v0  ;;  %v8048_v54 = vcvt.s32.f32 %v4718_v51  ;;  %v8050_v19 = vcvt.s32.f32 %v4711_v48  ;;  %v8052_v46 = vcvt.s32.f32 %v4721_v53 }
  0x8f   : > { %1618 = vperm.xlu1 %4385, %v4685_v21   ;;  %1613 = vperm.xlu0 %4384, %v4689_v22   ;;  %v4886_v21 = vld [vmem:[%s4493_s30 + $0xf8] sm:$0xff]  ;;  %v4889_v22 = vld [vmem:[%s4493_s30 + $0x100] sm:$0xff]  ;;  %v8057_v48 = vrot.slane %v4747_v11, 7  ;;  %v437_v53 = vfloor.f32 %v401_v38 }
  0x90   : > { %8040 = vst [vmem:[#allocation17_spill] sm:$0xff] %v4886_v21  ;;  %8041 = vst [vmem:[#allocation18_spill] sm:$0xff] %v4889_v22  ;;  %v927_v33 = vrot.slane %v4886_v21, 7  ;;  %v928_v32 = vrot.slane %v4889_v22, 7  ;;  %v4945_v12 = vsub.f32 %v8048_v54, %v472_v58  ;;  %v4949_v35 = vsub.f32 %v8050_v19, %v469_v43 }
  0x91   : > { %v4953_v47 = vsub.f32 %v8052_v46, %v470_v15  ;;  %v4969_v58 = vsel %vm932_vm0, %v8057_v48, %v926_v56  ;;  %v8059_v43 = vcvt.s32.f32 %v4879_v27  ;;  %v8062_v15 = vcvt.s32.f32 %v4894_v9 }
  0x92   : > { %v4917_v16 = vpop.permute.xlu1 %1281  ;;  %v4919_v44 = vpop.permute.xlu0 %1276  ;;  %8049 = vst [vmem:[#allocation22_spill] sm:$0xff] %v4945_v12  ;;  %8051 = vst [vmem:[#allocation23_spill] sm:$0xff] %v4949_v35  ;;  %v4963_v51 = vsel %vm932_vm0, %v926_v56, %v927_v33  ;;  %v438_v54 = vfloor.f32 %v402_v23  ;;  %v8063_v56 = vcvt.s32.f32 %v4915_v10  ;;  %v4986_v48 = vadd.s32 144, %v4486_v2 }
  0x93   : > { %1628 = vperm.xlu1 %4385, %v4694_v25   ;;  %1623 = vperm.xlu0 %4384, %v4700_v29   ;;  %v4933_v25 = vadd.s32 128, %v4486_v2  ;;  %8053 = vst [vmem:[#allocation24_spill] sm:$0xff] %v4953_v47  ;;  %v8054_v29 = vcvt.s32.f32 %v4724_v55  ;;  %8056 = vst [vmem:[#allocation26_spill] sm:$0xff] %v4963_v51  ;;  %v367_v55 = vadd.f32 0.5, %v8059_v43  ;;  %vm544_vm7 = vcmp.lt.f32.partialorder %v4945_v12, 63.0 }
  0x94   : > { %8058 = vst [vmem:[#allocation27_spill] sm:$0xff] %v4969_v58  ;;  %v369_v46 = vadd.f32 0.5, %v8063_v56  ;;  %vm541_vm8 = vcmp.lt.f32.partialorder %v4949_v35, 63.0  ;;  %vm542_vm9 = vcmp.lt.f32.partialorder %v4953_v47, 63.0  ;;  %v473_v23 = vmul.f32 72.0, %v437_v53 }
  0x95   : > { %v4957_v18 = vsub.f32 %v8054_v29, %v471_v41  ;;  %v8060_v41 = vrot.slane %v4912_v59, 7  ;;  %v370_v29 = vadd.f32 0.5, %v8062_v15  ;;  %v5000_v15 = vadd.s32 136, %v4486_v2 }
  0x96   : > { %v4939_v28 = vpop.permute.xlu1 %1055  ;;  %v4941_v45 = vpop.permute.xlu0 %1045  ;;  %v1001_v56 = vrot.slane %v4889_v22, 1  ;;  %v8064_v51 = vcvt.s32.f32 %v4933_v25  ;;  %v405_v11 = vmul.f32 0.013888889, %v369_v46 }
  0x97   : > { %8055 = vst [vmem:[#allocation25_spill] sm:$0xff] %v4957_v18  ;;  %1160 = vperm.xlu1 %4385, %v4715_v50   ;;  %1155 = vperm.xlu0 %4384, %v4704_v30   ;;  %v4977_v50 = vsel %vm932_vm0, %v928_v32, %v8060_v41  ;;  %v440_v30 = vfloor.f32 %v404_v39  ;;  %vm543_vm10 = vcmp.lt.f32.partialorder %v4957_v18, 63.0  ;;  %v1000_v39 = vrot.slane %v4886_v21, 1 }
  0x98   : > { %8061 = vst [vmem:[#allocation28_spill] sm:$0xff] %v4977_v50  ;;  %v403_v41 = vmul.f32 0.013888889, %v367_v55  ;;  %v406_v19 = vmul.f32 0.013888889, %v370_v29  ;;  %v474_v50 = vmul.f32 72.0, %v438_v54  ;;  %v8075_v18 = vcvt.s32.f32 %v4819_v36 }
  0x99   : > { %v476_v38 = vmul.f32 72.0, %v440_v30  ;;  %v372_v0 = vadd.f32 0.5, %v8064_v51  ;;  %v8066_v55 = vmov 0.0   ;;  %v5019_v30 = vsel %vm932_vm0, %v927_v33, %v928_v32 }
  0x9a   : > { %v4988_v43 = vpop.permute.xlu1 %1060  ;;  %v4990_v58 = vpop.permute.xlu0 %1050  ;;  %v5015_v22 = vsel %vm544_vm7, 1.0, %v8066_v55  ;;  %v5024_v51 = vsel %vm541_vm8, 1.0, %v8066_v55  ;;  %v5029_v29 = vsel %vm542_vm9, 1.0, %v8066_v55  ;;  %v5036_v54 = vsel %vm543_vm10, 1.0, %v8066_v55 }
  0x9b   : > { %1381 = vperm.xlu1 %4385, %v4660_v3   ;;  %1376 = vperm.xlu0 %4384, %v4640_v52   ;;  %v8065_v3 = vcvt.s32.f32 %v4937_v17  ;;  %8067 = vst [vmem:[#allocation29_spill] sm:$0xff] %v5015_v22  ;;  %8068 = vst [vmem:[#allocation30_spill] sm:$0xff] %v5024_v51  ;;  %v8071_v32 = vcvt.s32.f32 %v4808_v63  ;;  %v439_v46 = vfloor.f32 %v403_v41  ;;  %v5045_v52 = vsel %vm1005_vm1, %v1000_v39, %v1001_v56 }
  0x9c   : > { %8069 = vst [vmem:[#allocation31_spill] sm:$0xff] %v5029_v29  ;;  %8070 = vst [vmem:[#allocation32_spill] sm:$0xff] %v5036_v54  ;;  %v5053_v35 = vsub.f32 %v8075_v18, %v474_v50  ;;  %v408_v47 = vmul.f32 0.013888889, %v372_v0  ;;  %v441_v63 = vfloor.f32 %v405_v11  ;;  %v8077_v41 = vcvt.s32.f32 %v4986_v48 }
  0x9d   : > { %v371_v24 = vadd.f32 0.5, %v8065_v3  ;;  %v5040_v33 = vsub.f32 %v8071_v32, %v473_v23  ;;  %v8078_v29 = vrot.slane %v4828_v20, 1  ;;  %v7893_v36 = vrot.slane %v4569_v5, 1 }
  0x9e   : > { %v5008_v21 = vpop.permute.xlu1 %1070  ;;  %v5010_v53 = vpop.permute.xlu0 %1065  ;;  %8076 = vst [vmem:[#allocation35_spill] sm:$0xff] %v5053_v35  ;;  %v374_v32 = vadd.f32 0.5, %v8077_v41  ;;  %v475_v11 = vmul.f32 72.0, %v439_v46  ;;  %v8079_v0 = vcvt.s32.f32 %v5000_v15  ;;  %vm546_vm13 = vcmp.lt.f32.partialorder %v5053_v35, 63.0  ;;  %v5082_v46 = vld [vmem:[%s7850_s1 + $0x1] ss:$0 sm:$0xff] }
  0x9f   : > { %1170 = vperm.xlu1 %4385, %v4734_v61   ;;  %1165 = vperm.xlu0 %4384, %v4738_v62   ;;  %8072 = vst [vmem:[#allocation33_spill] sm:$0xff] %v5040_v33  ;;  %v8073_v61 = vcvt.s32.f32 %v4811_v8  ;;  %v442_v62 = vfloor.f32 %v406_v19  ;;  %v407_v23 = vmul.f32 0.013888889, %v371_v24  ;;  %v5061_v8 = vsel %vm1005_vm1, %v8078_v29, %v1000_v39 }
  0xa0   : > { %v1002_v19 = vrot.slane %v4912_v59, 1  ;;  %vm545_vm11 = vcmp.lt.f32.partialorder %v5040_v33, 63.0  ;;  %v5070_v24 = vadd.s32 160, %v4486_v2  ;;  %v373_v50 = vadd.f32 0.5, %v8079_v0 }
  0xa1   : > { %v5049_v12 = vsub.f32 %v8073_v61, %v476_v38  ;;  %v478_v38 = vmul.f32 72.0, %v442_v62  ;;  %v5077_v39 = vadd.s32 152, %v4486_v2  ;;  %v477_v29 = vmul.f32 72.0, %v441_v63 }
  0xa2   : > { %v1292_v3 = vpop.permute.xlu1 %1291  ;;  %v1287_v54 = vpop.permute.xlu0 %1286  ;;  %v410_v61 = vmul.f32 0.013888889, %v374_v32  ;;  %v5088_v62 = vsel %vm1005_vm1, %v1002_v19, %v7893_v36  ;;  %v5092_v0 = vsel %vm1005_vm1, %v1001_v56, %v1002_v19  ;;  %v8081_v63 = vrot.slane %v4912_v59, 7  ;;  %v5113_v56 = vld [vmem:[%s7850_s1] ss:$0 sm:$0xff] }
  0xa3   : > { %8074 = vst [vmem:[#allocation34_spill] sm:$0xff] %v5049_v12  ;;  %1391 = vperm.xlu1 %4385, %v4671_v14   ;;  %1386 = vperm.xlu0 %4384, %v4668_v13   ;;  %vm548_vm12 = vcmp.lt.f32.partialorder %v5049_v12, 63.0  ;;  %v444_v14 = vfloor.f32 %v408_v47  ;;  %v443_v13 = vfloor.f32 %v407_v23  ;;  %v8080_v47 = vrot.slane %v4569_v5, 7 }
  0xa4   : > { %v8082_v32 = vrot.slane %v4497_v4, 1  ;;  %v8083_v51 = vrot.slane %v4502_v6, 1  ;;  %v5120_v19 = vsel %vm545_vm11, 1.0, %v8066_v55  ;;  %v5125_v4 = vsel %vm546_vm13, 1.0, %v8066_v55 }
  0xa5   : > { %v5100_v23 = vsel %vm932_vm0, %v8081_v63, %v8080_v47  ;;  %8084 = vst [vmem:[#allocation36_spill] sm:$0xff] %v5120_v19  ;;  %8085 = vst [vmem:[#allocation37_spill] sm:$0xff] %v5125_v4  ;;  %v5128_v47 = vmul.f32 0.013888889, %v373_v50  ;;  %v7900_v35 = vcvt.s32.f32 %v5077_v39  ;;  %v480_v4 = vmul.f32 72.0, %v444_v14 }
  0xa6   : > { %v1529_v41 = vpop.permute.xlu1 %1528  ;;  %v1524_v18 = vpop.permute.xlu0 %1523  ;;  %v5108_v36 = vsel %vm1005_vm1, %v8083_v51, %v8082_v32  ;;  %v8089_v32 = vcvt.s32.f32 %v4879_v27  ;;  %v8091_v51 = vcvt.s32.f32 %v4915_v10  ;;  %v479_v19 = vmul.f32 72.0, %v443_v13  ;;  %v5159_v10 = vld [vmem:[%s7850_s1 + $0x2] ss:$0 sm:$0xff] }
  0xa7   : > { %1638 = vperm.xlu1 %4385, %v4756_v26   ;;  %1633 = vperm.xlu0 %4384, %v4760_v34   ;;  %v5133_v26 = vsel %vm548_vm12, 1.0, %v8066_v55  ;;  %v8087_v34 = vcvt.s32.f32 %v4894_v9  ;;  %v446_v22 = vfloor.f32 %v410_v61  ;;  %v1449_v12 = vmul.f32 %v5082_v46, %v4862_v7 }
  0xa8   : > { %8086 = vst [vmem:[#allocation38_spill] sm:$0xff] %v5133_v26  ;;  %v5141_v33 = vsub.f32 %v8089_v32, %v475_v11  ;;  %v5146_v50 = vsub.f32 %v8091_v51, %v477_v29  ;;  %v1448_v9 = vmul.f32 %v5082_v46, %v4864_v1  ;;  %v1451_v27 = vmul.f32 %v5082_v46, %v4917_v16 }
  0xa9   : > { %v5137_v63 = vsub.f32 %v8087_v34, %v478_v38  ;;  %v1227_v11 = vmul.f32 %v5113_v56, %v4941_v45  ;;  %v1450_v29 = vmul.f32 %v5082_v46, %v4919_v44  ;;  %v1228_v7 = vmul.f32 %v5113_v56, %v4990_v58 }
  0xaa   : > { %8090 = vst [vmem:[#allocation40_spill] sm:$0xff] %v5141_v33  ;;  %8092 = vst [vmem:[#allocation41_spill] sm:$0xff] %v5146_v50  ;;  %v1539_v38 = vpop.permute.xlu1 %1538  ;;  %v1534_v14 = vpop.permute.xlu0 %1533  ;;  %v8093_v1 = vcvt.s32.f32 %v5070_v24  ;;  %v445_v45 = vfloor.f32 %v5128_v47  ;;  %v1229_v13 = vmul.f32 %v5113_v56, %v4939_v28  ;;  %v1230_v61 = vmul.f32 %v5113_v56, %v4988_v43 }
  0xab   : > { %8088 = vst [vmem:[#allocation39_spill] sm:$0xff] %v5137_v63  ;;  %1648 = vperm.xlu1 %4385, %v4766_v37   ;;  %v1453_v51 = vmul.f32 %v5082_v46, %v1292_v3  ;;  %1643 = vperm.xlu0 %4384, %v4770_v40   ;;  %v375_v44 = vadd.f32 0.5, %v7900_v35  ;;  %v1452_v37 = vmul.f32 %v5082_v46, %v1287_v54  ;;  %v482_v47 = vmul.f32 72.0, %v446_v22 }
  0xac   : > { %v376_v16 = vadd.f32 0.5, %v8093_v1  ;;  %v1706_v58 = vmul.f32 %v5159_v10, %v1529_v41  ;;  %v1705_v34 = vmul.f32 %v5159_v10, %v1524_v18  ;;  %v1484_v32 = vadd.f32 %v1448_v9, %v1227_v11 }
  0xad   : > { %v1232_v28 = vmul.f32 %v5113_v56, %v5008_v21  ;;  %v1708_v43 = vmul.f32 %v5159_v10, %v1539_v38  ;;  %v1707_v3 = vmul.f32 %v5159_v10, %v1534_v14  ;;  %v1485_v26 = vadd.f32 %v1449_v12, %v1228_v7 }
  0xae   : > { %v1549_v1 = vpop.permute.xlu1 %1548  ;;  %v1544_v40 = vpop.permute.xlu0 %1543  ;;  %v1231_v35 = vmul.f32 %v5113_v56, %v5010_v53  ;;  %v1486_v22 = vadd.f32 %v1450_v29, %v1229_v13  ;;  %v1487_v18 = vadd.f32 %v1451_v27, %v1230_v61  ;;  %v412_v21 = vmul.f32 0.013888889, %v376_v16  ;;  %v5196_v53 = vld [vmem:[%s7851_s2] ss:$0 sm:$0xff] }
  0xaf   : > { %v1710_v54 = vmul.f32 %v5159_v10, %v1549_v1  ;;  %v1709_v41 = vmul.f32 %v5159_v10, %v1544_v40  ;;  %1180 = vperm.xlu1 %4385, %v4790_v57   ;;  %v1489_v9 = vadd.f32 %v1453_v51, %v1232_v28  ;;  %1175 = vperm.xlu0 %4384, %v4805_v42   ;;  %v5191_v12 = vadd.s32 176, %v4486_v2 }
  0xb0   : > { %v1488_v11 = vadd.f32 %v1452_v37, %v1231_v35  ;;  %v1742_v38 = vadd.f32 %v1706_v58, %v1485_v26  ;;  %v1741_v14 = vadd.f32 %v1705_v34, %v1484_v32  ;;  %v1744_v7 = vadd.f32 %v1708_v43, %v1487_v18  ;;  %v8100_v43 = vld [vmem:[#allocation10_spill] sm:$0xff] }
  0xb1   : > { %v1743_v1 = vadd.f32 %v1707_v3, %v1486_v22  ;;  %vm550_vm14 = vcmp.lt.f32.partialorder %v5137_v63, 63.0  ;;  %vm547_vm15 = vcmp.lt.f32.partialorder %v5141_v33, 63.0  ;;  %v1746_v42 = vadd.f32 %v1710_v54, %v1489_v9 }
  0xb2   : > { %v5198_v57 = vpop.permute.xlu1 %1080  ;;  %v5200_v27 = vpop.permute.xlu0 %1075  ;;  %v1745_v35 = vadd.f32 %v1709_v41, %v1488_v11  ;;  %v8094_v26 = vcvt.s32.f32 %v4933_v25  ;;  %vm549_vm2 = vcmp.lt.f32.partialorder %v5146_v50, 63.0  ;;  %v8096_v16 = vcvt.s32.f32 %v4937_v17 }
  0xb3   : > { %1401 = vperm.xlu1 %4385, %v4730_v60   ;;  %1396 = vperm.xlu0 %4384, %v4707_v31   ;;  %v8098_v61 = vcvt.s32.f32 %v4986_v48  ;;  %v481_v37 = vmul.f32 72.0, %v445_v45  ;;  %v411_v58 = vmul.f32 0.013888889, %v375_v44  ;;  %v1785_v60 = vadd.f32 %v5196_v53, %v1742_v38 }
  0xb4   : > { %v5207_v29 = vsub.f32 %v8094_v26, %v480_v4  ;;  %v5213_v13 = vsub.f32 %v8096_v16, %v479_v19  ;;  %v1784_v25 = vadd.f32 %v5196_v53, %v1741_v14  ;;  %v448_v4 = vfloor.f32 %v412_v21 }
  0xb5   : > { %v5217_v51 = vsub.f32 %v8098_v61, %v482_v47  ;;  %v7901_v34 = vcvt.s32.f32 %v5191_v12  ;;  %v1787_v32 = vadd.f32 %v5196_v53, %v1744_v7  ;;  %v1786_v31 = vadd.f32 %v5196_v53, %v1743_v1  ;;  %v8104_v1 = vld [vmem:[#allocation3_spill] sm:$0xff] }
  0xb6   : > { %8095 = vst [vmem:[#allocation42_spill] sm:$0xff] %v5207_v29  ;;  %8097 = vst [vmem:[#allocation43_spill] sm:$0xff] %v5213_v13  ;;  %v1302_v17 = vpop.permute.xlu1 %1301  ;;  %v1297_v19 = vpop.permute.xlu0 %1296  ;;  %v5227_v48 = vsel %vm550_vm14, 1.0, %v8066_v55  ;;  %v5232_v45 = vsel %vm547_vm15, 1.0, %v8066_v55  ;;  %v1789_v44 = vadd.f32 %v5196_v53, %v1746_v42  ;;  %v1788_v47 = vadd.f32 %v5196_v53, %v1745_v35 }
  0xb7   : > { %8099 = vst [vmem:[#allocation44_spill] sm:$0xff] %v5217_v51  ;;  %1190 = vperm.xlu1 %4385, %v4825_v49   ;;  %vm552_vm3 = vcmp.lt.f32.partialorder %v5207_v29, 63.0  ;;  %v5241_v28 = vsel %vm549_vm2, 1.0, %v8066_v55  ;;  %1185 = vperm.xlu0 %4384, %v8100_v43   ;;  %vm551_vm4 = vcmp.lt.f32.partialorder %v5213_v13, 63.0  ;;  %vm554_vm5 = vcmp.lt.f32.partialorder %v5217_v51, 63.0  ;;  %v8115_v51 = vld [vmem:[#allocation21_spill] sm:$0xff] }
  0xb8   : > { %v8101_v3 = vcvt.s32.f32 %v5000_v15  ;;  %v447_v54 = vfloor.f32 %v411_v58  ;;  %v1857_v41 = vmul.f32 0.01, %v1785_v60  ;;  %v1856_v49 = vmul.f32 0.01, %v1784_v25  ;;  %v8103_v15 = vld [vmem:[#allocation4_spill] sm:$0xff] }
  0xb9   : > { %v484_v22 = vmul.f32 72.0, %v448_v4  ;;  %v378_v18 = vadd.f32 0.5, %v7901_v34  ;;  %vm1821_vm6 = vcmp.gt.f32.partialorder %v1785_v60, 0.0  ;;  %vm1820_vm7 = vcmp.gt.f32.partialorder %v1784_v25, 0.0 }
  0xba   : > { %v5248_v40 = vsub.f32 %v8101_v3, %v481_v37  ;;  %v1859_v9 = vmul.f32 0.01, %v1787_v32  ;;  %v1858_v21 = vmul.f32 0.01, %v1786_v31  ;;  %v1091_v11 = vpop.permute.xlu1 %1090  ;;  %v1086_v38 = vpop.permute.xlu0 %1085  ;;  %vm1823_vm8 = vcmp.gt.f32.partialorder %v1787_v32, 0.0 }
  0xbb   : > { %vm1822_vm9 = vcmp.gt.f32.partialorder %v1786_v31, 0.0  ;;  %v1861_v14 = vmul.f32 0.01, %v1789_v44  ;;  %v1860_v7 = vmul.f32 0.01, %v1788_v47  ;;  %1411 = vperm.xlu1 %4385, %v8103_v15   ;;  %vm1825_vm10 = vcmp.gt.f32.partialorder %v1789_v44, 0.0  ;;  %1406 = vperm.xlu0 %4384, %v8104_v1  }
  0xbc   : > { %8102 = vst [vmem:[#allocation10_spill] sm:$0xff] %v5248_v40  ;;  %vm1824_vm11 = vcmp.gt.f32.partialorder %v1788_v47, 0.0  ;;  %v483_v42 = vmul.f32 72.0, %v447_v54  ;;  %v5255_v35 = vadd.s32 192, %v4486_v2  ;;  %v5258_v26 = vsel %vm1821_vm6, %v1785_v60, %v1857_v41  ;;  %v8108_v15 = vld [vmem:[#allocation16_spill] sm:$0xff] }
  0xbd   : > { %v5261_v16 = vsel %vm1820_vm7, %v1784_v25, %v1856_v49  ;;  %v5266_v61 = vsel %vm552_vm3, 1.0, %v8066_v55  ;;  %v8106_v37 = vcvt.s32.f32 %v5070_v24  ;;  %v5272_v4 = vsel %vm1823_vm8, %v1787_v32, %v1859_v9 }
  0xbe   : > { %8105 = vst [vmem:[#allocation4_spill] sm:$0xff] %v5261_v16  ;;  %v5274_v43 = vsel %vm1822_vm9, %v1786_v31, %v1858_v21  ;;  %v1312_v3 = vpop.permute.xlu1 %1311  ;;  %v1307_v54 = vpop.permute.xlu0 %1306  ;;  %v414_v60 = vmul.f32 0.013888889, %v378_v18  ;;  %v5277_v41 = vadd.s32 168, %v4486_v2  ;;  %v5279_v25 = vsel %vm1825_vm10, %v1789_v44, %v1861_v14  ;;  %v8110_v44 = vld [vmem:[#allocation19_spill] sm:$0xff] }
  0xbf   : > { %v5270_v58 = vsub.f32 %v8106_v37, %v484_v22  ;;  %v5281_v49 = vsel %vm1824_vm11, %v1788_v47, %v1860_v7  ;;  %1658 = vperm.xlu1 %4385, %v8108_v15   ;;  %v5287_v24 = vsel %vm551_vm4, 1.0, %v8066_v55  ;;  %v5292_v32 = vsel %vm554_vm5, 1.0, %v8066_v55  ;;  %1653 = vperm.xlu0 %4384, %v8110_v44   ;;  %v8113_v22 = vld [vmem:[#allocation20_spill] sm:$0xff] }
  0xc0   : > { %8109 = vst [vmem:[#allocation16_spill] sm:$0xff] %v5292_v32  ;;  %v1929_v31 = vrot.slane %v5258_v26, 1  ;;  %vm553_vm12 = vcmp.lt.f32.partialorder %v5248_v40, 63.0  ;;  %v8111_v47 = vcvt.s32.f32 %v5077_v39  ;;  %v1931_v21 = vrot.slane %v5272_v4, 1 }
  0xc1   : > { %8107 = vst [vmem:[#allocation3_spill] sm:$0xff] %v5270_v58  ;;  %v1930_v14 = vrot.slane %v5274_v43, 1  ;;  %v1455_v7 = vmul.f32 %v5082_v46, %v1302_v17  ;;  %v1454_v1 = vmul.f32 %v5082_v46, %v1297_v19  ;;  %vm556_vm13 = vcmp.lt.f32.partialorder %v5270_v58, 63.0 }
  0xc2   : > { %v5300_v18 = vsub.f32 %v8111_v47, %v483_v42  ;;  %v1932_v15 = vrot.slane %v5281_v49, 1  ;;  %v1559_v44 = vpop.permute.xlu1 %1558  ;;  %v1554_v39 = vpop.permute.xlu0 %1553  ;;  %v450_v42 = vfloor.f32 %v414_v60  ;;  %v1234_v34 = vmul.f32 %v5113_v56, %v5198_v57 }
  0xc3   : > { %v1233_v9 = vmul.f32 %v5113_v56, %v5200_v27  ;;  %v1712_v17 = vmul.f32 %v5159_v10, %v1559_v44  ;;  %v1711_v19 = vmul.f32 %v5159_v10, %v1554_v39  ;;  %1668 = vperm.xlu1 %4385, %v8113_v22   ;;  %v8114_v37 = vrot.slane %v5261_v16, 1  ;;  %1663 = vperm.xlu0 %4384, %v8115_v51  }
  0xc4   : > { %8112 = vst [vmem:[#allocation19_spill] sm:$0xff] %v5300_v18  ;;  %v1457_v60 = vmul.f32 %v5082_v46, %v1312_v3  ;;  %v1456_v47 = vmul.f32 %v5082_v46, %v1307_v54  ;;  %v8116_v57 = vcvt.s32.f32 %v5255_v35  ;;  %v1996_v44 = vsel %vm1005_vm1, %v1930_v14, %v1931_v21 }
  0xc5   : > { %v1998_v29 = vsel %vm1005_vm1, %v8114_v37, %v1929_v31  ;;  %v1491_v39 = vadd.f32 %v1455_v7, %v1234_v34  ;;  %v1490_v13 = vadd.f32 %v1454_v1, %v1233_v9  ;;  %v1997_v22 = vsel %vm1005_vm1, %v1929_v31, %v1930_v14  ;;  %v8118_v14 = vld [vmem:[#allocation26_spill] sm:$0xff] }
  0xc6   : > { %v380_v27 = vadd.f32 0.5, %v8116_v57  ;;  %v8117_v50 = vrot.slane %v5279_v25, 1  ;;  %v1236_v54 = vmul.f32 %v5113_v56, %v1091_v11  ;;  %v1235_v51 = vmul.f32 %v5113_v56, %v1086_v38  ;;  %v1569_v37 = vpop.permute.xlu1 %1568  ;;  %v1564_v63 = vpop.permute.xlu0 %1563 }
  0xc7   : > { %v1995_v57 = vsel %vm1005_vm1, %v1931_v21, %v1932_v15  ;;  %v1748_v33 = vadd.f32 %v1712_v17, %v1491_v39  ;;  %v1747_v34 = vadd.f32 %v1711_v19, %v1490_v13  ;;  %v1714_v9 = vmul.f32 %v5159_v10, %v1569_v37  ;;  %1200 = vperm.xlu1 %4385, %v8118_v14   ;;  %v8129_v37 = vld [vmem:[#allocation13_spill] sm:$0xff] }
  0xc8   : > { %v1994_v3 = vsel %vm1005_vm1, %v1932_v15, %v8117_v50  ;;  %v1713_v31 = vmul.f32 %v5159_v10, %v1564_v63  ;;  %v1493_v7 = vadd.f32 %v1457_v60, %v1236_v54  ;;  %v1492_v1 = vadd.f32 %v1456_v47, %v1235_v51  ;;  %v8119_v50 = vld [vmem:[#allocation27_spill] sm:$0xff] }
  0xc9   : > { %1195 = vperm.xlu0 %4384, %v8119_v50   ;;  %vm555_vm14 = vcmp.lt.f32.partialorder %v5300_v18, 63.0  ;;  %v486_v11 = vmul.f32 72.0, %v450_v42  ;;  %v2002_v38 = vmax.f32 %v5274_v43, %v1996_v44  ;;  %v2004_v32 = vmax.f32 %v5281_v49, %v1994_v3  ;;  %v8120_v43 = vld [vmem:[#allocation17_spill] sm:$0xff]  ;;  %v8127_v3 = vld [vmem:[#allocation14_spill] sm:$0xff] }
  0xca   : > { %v2001_v21 = vmax.f32 %v5258_v26, %v1997_v22  ;;  %v2003_v13 = vmax.f32 %v5272_v4, %v1995_v57  ;;  %v2000_v15 = vmax.f32 %v5261_v16, %v1998_v29  ;;  %v1750_v63 = vadd.f32 %v1714_v9, %v1493_v7  ;;  %v5349_v19 = vpop.permute.xlu1 %1100  ;;  %v5351_v47 = vpop.permute.xlu0 %1095 }
  0xcb   : > { %v1749_v17 = vadd.f32 %v1713_v31, %v1492_v1  ;;  %v416_v60 = vmul.f32 0.013888889, %v380_v27  ;;  %v1791_v39 = vadd.f32 %v5196_v53, %v1748_v33  ;;  %v1790_v42 = vadd.f32 %v5196_v53, %v1747_v34  ;;  %1421 = vperm.xlu1 %4385, %v8120_v43   ;;  %v8130_v34 = vld [vmem:[#allocation15_spill] sm:$0xff] }
  0xcc   : > { %v5359_v26 = vsel %vm553_vm12, 1.0, %v8066_v55  ;;  %v8122_v29 = vcvt.s32.f32 %v5277_v41  ;;  %v5367_v49 = vsel %vm556_vm13, 1.0, %v8066_v55  ;;  %v5372_v33 = vsel %vm555_vm14, 1.0, %v8066_v55  ;;  %v8131_v1 = vld [vmem:[#allocation11_spill] sm:$0xff] }
  0xcd   : > { %8121 = vst [vmem:[#allocation20_spill] sm:$0xff] %v5359_v26  ;;  %1416 = vperm.xlu0 %4384, %v4828_v20   ;;  %8123 = vst [vmem:[#allocation21_spill] sm:$0xff] %v5367_v49  ;;  %v8125_v27 = vcvt.s32.f32 %v5191_v12  ;;  %v5379_v22 = vadd.s32 184, %v4486_v2  ;;  %v5382_v54 = vmul.f32 %v8127_v3, %v2004_v32  ;;  %v8128_v20 = vld [vmem:[#allocation12_spill] sm:$0xff]  ;;  %v5388_v57 = vmul.f32 %v8129_v37, %v2002_v38 }
  0xce   : > { %v377_v4 = vadd.f32 0.5, %v8122_v29  ;;  %8124 = vst [vmem:[#allocation26_spill] sm:$0xff] %v5372_v33  ;;  %v5385_v51 = vmul.f32 %v8128_v20, %v2001_v21  ;;  %v5391_v9 = vmul.f32 %v8130_v34, %v2003_v13  ;;  %v1793_v31 = vadd.f32 %v5196_v53, %v1750_v63  ;;  %v1322_v14 = vpop.permute.xlu1 %1321  ;;  %v1317_v7 = vpop.permute.xlu0 %1316  ;;  %v8132_v21 = vld [vmem:[#allocation28_spill] sm:$0xff] }
  0xcf   : > { %v5376_v44 = vsub.f32 %v8125_v27, %v486_v11  ;;  %v1792_v12 = vadd.f32 %v5196_v53, %v1749_v17  ;;  %v5396_v50 = vmul.f32 %v8131_v1, %v2000_v15  ;;  %v452_v32 = vfloor.f32 %v416_v60  ;;  %1210 = vperm.xlu1 %4385, %v8132_v21   ;;  %v8135_v21 = vld [vmem:[#allocation18_spill] sm:$0xff] }
  0xd0   : > { %v1863_v11 = vmul.f32 0.01, %v1791_v39  ;;  %v1862_v43 = vmul.f32 0.01, %v1790_v42  ;;  %v8133_v38 = vrot.slane %v4502_v6, 1  ;;  %v8134_v29 = vrot.slane %v4569_v5, 1 }
  0xd1   : > { %8126 = vst [vmem:[#allocation27_spill] sm:$0xff] %v5376_v44  ;;  %v413_v63 = vmul.f32 0.013888889, %v377_v4  ;;  %vm1827_vm15 = vcmp.gt.f32.partialorder %v1791_v39, 0.0  ;;  %vm1826_vm2 = vcmp.gt.f32.partialorder %v1790_v42, 0.0  ;;  %1205 = vperm.xlu0 %4384, %v5019_v30   ;;  %vm558_vm3 = vcmp.lt.f32.partialorder %v5376_v44, 63.0 }
  0xd2   : > { %v5405_v13 = vsel %vm1005_vm1, %v8134_v29, %v8133_v38  ;;  %v7914_v15 = vcvt.s32.f32 %v5379_v22  ;;  %v2181_v17 = vrot.slane %v5385_v51, 1  ;;  %v2182_v60 = vrot.slane %v5388_v57, 1  ;;  %v1111_v20 = vpop.permute.xlu1 %1110  ;;  %v1106_v4 = vpop.permute.xlu0 %1105  ;;  %v8136_v38 = vld [vmem:[#allocation2_spill] sm:$0xff] }
  0xd3   : > { %v2183_v6 = vrot.slane %v5391_v9, 1  ;;  %v1865_v27 = vmul.f32 0.01, %v1793_v31  ;;  %v1864_v3 = vmul.f32 0.01, %v1792_v12  ;;  %v7919_v37 = vrot.slane %v5396_v50, 1  ;;  %1426 = vperm.xlu1 %4385, %v8135_v21  }
  0xd4   : > { %v488_v34 = vmul.f32 72.0, %v452_v32  ;;  %v5415_v30 = vsel %vm1827_vm15, %v1791_v39, %v1863_v11  ;;  %v5417_v1 = vsel %vm1826_vm2, %v1790_v42, %v1862_v43  ;;  %vm1829_vm4 = vcmp.gt.f32.partialorder %v1793_v31, 0.0 }
  0xd5   : > { %vm1828_vm5 = vcmp.gt.f32.partialorder %v1792_v12, 0.0  ;;  %1220 = vperm.xlu0 %4384, %v8136_v38   ;;  %v5424_v29 = vsel %vm558_vm3, 1.0, %v8066_v55  ;;  %v449_v5 = vfloor.f32 %v413_v63  ;;  %v379_v32 = vadd.f32 0.5, %v7914_v15 }
  0xd6   : > { %8137 = vst [vmem:[#allocation17_spill] sm:$0xff] %v5424_v29  ;;  %v5429_v39 = vadd.s32 208, %v4486_v2  ;;  %v5433_v42 = vsel %vm1005_vm1, %v2181_v17, %v2182_v60  ;;  %v5439_v11 = vsel %vm1005_vm1, %v7919_v37, %v2181_v17  ;;  %v8138_v43 = vrot.slane %v5382_v54, 1  ;;  %v1332_v17 = vpop.permute.xlu1 %1331  ;;  %v1327_v37 = vpop.permute.xlu0 %1326 }
  0xd7   : > { %v5449_v21 = vsel %vm1005_vm1, %v2182_v60, %v2183_v6  ;;  %v1935_v38 = vrot.slane %v5415_v30, 1  ;;  %v1934_v15 = vrot.slane %v5417_v1, 1  ;;  %v5453_v58 = vsel %vm1829_vm4, %v1793_v31, %v1865_v27 }
  0xd8   : > { %v5445_v63 = vsel %vm1005_vm1, %v2183_v6, %v8138_v43  ;;  %v5455_v44 = vsel %vm1828_vm5, %v1792_v12, %v1864_v3  ;;  %v1459_v18 = vmul.f32 %v5082_v46, %v1322_v14  ;;  %v1458_v40 = vmul.f32 %v5082_v46, %v1317_v7  ;;  %v4413_v43 = vld [vmem:[%s4493_s30 + $0x118] sm:$0xff] }
  0xd9   : > { %1441 = vperm.xlu1 %4385, %v4413_v43   ;;  %v8139_v6 = vcvt.s32.f32 %v5255_v35  ;;  %1431 = vperm.xlu0 %4384, %v4912_v59   ;;  %v485_v7 = vmul.f32 72.0, %v449_v5  ;;  %v1936_v3 = vrot.slane %v5455_v44, 1  ;;  %v1238_v35 = vmul.f32 %v5113_v56, %v5349_v19 }
  0xda   : > { %v1237_v59 = vmul.f32 %v5113_v56, %v5351_v47  ;;  %v1579_v43 = vpop.permute.xlu1 %1578  ;;  %v8141_v12 = vrot.slane %v5279_v25, 1  ;;  %v5485_v14 = vmul.f32 0.013888889, %v379_v32  ;;  %v1461_v29 = vmul.f32 %v5082_v46, %v1332_v17 }
  0xdb   : > { %v5464_v16 = vsub.f32 %v8139_v6, %v488_v34  ;;  %v1992_v34 = vsel %vm1005_vm1, %v1934_v15, %v1935_v38  ;;  %v1574_v6 = vpop.permute.xlu0 %1573  ;;  %v1495_v31 = vadd.f32 %v1459_v18, %v1238_v35  ;;  %v1716_v19 = vmul.f32 %v5159_v10, %v1579_v43 }
  0xdc   : > { %v1993_v5 = vsel %vm1005_vm1, %v8141_v12, %v1934_v15  ;;  %v1494_v27 = vadd.f32 %v1458_v40, %v1237_v59  ;;  %v1715_v47 = vmul.f32 %v5159_v10, %v1574_v6  ;;  %v1460_v33 = vmul.f32 %v5082_v46, %v1327_v37 }
  0xdd   : > { %8140 = vst [vmem:[#allocation14_spill] sm:$0xff] %v5464_v16  ;;  %1678 = vperm.xlu1 %4385, %v5045_v52   ;;  %1673 = vperm.xlu0 %4384, %v5061_v8   ;;  %v5495_v15 = vadd.s32 224, %v4486_v2  ;;  %v5498_v32 = vadd.s32 200, %v4486_v2  ;;  %v8142_v40 = vrot.slane %v5453_v58, 1  ;;  %v1752_v12 = vadd.f32 %v1716_v19, %v1495_v31 }
  0xde   : > { %v1751_v35 = vadd.f32 %v1715_v47, %v1494_v27  ;;  %v1991_v52 = vsel %vm1005_vm1, %v1935_v38, %v1936_v3  ;;  %v2006_v37 = vmax.f32 %v5417_v1, %v1992_v34  ;;  %v1240_v8 = vmul.f32 %v5113_v56, %v1111_v20  ;;  %v1589_v59 = vpop.permute.xlu1 %1588 }
  0xdf   : > { %v1990_v18 = vsel %vm1005_vm1, %v1936_v3, %v8142_v40  ;;  %v1239_v17 = vmul.f32 %v5113_v56, %v1106_v4  ;;  %v1584_v43 = vpop.permute.xlu0 %1583  ;;  %v2005_v6 = vmax.f32 %v5279_v25, %v1993_v5  ;;  %v1795_v60 = vadd.f32 %v5196_v53, %v1752_v12 }
  0xe0   : > { %v1794_v49 = vadd.f32 %v5196_v53, %v1751_v35  ;;  %v1718_v31 = vmul.f32 %v5159_v10, %v1589_v59  ;;  %v1717_v27 = vmul.f32 %v5159_v10, %v1584_v43  ;;  %v2008_v1 = vmax.f32 %v5455_v44, %v1990_v18 }
  0xe1   : > { %1688 = vperm.xlu1 %4385, %v5088_v62   ;;  %v1497_v38 = vadd.f32 %v1461_v29, %v1240_v8  ;;  %v1496_v20 = vadd.f32 %v1460_v33, %v1239_v17  ;;  %1683 = vperm.xlu0 %4384, %v5092_v0   ;;  %v2007_v4 = vmax.f32 %v5415_v30, %v1991_v52  ;;  %vm1831_vm6 = vcmp.gt.f32.partialorder %v1795_v60, 0.0  ;;  %v8146_v52 = vld [vmem:[#allocation29_spill] sm:$0xff]  ;;  %v8149_v17 = vld [vmem:[#allocation32_spill] sm:$0xff] }
  0xe2   : > { %v1867_v25 = vmul.f32 0.01, %v1795_v60  ;;  %vm1830_vm7 = vcmp.gt.f32.partialorder %v1794_v49, 0.0  ;;  %v1866_v3 = vmul.f32 0.01, %v1794_v49  ;;  %v5518_v19 = vpop.permute.xlu1 %1120  ;;  %v8143_v62 = vcvt.s32.f32 %v5277_v41 }
  0xe3   : > { %v1754_v34 = vadd.f32 %v1718_v31, %v1497_v38  ;;  %v1753_v5 = vadd.f32 %v1717_v27, %v1496_v20  ;;  %v5520_v47 = vpop.permute.xlu0 %1115  ;;  %v5527_v33 = vadd.s32 216, %v4486_v2  ;;  %v451_v30 = vfloor.f32 %v5485_v14 }
  0xe4   : > { %v5524_v40 = vsub.f32 %v8143_v62, %v485_v7  ;;  %v5529_v0 = vsel %vm1831_vm6, %v1795_v60, %v1867_v25  ;;  %v1902_v44 = vsel %vm1830_vm7, %v1794_v49, %v1866_v3  ;;  %v8145_v29 = vcvt.s32.f32 %v5429_v39  ;;  %v8147_v49 = vld [vmem:[#allocation30_spill] sm:$0xff] }
  0xe5   : > { %1215 = vperm.xlu1 %4385, %v5100_v23   ;;  %v1939_v12 = vrot.slane %v5529_v0, 1  ;;  %v1938_v35 = vrot.slane %v1902_v44, 1  ;;  %v1797_v41 = vadd.f32 %v5196_v53, %v1754_v34  ;;  %v1796_v7 = vadd.f32 %v5196_v53, %v1753_v5  ;;  %1698 = vperm.xlu0 %4384, %v5108_v36   ;;  %v8148_v23 = vld [vmem:[#allocation31_spill] sm:$0xff] }
  0xe6   : > { %8144 = vst [vmem:[#allocation12_spill] sm:$0xff] %v5524_v40  ;;  %v382_v18 = vadd.f32 0.5, %v8145_v29  ;;  %v5540_v60 = vmul.f32 %v8146_v52, %v2008_v1  ;;  %v5543_v8 = vmul.f32 %v8147_v49, %v2005_v6  ;;  %v5546_v14 = vmul.f32 %v8148_v23, %v2006_v37  ;;  %v1342_v36 = vpop.permute.xlu1 %1341 }
  0xe7   : > { %v5549_v59 = vmul.f32 %v8149_v17, %v2007_v4  ;;  %v1988_v43 = vsel %vm1005_vm1, %v1938_v35, %v1939_v12  ;;  %vm1833_vm8 = vcmp.gt.f32.partialorder %v1797_v41, 0.0  ;;  %v1869_v31 = vmul.f32 0.01, %v1797_v41  ;;  %v1337_v27 = vpop.permute.xlu0 %1336  ;;  %v4414_v4 = vld [vmem:[%s4493_s30 + $0x110] sm:$0xff] }
  0xe8   : > { %vm1832_vm9 = vcmp.gt.f32.partialorder %v1796_v7, 0.0  ;;  %v1868_v1 = vmul.f32 0.01, %v1796_v7  ;;  %v487_v6 = vmul.f32 72.0, %v451_v30  ;;  %v5554_v38 = vmul.f32 0.013888889, %v382_v18 }
  0xe9   : > { %1693 = vperm.xlu1 %4385, %v5405_v13   ;;  %v7925_v37 = vcvt.s32.f32 %v5495_v15  ;;  %v2010_v20 = vmax.f32 %v1902_v44, %v1988_v43  ;;  %v5557_v25 = vsel %vm1833_vm8, %v1797_v41, %v1869_v31  ;;  %1436 = vperm.xlu0 %4384, %v4414_v4   ;;  %v8150_v3 = vrot.slane %v5453_v58, 1 }
  0xea   : > { %v7926_v62 = vrot.slane %v5557_v25, 1  ;;  %v1904_v13 = vsel %vm1832_vm9, %v1796_v7, %v1868_v1  ;;  %v2185_v30 = vrot.slane %v5543_v8, 1  ;;  %v2186_v29 = vrot.slane %v5546_v14, 1  ;;  %v1131_v44 = vpop.permute.xlu1 %1130 }
  0xeb   : > { %v1989_v34 = vsel %vm1005_vm1, %v8150_v3, %v1938_v35  ;;  %v1940_v18 = vrot.slane %v1904_v13, 1  ;;  %v1126_v41 = vpop.permute.xlu0 %1125  ;;  %v2187_v52 = vrot.slane %v5549_v59, 1  ;;  %v2188_v49 = vrot.slane %v5540_v60, 1  ;;  %v8155_v3 = vld [vmem:[#allocation36_spill] sm:$0xff] }
  0xec   : > { %v2009_v23 = vmax.f32 %v5453_v58, %v1989_v34  ;;  %v8151_v35 = vpack.c.bf16 %v5391_v9, %v5388_v57  ;;  %v2164_v7 = vpack.c.bf16 %v5543_v8, %v5382_v54  ;;  %v8152_v17 = vcvt.s32.f32 %v5379_v22  ;;  %v8156_v34 = vld [vmem:[#allocation37_spill] sm:$0xff] }
  0xed   : > { %v5584_v1 = vadd.f32 0.5, %v7925_v37  ;;  %v1986_v58 = vsel %vm1005_vm1, %v1940_v18, %v7926_v62  ;;  %v8154_v4 = vpack.c.bf16 %v5385_v51, %v5396_v50  ;;  %v1463_v37 = vmul.f32 %v5082_v46, %v1342_v36 }
  0xee   : > { %2290 = vrot.lane.b32.xlu1 %v8151_v35, %s4430_s16  ;;  %v5579_v43 = vsub.f32 %v8152_v17, %v487_v6  ;;  %v5595_v22 = vmul.f32 %v8155_v3, %v2009_v23  ;;  %v1987_v6 = vsel %vm1005_vm1, %v1939_v12, %v1940_v18  ;;  %v5600_v35 = vmul.f32 %v8156_v34, %v2010_v20 }
  0xef   : > { %2288 = vrot.lane.b32.xlu0 %v8154_v4, %s4430_s16  ;;  %v2012_v17 = vmax.f32 %v1904_v13, %v1986_v58  ;;  %v2245_v62 = vsel %vm1005_vm1, %v2185_v30, %v2186_v29  ;;  %v2011_v31 = vmax.f32 %v5529_v0, %v1987_v6  ;;  %v1462_v5 = vmul.f32 %v5082_v46, %v1337_v27  ;;  %v1352_v4 = vpop.permute.xlu1 %1351  ;;  %v1347_v26 = vpop.permute.xlu0 %1346  ;;  %v8159_v58 = vld [vmem:[#allocation38_spill] sm:$0xff] }
  0xf0   : > { %8153 = vst [vmem:[#allocation13_spill] sm:$0xff] %v5579_v43  ;;  %v8157_v23 = vrot.slane %v5382_v54, 1  ;;  %v2243_v20 = vsel %vm1005_vm1, %v2187_v52, %v2188_v49  ;;  %v2244_v36 = vsel %vm1005_vm1, %v2186_v29, %v2187_v52  ;;  %v1242_v13 = vmul.f32 %v5113_v56, %v5518_v19 }
  0xf1   : > { %v1241_v0 = vmul.f32 %v5113_v56, %v5520_v47  ;;  %v8158_v27 = vpack.c.bf16 %v5445_v63, %v5449_v21  ;;  %v2074_v18 = vrot.slane %v5388_v57, 7  ;;  %v5626_v3 = vmul.f32 %v8159_v58, %v2012_v17 }
  0xf2   : > { %v2246_v12 = vsel %vm1005_vm1, %v8157_v23, %v2185_v30  ;;  %v2073_v30 = vrot.slane %v5385_v51, 7  ;;  %v8160_v19 = vpack.c.bf16 %v5433_v42, %v5439_v11  ;;  %v5633_v47 = vmul.f32 %v5232_v45, %v2011_v31 }
  0xf3   : > { %2344 = vrot.lane.b32.xlu1 %v8158_v27, %s4431_s17  ;;  %v2189_v29 = vrot.slane %v5595_v22, 1  ;;  %v2190_v63 = vrot.slane %v5600_v35, 1  ;;  %v1499_v21 = vadd.f32 %v1463_v37, %v1242_v13  ;;  %v2165_v51 = vpack.c.bf16 %v5549_v59, %v5546_v14  ;;  %v1599_v11 = vpop.permute.xlu1 %1598  ;;  %v1594_v45 = vpop.permute.xlu0 %1593 }
  0xf4   : > { %2342 = vrot.lane.b32.xlu0 %v8160_v19, %s4431_s17  ;;  %v2254_v57 = vpack.c.bf16 %v2245_v62, %v2246_v12  ;;  %v2255_v52 = vpack.c.bf16 %v2243_v20, %v2244_v36  ;;  %v1498_v6 = vadd.f32 %v1462_v5, %v1241_v0  ;;  %v1244_v34 = vmul.f32 %v5113_v56, %v1131_v44  ;;  %v4386_v36 = vld [vmem:[%s7852_s3 + $0x10] sm:$0xff]  }
  0xf5   : > { %v1465_v17 = vmul.f32 %v5082_v46, %v1352_v4  ;;  %v1464_v42 = vmul.f32 %v5082_v46, %v1347_v26  ;;  %v1243_v31 = vmul.f32 %v5113_v56, %v1126_v41  ;;  %v1720_v23 = vmul.f32 %v5159_v10, %v1599_v11  ;;  %4278 = vmatprep.subr.bf16.mxu0 %v4386_v36 }
  0xf6   : > { %v1719_v37 = vmul.f32 %v5159_v10, %v1594_v45  ;;  %v5648_v62 = vsel %vm932_vm0, %v2073_v30, %v2074_v18  ;;  %v2166_v5 = vpack.c.bf16 %v5595_v22, %v5540_v60  ;;  %v5655_v26 = vsel %vm1005_vm1, %v2189_v29, %v2190_v63  ;;  %4279 = vmatpush3.bf16.msra.mxu0 %v4386_v36 }
  0xf7   : > { %2294 = vrot.lane.b32.xlu1 %v2165_v51, %s4430_s16  ;;  %v2191_v44 = vrot.slane %v5633_v47, 1  ;;  %v2192_v41 = vrot.slane %v5626_v3, 1  ;;  %v1756_v4 = vadd.f32 %v1720_v23, %v1499_v21  ;;  %v5661_v20 = vsel %vm1005_vm1, %v2188_v49, %v2189_v29  ;;  %v1609_v27 = vpop.permute.xlu1 %1608  ;;  %v1604_v58 = vpop.permute.xlu0 %1603  ;;  %v4387_v29 = vld [vmem:[%s7852_s3 + $0x8] sm:$0xff]  }
  0xf8   : > { %2292 = vrot.lane.b32.xlu0 %v2164_v7, %s4430_s16  ;;  %v1755_v12 = vadd.f32 %v1719_v37, %v1498_v6  ;;  %vm560_vm10 = vcmp.lt.f32.partialorder %v5464_v16, 63.0  ;;  %vm557_vm11 = vcmp.lt.f32.partialorder %v5524_v40, 63.0  ;;  %v2075_v7 = vrot.slane %v5391_v9, 7  ;;  %4280 = vmatprep.subr.bf16.mxu0 %v4387_v29 }
  0xf9   : > { %v1501_v13 = vadd.f32 %v1465_v17, %v1244_v34  ;;  %v1500_v0 = vadd.f32 %v1464_v42, %v1243_v31  ;;  %v2167_v19 = vpack.c.bf16 %v5633_v47, %v5600_v35  ;;  %v7927_v49 = vrot.slane %v5396_v50, 7 }
  0xfa   : > { %v1799_v21 = vadd.f32 %v5196_v53, %v1756_v4  ;;  %v1798_v51 = vadd.f32 %v5196_v53, %v1755_v12  ;;  %v1722_v6 = vmul.f32 %v5159_v10, %v1609_v27  ;;  %v1721_v34 = vmul.f32 %v5159_v10, %v1604_v58  ;;  %4281 = vmatpush3.bf16.msra.mxu0 %v4387_v29 }
  0xfb   : > { %2348 = vrot.lane.b32.xlu1 %v2255_v52, %s4431_s17  ;;  %v2239_v17 = vsel %vm1005_vm1, %v2191_v44, %v2192_v41  ;;  %v420_v42 = vmul.f32 0.013888889, %v5584_v1  ;;  %v5690_v11 = vsel %vm932_vm0, %v2074_v18, %v2075_v7  ;;  %v5696_v52 = vsel %vm932_vm0, %v7927_v49, %v2073_v30  ;;  %v5698_v23 = vpop.permute.xlu1 %1140  ;;  %v5700_v37 = vpop.permute.xlu0 %1135  ;;  %v4388_v30 = vld [vmem:[%s7852_s3] sm:$0xff]  }
  0xfc   : > { %2346 = vrot.lane.b32.xlu0 %v2254_v57, %s4431_s17  ;;  %vm1835_vm12 = vcmp.gt.f32.partialorder %v1799_v21, 0.0  ;;  %v1871_v57 = vmul.f32 0.01, %v1799_v21  ;;  %vm1834_vm13 = vcmp.gt.f32.partialorder %v1798_v51, 0.0  ;;  %v1870_v45 = vmul.f32 0.01, %v1798_v51  ;;  %4282 = vmatprep.subr.bf16.mxu0 %v4388_v30 }
  0xfd   : > { %v1758_v31 = vadd.f32 %v1722_v6, %v1501_v13  ;;  %v1757_v1 = vadd.f32 %v1721_v34, %v1500_v0  ;;  %v2240_v18 = vsel %vm1005_vm1, %v2190_v63, %v2191_v44  ;;  %vm559_vm14 = vcmp.lt.f32.partialorder %v5579_v43, 63.0  ;;  %v8177_v43 = vld [vmem:[#allocation26_spill] sm:$0xff] }
  0xfe   : > { %v5709_v12 = vsel %vm1835_vm12, %v1799_v21, %v1871_v57  ;;  %v1906_v36 = vsel %vm1834_vm13, %v1798_v51, %v1870_v45  ;;  %v8161_v13 = vcvt.s32.f32 %v5498_v32  ;;  %v2256_v21 = vpack.c.bf16 %v5655_v26, %v5661_v20  ;;  %4283 = vmatpush3.bf16.msra.mxu0 %v4388_v30 }
  0xff   : > { %2298 = vrot.lane.b32.xlu1 %v2167_v19, %s4430_s16  ;;  %v1943_v63 = vrot.slane %v5709_v12, 1  ;;  %v1942_v44 = vrot.slane %v1906_v36, 1  ;;  %v1801_v27 = vadd.f32 %v5196_v53, %v1758_v31  ;;  %v1800_v58 = vadd.f32 %v5196_v53, %v1757_v1 }
 0x100   : > { %v381_v0 = vadd.f32 0.5, %v8161_v13  ;;  %2296 = vrot.lane.b32.xlu0 %v2166_v5, %s4430_s16  ;;  %v2257_v51 = vpack.c.bf16 %v2239_v17, %v2240_v18  ;;  %v8162_v19 = vfloor.f32 %v5554_v38  ;;  %v456_v34 = vfloor.f32 %v420_v42  ;;  %v1362_v5 = vpop.permute.xlu1 %1361  ;;  %v1357_v13 = vpop.permute.xlu0 %1356 }
 0x101   : > { %v1984_v57 = vsel %vm1005_vm1, %v1942_v44, %v1943_v63  ;;  %v8163_v45 = vrot.slane %v5557_v25, 1  ;;  %vm1837_vm15 = vcmp.gt.f32.partialorder %v1801_v27, 0.0  ;;  %v1873_v1 = vmul.f32 0.01, %v1801_v27 }
 0x102   : > { %v490_v6 = vmul.f32 72.0, %v8162_v19  ;;  %v2014_v26 = vmax.f32 %v1906_v36, %v1984_v57  ;;  %vm1836_vm2 = vcmp.gt.f32.partialorder %v1800_v58, 0.0  ;;  %v1872_v20 = vmul.f32 0.01, %v1800_v58 }
 0x103   : > { %v1985_v31 = vsel %vm1005_vm1, %v8163_v45, %v1942_v44  ;;  %2352 = vrot.lane.b32.xlu1 %v2257_v51, %s4431_s17  ;;  %v417_v38 = vmul.f32 0.013888889, %v381_v0  ;;  %v5730_v29 = vsel %vm1837_vm15, %v1801_v27, %v1873_v1  ;;  %v5737_v42 = vsel %vm560_vm10, 1.0, %v8066_v55 }
 0x104   : > { %2350 = vrot.lane.b32.xlu0 %v2256_v21, %s4431_s17  ;;  %v2013_v17 = vmax.f32 %v5557_v25, %v1985_v31  ;;  %v5742_v18 = vsel %vm557_vm11, 1.0, %v8066_v55  ;;  %v5745_v36 = vmul.f32 %v5227_v48, %v2014_v26  ;;  %v1945_v0 = vrot.slane %v5730_v29, 1  ;;  %v1151_v21 = vpop.permute.xlu1 %1150  ;;  %v1146_v51 = vpop.permute.xlu0 %1145 }
 0x105   : > { %v1908_v44 = vsel %vm1836_vm2, %v1800_v58, %v1872_v20  ;;  %v5751_v25 = vsel %vm559_vm14, 1.0, %v8066_v55  ;;  %v8164_v57 = vcvt.s32.f32 %v5429_v39  ;;  %v5760_v48 = vmul.f32 72.0, %v456_v34 }
 0x106   : > { %v1944_v27 = vrot.slane %v1908_v44, 1  ;;  %v5754_v19 = vmul.f32 %v5241_v28, %v2013_v17  ;;  %v2194_v58 = vrot.slane %v5745_v36, 1  ;;  %v453_v31 = vfloor.f32 %v417_v38 }
 0x107   : > { %v5758_v45 = vsub.f32 %v8164_v57, %v490_v6  ;;  %v7928_v1 = vcvt.s32.f32 %v5527_v33  ;;  %v5765_v26 = vadd.s32 240, %v4486_v2  ;;  %v1467_v20 = vmul.f32 %v5082_v46, %v1362_v5 }
 0x108   : > { %v1982_v28 = vsel %vm1005_vm1, %v1944_v27, %v1945_v0  ;;  %v1983_v39 = vsel %vm1005_vm1, %v1943_v63, %v1944_v27  ;;  %v2168_v30 = vpack.c.bf16 %v5754_v19, %v5626_v3  ;;  %v2193_v6 = vrot.slane %v5754_v19, 1  ;;  %v1372_v57 = vpop.permute.xlu1 %1371  ;;  %v1367_v4 = vpop.permute.xlu0 %1366 }
 0x109   : > { %8165 = vst [vmem:[#allocation15_spill] sm:$0xff] %v5758_v45  ;;  %v2016_v34 = vmax.f32 %v1908_v44, %v1982_v28  ;;  %v1466_v38 = vmul.f32 %v5082_v46, %v1357_v13  ;;  %v2015_v17 = vmax.f32 %v5709_v12, %v1983_v39  ;;  %v2077_v44 = vrot.slane %v5543_v8, 7 }
 0x10a   : > { %2300 = vrot.lane.b32.xlu0 %v2168_v30, %s4430_s16  ;;  %v2237_v49 = vsel %vm1005_vm1, %v2193_v6, %v2194_v58  ;;  %v2238_v63 = vsel %vm1005_vm1, %v2192_v41, %v2193_v6  ;;  %v2078_v5 = vrot.slane %v5546_v14, 7  ;;  %v1246_v12 = vmul.f32 %v5113_v56, %v5698_v23 }
 0x10b   : > { %v5789_v46 = vmul.f32 %v5266_v61, %v2016_v34  ;;  %v2258_v13 = vpack.c.bf16 %v2237_v49, %v2238_v63  ;;  %vm562_vm3 = vcmp.lt.f32.partialorder %v5758_v45, 63.0  ;;  %v5794_v27 = vmul.f32 72.0, %v453_v31  ;;  %v5832_v63 = vld [vmem:[%s7850_s1] ss:$0 sm:$0xff] }
 0x10c   : > { %v1245_v28 = vmul.f32 %v5113_v56, %v5700_v37  ;;  %v5799_v41 = vmul.f32 %v5287_v24, %v2015_v17  ;;  %v383_v8 = vadd.f32 0.5, %v7928_v1  ;;  %v5805_v61 = vsel %vm932_vm0, %v2077_v44, %v2078_v5  ;;  %v5813_v56 = vld [vmem:[%s7850_s1 + $0x1] ss:$0 sm:$0xff]  ;;  %v1619_v30 = vpop.permute.xlu1 %1618  ;;  %v1614_v6 = vpop.permute.xlu0 %1613 }
 0x10d   : > { %v1503_v14 = vadd.f32 %v1467_v20, %v1246_v12  ;;  %v7931_v49 = vrot.slane %v5789_v46, 1  ;;  %v7930_v23 = vcvt.s32.f32 %v5765_v26  ;;  %v7929_v31 = vrot.slane %v5549_v59, 7 }
 0x10e   : > { %v1502_v39 = vadd.f32 %v1466_v38, %v1245_v28  ;;  %v1469_v24 = vmul.f32 %v5813_v56, %v1372_v57  ;;  %2354 = vrot.lane.b32.xlu0 %v2258_v13, %s4431_s17  ;;  %v2169_v37 = vpack.c.bf16 %v5799_v41, %v5745_v36  ;;  %v2195_v34 = vrot.slane %v5799_v41, 1 }
 0x10f   : > { %v1724_v20 = vmul.f32 %v5159_v10, %v1619_v30  ;;  %v1723_v38 = vmul.f32 %v5159_v10, %v1614_v6  ;;  %v5826_v17 = vsel %vm932_vm0, %v2078_v5, %v7929_v31  ;;  %v2076_v57 = vrot.slane %v5382_v54, 7 }
 0x110   : > { %v1248_v12 = vmul.f32 %v5832_v63, %v1151_v21  ;;  %v1468_v13 = vmul.f32 %v5813_v56, %v1367_v4  ;;  %2302 = vrot.lane.b32.xlu1 %v2169_v37, %s4430_s16  ;;  %v2235_v10 = vsel %vm1005_vm1, %v2195_v34, %v7931_v49  ;;  %v2236_v5 = vsel %vm1005_vm1, %v2194_v58, %v2195_v34  ;;  %v1629_v31 = vpop.permute.xlu1 %1628  ;;  %v1624_v21 = vpop.permute.xlu0 %1623 }
 0x111   : > { %v1247_v54 = vmul.f32 %v5832_v63, %v1146_v51  ;;  %v1760_v28 = vadd.f32 %v1724_v20, %v1503_v14  ;;  %v1759_v30 = vadd.f32 %v1723_v38, %v1502_v39  ;;  %v2259_v6 = vpack.c.bf16 %v2235_v10, %v2236_v5  ;;  %v5861_v39 = vld [vmem:[%s7850_s1 + $0x2] ss:$0 sm:$0xff] }
 0x112   : > { %v1505_v1 = vadd.f32 %v1469_v24, %v1248_v12  ;;  %v5848_v37 = vsel %vm932_vm0, %v2076_v57, %v2077_v44  ;;  %v5854_v58 = vsel %vm932_vm0, %v2075_v7, %v2076_v57  ;;  %v1726_v24 = vmul.f32 %v5861_v39, %v1629_v31 }
 0x113   : > { %v1803_v51 = vadd.f32 %v5196_v53, %v1760_v28  ;;  %v1802_v14 = vadd.f32 %v5196_v53, %v1759_v30  ;;  %v1725_v44 = vmul.f32 %v5861_v39, %v1624_v21  ;;  %v1504_v34 = vadd.f32 %v1468_v13, %v1247_v54 }
 0x114   : > { %2356 = vrot.lane.b32.xlu1 %v2259_v6, %s4431_s17  ;;  %v2081_v7 = vrot.slane %v5595_v22, 7  ;;  %v2082_v20 = vrot.slane %v5600_v35, 7  ;;  %v1762_v12 = vadd.f32 %v1726_v24, %v1505_v1  ;;  %v5870_v5 = vpop.permute.xlu1 %1160  ;;  %v5872_v31 = vpop.permute.xlu0 %1155  ;;  %v5877_v13 = vsel %vm562_vm3, 1.0, %v8066_v55 }
 0x115   : > { %vm1839_vm4 = vcmp.gt.f32.partialorder %v1803_v51, 0.0  ;;  %v1875_v38 = vmul.f32 0.01, %v1803_v51  ;;  %vm1838_vm5 = vcmp.gt.f32.partialorder %v1802_v14, 0.0  ;;  %v1874_v57 = vmul.f32 0.01, %v1802_v14 }
 0x116   : > { %v1761_v10 = vadd.f32 %v1725_v44, %v1504_v34  ;;  %v5881_v22 = vsel %vm932_vm0, %v2081_v7, %v2082_v20  ;;  %v419_v28 = vmul.f32 0.013888889, %v383_v8  ;;  %v5886_v1 = vadd.s32 256, %v4486_v2 }
 0x117   : > { %8166 = vst [vmem:[#allocation11_spill] sm:$0xff] %v5881_v22  ;;  %v5883_v35 = vsel %vm1839_vm4, %v1803_v51, %v1875_v38  ;;  %v1910_v54 = vsel %vm1838_vm5, %v1802_v14, %v1874_v57  ;;  %v1805_v21 = vadd.f32 %v5196_v53, %v1762_v12  ;;  %v8167_v44 = vcvt.s32.f32 %v5495_v15 }
 0x118   : > { %v1947_v30 = vrot.slane %v5883_v35, 1  ;;  %v1946_v6 = vrot.slane %v1910_v54, 1  ;;  %v1804_v24 = vadd.f32 %v5196_v53, %v1761_v10  ;;  %v8169_v51 = vcvt.s32.f32 %v5498_v32  ;;  %v1377_v12 = vpop.permute.xlu0 %1376  ;;  %v8172_v10 = vld [vmem:[#allocation20_spill] sm:$0xff] }
 0x119   : > { %v5894_v34 = vsub.f32 %v8167_v44, %v5760_v48  ;;  %v386_v8 = vadd.f32 0.5, %v7930_v23  ;;  %v7932_v38 = vrot.slane %v5633_v47, 7  ;;  %vm1841_vm6 = vcmp.gt.f32.partialorder %v1805_v21, 0.0  ;;  %v1382_v48 = vpop.permute.xlu1 %1381 }
 0x11a   : > { %v5899_v14 = vsub.f32 %v8169_v51, %v5794_v27  ;;  %v1980_v57 = vsel %vm1005_vm1, %v1946_v6, %v1947_v30  ;;  %v1981_v53 = vsel %vm1005_vm1, %v1945_v0, %v1946_v6  ;;  %v1877_v15 = vmul.f32 0.01, %v1805_v21  ;;  %v8171_v0 = vld [vmem:[#allocation16_spill] sm:$0xff] }
 0x11b   : > { %8168 = vst [vmem:[#allocation28_spill] sm:$0xff] %v5894_v34  ;;  %v2018_v32 = vmax.f32 %v1910_v54, %v1980_v57  ;;  %vm1840_vm7 = vcmp.gt.f32.partialorder %v1804_v24, 0.0  ;;  %v1876_v27 = vmul.f32 0.01, %v1804_v24  ;;  %v2017_v51 = vmax.f32 %v5730_v29, %v1981_v53 }
 0x11c   : > { %8170 = vst [vmem:[#allocation18_spill] sm:$0xff] %v5899_v14  ;;  %v5911_v44 = vsel %vm1841_vm6, %v1805_v21, %v1877_v15  ;;  %v455_v4 = vfloor.f32 %v419_v28  ;;  %v5918_v9 = vsel %vm932_vm0, %v2082_v20, %v7932_v38  ;;  %v2080_v23 = vrot.slane %v5540_v60, 7  ;;  %v1166_v15 = vpop.permute.xlu0 %1165 }
 0x11d   : > { %v5921_v6 = vmul.f32 %v8171_v0, %v2018_v32  ;;  %v7935_v54 = vrot.slane %v5911_v44, 1  ;;  %v1912_v57 = vsel %vm1840_vm7, %v1804_v24, %v1876_v27  ;;  %v1171_v21 = vpop.permute.xlu1 %1170  ;;  %v5926_v29 = vmul.f32 %v8172_v10, %v2017_v51 }
 0x11e   : > { %v1948_v49 = vrot.slane %v1912_v57, 1  ;;  %v5928_v28 = vmul.f32 0.013888889, %v386_v8  ;;  %v8173_v32 = vcvt.s32.f32 %v5886_v1  ;;  %v5936_v24 = vadd.s32 280, %v4486_v2 }
 0x11f   : > { %v2198_v53 = vrot.slane %v5921_v6, 1  ;;  %v5940_v60 = vsel %vm932_vm0, %v2080_v23, %v2081_v7  ;;  %v2170_v10 = vpack.c.bf16 %v5926_v29, %v5789_v46  ;;  %v2197_v51 = vrot.slane %v5926_v29, 1 }
 0x120   : > { %v388_v0 = vadd.f32 0.5, %v8173_v32  ;;  %v1978_v8 = vsel %vm1005_vm1, %v1948_v49, %v7935_v54  ;;  %v1979_v27 = vsel %vm1005_vm1, %v1947_v30, %v1948_v49  ;;  %v1471_v20 = vmul.f32 %v5813_v56, %v1382_v48  ;;  %v1387_v30 = vpop.permute.xlu0 %1386  ;;  %v8176_v48 = vld [vmem:[#allocation21_spill] sm:$0xff] }
 0x121   : > { %v2020_v32 = vmax.f32 %v1912_v57, %v1978_v8  ;;  %v2019_v38 = vmax.f32 %v5883_v35, %v1979_v27  ;;  %v8174_v7 = vrot.slane %v5549_v59, 7  ;;  %v1470_v54 = vmul.f32 %v5813_v56, %v1377_v12  ;;  %2304 = vrot.lane.b32.xlu0 %v2170_v10, %s4430_s16  ;;  %v1392_v49 = vpop.permute.xlu1 %1391 }
 0x122   : > { %v2233_v45 = vsel %vm1005_vm1, %v2197_v51, %v2198_v53  ;;  %v8175_v57 = vrot.slane %v5789_v46, 1  ;;  %vm561_vm8 = vcmp.lt.f32.partialorder %v5899_v14, 63.0  ;;  %v491_v12 = vmul.f32 72.0, %v455_v4 }
 0x123   : > { %v5957_v16 = vsel %vm932_vm0, %v8174_v7, %v2080_v23  ;;  %v5970_v23 = vmul.f32 %v8176_v48, %v2020_v32  ;;  %v458_v27 = vfloor.f32 %v5928_v28  ;;  %v1250_v10 = vmul.f32 %v5832_v63, %v5870_v5 }
 0x124   : > { %v2234_v35 = vsel %vm1005_vm1, %v8175_v57, %v2197_v51  ;;  %v1249_v7 = vmul.f32 %v5832_v63, %v5872_v31  ;;  %v5979_v51 = vmul.f32 %v8177_v43, %v2019_v38  ;;  %v2085_v57 = vrot.slane %v5754_v19, 7  ;;  %v1634_v43 = vpop.permute.xlu0 %1633 }
 0x125   : > { %v2260_v8 = vpack.c.bf16 %v2233_v45, %v2234_v35  ;;  %v7940_v32 = vrot.slane %v5970_v23, 1  ;;  %v5983_v48 = vmul.f32 0.013888889, %v388_v0  ;;  %v2086_v4 = vrot.slane %v5745_v36, 7  ;;  %v1639_v31 = vpop.permute.xlu1 %1638 }
 0x126   : > { %v1507_v28 = vadd.f32 %v1471_v20, %v1250_v10  ;;  %v1506_v35 = vadd.f32 %v1470_v54, %v1249_v7  ;;  %v2171_v5 = vpack.c.bf16 %v5979_v51, %v5921_v6  ;;  %v2199_v38 = vrot.slane %v5979_v51, 1 }
 0x127   : > { %2358 = vrot.lane.b32.xlu0 %v2260_v8, %s4431_s17  ;;  %v1728_v19 = vmul.f32 %v5861_v39, %v1639_v31  ;;  %v1727_v0 = vmul.f32 %v5861_v39, %v1634_v43  ;;  %v5995_v59 = vsel %vm932_vm0, %v2085_v57, %v2086_v4  ;;  %v7943_v36 = vrot.slane %v5799_v41, 7 }
 0x128   : > { %8178 = vst [vmem:[#allocation2_spill] sm:$0xff] %v5995_v59  ;;  %v1473_v54 = vmul.f32 %v5813_v56, %v1392_v49  ;;  %v1472_v20 = vmul.f32 %v5813_v56, %v1387_v30  ;;  %2306 = vrot.lane.b32.xlu1 %v2171_v5, %s4430_s16  ;;  %v2231_v8 = vsel %vm1005_vm1, %v2199_v38, %v7940_v32  ;;  %v2084_v40 = vrot.slane %v5626_v3, 7 }
 0x129   : > { %v2232_v10 = vsel %vm1005_vm1, %v2198_v53, %v2199_v38  ;;  %v1764_v7 = vadd.f32 %v1728_v19, %v1507_v28  ;;  %v1763_v31 = vadd.f32 %v1727_v0, %v1506_v35  ;;  %v6011_v49 = vsel %vm932_vm0, %v2086_v4, %v7943_v36  ;;  %v1649_v45 = vpop.permute.xlu1 %1648  ;;  %v6021_v53 = vld [vmem:[%s7851_s2] ss:$0 sm:$0xff] }
 0x12a   : > { %v2261_v43 = vpack.c.bf16 %v2231_v8, %v2232_v10  ;;  %8179 = vst [vmem:[#allocation29_spill] sm:$0xff] %v6011_v49  ;;  %v1252_v30 = vmul.f32 %v5832_v63, %v1171_v21  ;;  %v1251_v5 = vmul.f32 %v5832_v63, %v1166_v15  ;;  %v1730_v35 = vmul.f32 %v5861_v39, %v1649_v45  ;;  %v1644_v21 = vpop.permute.xlu0 %1643 }
 0x12b   : > { %v1807_v28 = vadd.f32 %v6021_v53, %v1764_v7  ;;  %v1806_v4 = vadd.f32 %v6021_v53, %v1763_v31  ;;  %v6027_v15 = vadd.s32 232, %v4486_v2  ;;  %v1729_v3 = vmul.f32 %v5861_v39, %v1644_v21 }
 0x12c   : > { %v1509_v38 = vadd.f32 %v1473_v54, %v1252_v30  ;;  %v1508_v19 = vadd.f32 %v1472_v20, %v1251_v5  ;;  %2360 = vrot.lane.b32.xlu1 %v2261_v43, %s4431_s17  ;;  %v6033_v0 = vsel %vm932_vm0, %v2084_v40, %v2085_v57  ;;  %v6038_v54 = vsel %vm561_vm8, 1.0, %v8066_v55 }
 0x12d   : > { %8180 = vst [vmem:[#allocation30_spill] sm:$0xff] %v6033_v0  ;;  %vm1843_vm9 = vcmp.gt.f32.partialorder %v1807_v28, 0.0  ;;  %v1879_v8 = vmul.f32 0.01, %v1807_v28  ;;  %vm1842_vm10 = vcmp.gt.f32.partialorder %v1806_v4, 0.0  ;;  %v1181_v31 = vpop.permute.xlu1 %1180  ;;  %v8181_v20 = vcvt.s32.f32 %v5527_v33 }
 0x12e   : > { %v1878_v10 = vmul.f32 0.01, %v1806_v4  ;;  %v1766_v7 = vadd.f32 %v1730_v35, %v1509_v38  ;;  %v1765_v45 = vadd.f32 %v1729_v3, %v1508_v19  ;;  %v1176_v5 = vpop.permute.xlu0 %1175  ;;  %v6046_v21 = vmul.f32 72.0, %v458_v27 }
 0x12f   : > { %v6042_v43 = vsub.f32 %v8181_v20, %v491_v12  ;;  %v6044_v30 = vsel %vm1843_vm9, %v1807_v28, %v1879_v8  ;;  %v8183_v33 = vcvt.s32.f32 %v5936_v24  ;;  %v8184_v28 = vrot.slane %v5633_v47, 7 }
 0x130   : > { %v1914_v57 = vsel %vm1842_vm10, %v1806_v4, %v1878_v10  ;;  %v1951_v35 = vrot.slane %v6044_v30, 1  ;;  %v1809_v19 = vadd.f32 %v6021_v53, %v1766_v7  ;;  %v1808_v3 = vadd.f32 %v6021_v53, %v1765_v45 }
 0x131   : > { %8182 = vst [vmem:[#allocation31_spill] sm:$0xff] %v6042_v43  ;;  %v1950_v38 = vrot.slane %v1914_v57, 1  ;;  %v6055_v12 = vadd.f32 0.5, %v8183_v33  ;;  %v6061_v27 = vsel %vm932_vm0, %v8184_v28, %v2084_v40  ;;  %v2088_v4 = vrot.slane %v5789_v46, 7  ;;  %v1402_v20 = vpop.permute.xlu1 %1401 }
 0x132   : > { %8185 = vst [vmem:[#allocation32_spill] sm:$0xff] %v6061_v27  ;;  %v8186_v10 = vrot.slane %v5911_v44, 1  ;;  %vm1845_vm11 = vcmp.gt.f32.partialorder %v1809_v19, 0.0  ;;  %v1881_v45 = vmul.f32 0.01, %v1809_v19  ;;  %vm1844_vm12 = vcmp.gt.f32.partialorder %v1808_v3, 0.0  ;;  %v1397_v36 = vpop.permute.xlu0 %1396 }
 0x133   : > { %v1976_v8 = vsel %vm1005_vm1, %v1950_v38, %v1951_v35  ;;  %v1880_v47 = vmul.f32 0.01, %v1808_v3  ;;  %v2089_v40 = vrot.slane %v5926_v29, 7  ;;  %v1475_v46 = vmul.f32 %v5813_v56, %v1402_v20 }
 0x134   : > { %v1977_v7 = vsel %vm1005_vm1, %v8186_v10, %v1950_v38  ;;  %v2022_v33 = vmax.f32 %v1914_v57, %v1976_v8  ;;  %v6071_v28 = vsel %vm1845_vm11, %v1809_v19, %v1881_v45  ;;  %v8187_v14 = vcvt.s32.f32 %v6027_v15  ;;  %v8188_v38 = vld [vmem:[#allocation17_spill] sm:$0xff] }
 0x135   : > { %v2021_v32 = vmax.f32 %v5911_v44, %v1977_v7  ;;  %v7950_v49 = vrot.slane %v6071_v28, 1  ;;  %v1916_v57 = vsel %vm1844_vm12, %v1808_v3, %v1880_v47  ;;  %v1254_v8 = vmul.f32 %v5832_v63, %v1181_v31  ;;  %v1191_v19 = vpop.permute.xlu1 %1190 }
 0x136   : > { %v6077_v59 = vadd.f32 0.5, %v8187_v14  ;;  %v2058_v10 = vmul.f32 %v8188_v38, %v2022_v33  ;;  %v1952_v22 = vrot.slane %v1916_v57, 1  ;;  %v1474_v29 = vmul.f32 %v5813_v56, %v1397_v36  ;;  %v1186_v14 = vpop.permute.xlu0 %1185 }
 0x137   : > { %v2057_v45 = vmul.f32 %v5742_v18, %v2021_v32  ;;  %v1253_v7 = vmul.f32 %v5832_v63, %v1176_v5  ;;  %v6089_v33 = vsel %vm932_vm0, %v2088_v4, %v2089_v40  ;;  %v8189_v3 = vrot.slane %v5799_v41, 7 }
 0x138   : > { %v2202_v20 = vrot.slane %v2058_v10, 1  ;;  %v1974_v18 = vsel %vm1005_vm1, %v1952_v22, %v7950_v49  ;;  %v1975_v32 = vsel %vm1005_vm1, %v1951_v35, %v1952_v22  ;;  %v1511_v36 = vadd.f32 %v1475_v46, %v1254_v8 }
 0x139   : > { %v6095_v31 = vsel %vm932_vm0, %v8189_v3, %v2088_v4  ;;  %v2172_v5 = vpack.c.bf16 %v2057_v45, %v5970_v23  ;;  %v2024_v47 = vmax.f32 %v1916_v57, %v1974_v18  ;;  %v2201_v38 = vrot.slane %v2057_v45, 1  ;;  %v1412_v3 = vpop.permute.xlu1 %1411 }
 0x13a   : > { %v2023_v44 = vmax.f32 %v6044_v30, %v1975_v32  ;;  %v1510_v4 = vadd.f32 %v1474_v29, %v1253_v7  ;;  %v2090_v27 = vrot.slane %v5921_v6, 7  ;;  %v2091_v49 = vrot.slane %v5979_v51, 7  ;;  %v1407_v35 = vpop.permute.xlu0 %1406 }
 0x13b   : > { %2308 = vrot.lane.b32.xlu0 %v2172_v5, %s4430_s16  ;;  %v2093_v0 = vrot.slane %v2057_v45, 7  ;;  %v6111_v22 = vmul.f32 %v5737_v42, %v2024_v47  ;;  %v2229_v46 = vsel %vm1005_vm1, %v2201_v38, %v2202_v20  ;;  %v8190_v30 = vrot.slane %v5970_v23, 1 }
 0x13c   : > { %v2092_v8 = vrot.slane %v5970_v23, 7  ;;  %v1256_v29 = vmul.f32 %v5832_v63, %v1191_v19  ;;  %v2059_v51 = vmul.f32 %v5751_v25, %v2023_v44  ;;  %v6124_v42 = vsel %vm932_vm0, %v2089_v40, %v2090_v27 }
 0x13d   : > { %v2230_v57 = vsel %vm1005_vm1, %v8190_v30, %v2201_v38  ;;  %v1477_v45 = vmul.f32 %v5813_v56, %v1412_v3  ;;  %v7953_v7 = vrot.slane %v6111_v22, 1  ;;  %v6130_v18 = vsel %vm932_vm0, %v2090_v27, %v2091_v49  ;;  %v1659_v44 = vpop.permute.xlu1 %1658 }
 0x13e   : > { %v2262_v6 = vpack.c.bf16 %v2229_v46, %v2230_v57  ;;  %v6134_v23 = vsel %vm932_vm0, %v2092_v8, %v2093_v0  ;;  %v1476_v19 = vmul.f32 %v5813_v56, %v1407_v35  ;;  %v2173_v25 = vpack.c.bf16 %v2059_v51, %v2058_v10  ;;  %v1654_v47 = vpop.permute.xlu0 %1653 }
 0x13f   : > { %v2203_v40 = vrot.slane %v2059_v51, 1  ;;  %v1732_v5 = vmul.f32 %v5861_v39, %v1659_v44  ;;  %v6143_v27 = vsel %vm932_vm0, %v2091_v49, %v2092_v8  ;;  %v2094_v38 = vrot.slane %v2058_v10, 7 }
 0x140   : > { %2362 = vrot.lane.b32.xlu0 %v2262_v6, %s4431_s17  ;;  %8191 = vst [vmem:[#allocation36_spill] sm:$0xff] %v6143_v27  ;;  %v2095_v3 = vrot.slane %v2059_v51, 7  ;;  %2310 = vrot.lane.b32.xlu1 %v2173_v25, %s4430_s16  ;;  %v1731_v35 = vmul.f32 %v5861_v39, %v1654_v47  ;;  %v1255_v51 = vmul.f32 %v5832_v63, %v1186_v14  ;;  %vm564_vm13 = vcmp.lt.f32.partialorder %v5894_v34, 63.0 }
 0x141   : > { %v2227_v46 = vsel %vm1005_vm1, %v2203_v40, %v7953_v7  ;;  %v2228_v30 = vsel %vm1005_vm1, %v2202_v20, %v2203_v40  ;;  %v1768_v6 = vadd.f32 %v1732_v5, %v1511_v36  ;;  %v6157_v10 = vsel %vm932_vm0, %v2093_v0, %v2094_v38  ;;  %v1669_v44 = vpop.permute.xlu1 %1668 }
 0x142   : > { %v2263_v49 = vpack.c.bf16 %v2227_v46, %v2228_v30  ;;  %8192 = vst [vmem:[#allocation37_spill] sm:$0xff] %v6157_v10  ;;  %v6161_v8 = vsel %vm932_vm0, %v2094_v38, %v2095_v3  ;;  %v1767_v25 = vadd.f32 %v1731_v35, %v1510_v4  ;;  %v7952_v36 = vrot.slane %v6111_v22, 7  ;;  %v1664_v47 = vpop.permute.xlu0 %1663 }
 0x143   : > { %8193 = vst [vmem:[#allocation38_spill] sm:$0xff] %v6161_v8  ;;  %v1513_v40 = vadd.f32 %v1477_v45, %v1256_v29  ;;  %v1811_v5 = vadd.f32 %v6021_v53, %v1768_v6  ;;  %v1734_v0 = vmul.f32 %v5861_v39, %v1669_v44  ;;  %v6171_v38 = vadd.s32 248, %v4486_v2 }
 0x144   : > { %v1512_v46 = vadd.f32 %v1476_v19, %v1255_v51  ;;  %v1810_v14 = vadd.f32 %v6021_v53, %v1767_v25  ;;  %2364 = vrot.lane.b32.xlu1 %v2263_v49, %s4431_s17  ;;  %v1733_v4 = vmul.f32 %v5861_v39, %v1664_v47  ;;  %v6180_v29 = vsel %vm932_vm0, %v2095_v3, %v7952_v36 }
 0x145   : > { %vm1847_vm14 = vcmp.gt.f32.partialorder %v1811_v5, 0.0  ;;  %v1883_v45 = vmul.f32 0.01, %v1811_v5  ;;  %v1770_v35 = vadd.f32 %v1734_v0, %v1513_v40  ;;  %v427_v30 = vmul.f32 0.013888889, %v6055_v12  ;;  %v6183_v51 = vpop.permute.xlu1 %1200 }
 0x146   : > { %vm1846_vm15 = vcmp.gt.f32.partialorder %v1810_v14, 0.0  ;;  %v1882_v6 = vmul.f32 0.01, %v1810_v14  ;;  %v1769_v19 = vadd.f32 %v1733_v4, %v1512_v46  ;;  %v421_v49 = vmul.f32 0.013888889, %v6077_v59  ;;  %v6187_v47 = vpop.permute.xlu0 %1195 }
 0x147   : > { %v1919_v25 = vsel %vm1847_vm14, %v1811_v5, %v1883_v45  ;;  %v1813_v44 = vadd.f32 %v6021_v53, %v1770_v35  ;;  %vm563_vm2 = vcmp.lt.f32.partialorder %v6042_v43, 63.0  ;;  %v8194_v3 = vcvt.s32.f32 %v5765_v26 }
 0x148   : > { %v1955_v12 = vrot.slane %v1919_v25, 1  ;;  %v1918_v0 = vsel %vm1846_vm15, %v1810_v14, %v1882_v6  ;;  %v1812_v46 = vadd.f32 %v6021_v53, %v1769_v19  ;;  %v7954_v4 = vcvt.s32.f32 %v6171_v38 }
 0x149   : > { %v6193_v40 = vsub.f32 %v8194_v3, %v6046_v21  ;;  %v1954_v20 = vrot.slane %v1918_v0, 1  ;;  %vm1849_vm3 = vcmp.gt.f32.partialorder %v1813_v44, 0.0  ;;  %v1885_v59 = vmul.f32 0.01, %v1813_v44  ;;  %v1422_v57 = vpop.permute.xlu1 %1421 }
 0x14a   : > { %v8196_v5 = vfloor.f32 %v5983_v48  ;;  %vm1848_vm4 = vcmp.gt.f32.partialorder %v1812_v46, 0.0  ;;  %v1884_v35 = vmul.f32 0.01, %v1812_v46  ;;  %v463_v32 = vfloor.f32 %v427_v30  ;;  %v1417_v19 = vpop.permute.xlu0 %1416 }
 0x14b   : > { %8195 = vst [vmem:[#allocation16_spill] sm:$0xff] %v6193_v40  ;;  %v457_v41 = vfloor.f32 %v421_v49  ;;  %v1972_v26 = vsel %vm1005_vm1, %v1954_v20, %v1955_v12  ;;  %v8197_v21 = vrot.slane %v6071_v28, 1  ;;  %v6205_v6 = vsel %vm1849_vm3, %v1813_v44, %v1885_v59 }
 0x14c   : > { %v496_v45 = vmul.f32 72.0, %v8196_v5  ;;  %v6208_v3 = vadd.s32 264, %v4486_v2  ;;  %v2026_v48 = vmax.f32 %v1918_v0, %v1972_v26  ;;  %v7961_v5 = vrot.slane %v6205_v6, 1 }
 0x14d   : > { %v1973_v14 = vsel %vm1005_vm1, %v8197_v21, %v1954_v20  ;;  %v1920_v36 = vsel %vm1848_vm4, %v1812_v46, %v1884_v35  ;;  %v387_v30 = vadd.f32 0.5, %v7954_v4  ;;  %v4098_v49 = vsel %vm564_vm13, 1.0, %v8066_v55  ;;  %v6221_v0 = vpop.permute.xlu1 %1210 }
 0x14e   : > { %v1956_v7 = vrot.slane %v1920_v36, 1  ;;  %v2025_v20 = vmax.f32 %v6071_v28, %v1973_v14  ;;  %v4097_v44 = vsel %vm563_vm2, 1.0, %v8066_v55  ;;  %v2062_v59 = vmul.f32 %v5877_v13, %v2026_v48  ;;  %v6234_v4 = vpop.permute.xlu0 %1205 }
 0x14f   : > { %vm566_vm5 = vcmp.lt.f32.partialorder %v6193_v40, 63.0  ;;  %v8198_v46 = vcvt.s32.f32 %v5886_v1  ;;  %v499_v26 = vmul.f32 72.0, %v463_v32  ;;  %v493_v21 = vmul.f32 72.0, %v457_v41 }
 0x150   : > { %v1970_v28 = vsel %vm1005_vm1, %v1956_v7, %v7961_v5  ;;  %v1971_v14 = vsel %vm1005_vm1, %v1955_v12, %v1956_v7  ;;  %v2061_v13 = vmul.f32 %v6038_v54, %v2025_v20  ;;  %v7966_v48 = vcvt.s32.f32 %v6208_v3 }
 0x151   : > { %v6226_v35 = vsub.f32 %v8198_v46, %v496_v45  ;;  %v2028_v34 = vmax.f32 %v1920_v36, %v1970_v28  ;;  %v2206_v1 = vrot.slane %v2062_v59, 1  ;;  %v2027_v45 = vmax.f32 %v1919_v25, %v1971_v14  ;;  %v1427_v5 = vpop.permute.xlu1 %1426 }
 0x152   : > { %v423_v46 = vmul.f32 0.013888889, %v387_v30  ;;  %v2174_v41 = vpack.c.bf16 %v2061_v13, %v6111_v22  ;;  %v2205_v32 = vrot.slane %v2061_v13, 1  ;;  %v2097_v43 = vrot.slane %v2061_v13, 7  ;;  %v6249_v36 = vpop.permute.xlu0 %1220 }
 0x153   : > { %8199 = vst [vmem:[#allocation20_spill] sm:$0xff] %v6226_v35  ;;  %v2098_v10 = vrot.slane %v2062_v59, 7  ;;  %v6239_v8 = vmul.f32 %v4098_v49, %v2028_v34  ;;  %v2063_v27 = vmul.f32 %v4097_v44, %v2027_v45  ;;  %v8200_v7 = vcvt.s32.f32 %v5936_v24 }
 0x154   : > { %v6246_v54 = vadd.s32 272, %v4486_v2  ;;  %2312 = vrot.lane.b32.xlu0 %v2174_v41, %s4430_s16  ;;  %v2225_v25 = vsel %vm1005_vm1, %v2205_v32, %v2206_v1  ;;  %v8202_v30 = vrot.slane %v6111_v22, 1  ;;  %v389_v24 = vadd.f32 0.5, %v7966_v48 }
 0x155   : > { %v6243_v12 = vsub.f32 %v8200_v7, %v499_v26  ;;  %v8203_v49 = vrot.slane %v6111_v22, 7  ;;  %v2175_v26 = vpack.c.bf16 %v2063_v27, %v2062_v59  ;;  %v2207_v28 = vrot.slane %v2063_v27, 1  ;;  %v1442_v7 = vpop.permute.xlu1 %1441 }
 0x156   : > { %v2226_v34 = vsel %vm1005_vm1, %v8202_v30, %v2205_v32  ;;  %v8204_v14 = vcvt.s32.f32 %v6027_v15  ;;  %v7964_v45 = vrot.slane %v6239_v8, 1  ;;  %v459_v41 = vfloor.f32 %v423_v46  ;;  %v1432_v30 = vpop.permute.xlu0 %1431 }
 0x157   : > { %8201 = vst [vmem:[#allocation21_spill] sm:$0xff] %v6243_v12  ;;  %v6263_v20 = vsel %vm932_vm0, %v8203_v49, %v2097_v43  ;;  %v2264_v44 = vpack.c.bf16 %v2225_v25, %v2226_v34  ;;  %v6274_v22 = vsel %vm932_vm0, %v2097_v43, %v2098_v10  ;;  %2314 = vrot.lane.b32.xlu1 %v2175_v26, %s4430_s16  ;;  %v7965_v15 = vcvt.s32.f32 %v6246_v54 }
 0x158   : > { %v6267_v13 = vsub.f32 %v8204_v14, %v493_v21  ;;  %v2224_v59 = vsel %vm1005_vm1, %v2206_v1, %v2207_v28  ;;  %v2099_v21 = vrot.slane %v2063_v27, 7  ;;  %v7963_v25 = vrot.slane %v6239_v8, 7 }
 0x159   : > { %v1479_v46 = vmul.f32 %v5813_v56, %v1422_v57  ;;  %2366 = vrot.lane.b32.xlu0 %v2264_v44, %s4431_s17  ;;  %v2223_v43 = vsel %vm1005_vm1, %v2207_v28, %v7964_v45  ;;  %vm568_vm6 = vcmp.lt.f32.partialorder %v6226_v35, 63.0  ;;  %v425_v34 = vmul.f32 0.013888889, %v389_v24  ;;  %v1679_v26 = vpop.permute.xlu1 %1678 }
 0x15a   : > { %8205 = vst [vmem:[#allocation26_spill] sm:$0xff] %v6267_v13  ;;  %v1478_v1 = vmul.f32 %v5813_v56, %v1417_v19  ;;  %v2265_v49 = vpack.c.bf16 %v2223_v43, %v2224_v59  ;;  %v6291_v27 = vsel %vm932_vm0, %v2098_v10, %v2099_v21  ;;  %v6297_v57 = vsel %vm932_vm0, %v2099_v21, %v7963_v25  ;;  %v1674_v43 = vpop.permute.xlu0 %1673 }
 0x15b   : > { %v1258_v44 = vmul.f32 %v5832_v63, %v6183_v51  ;;  %v6304_v24 = vsel %vm566_vm5, 1.0, %v8066_v55  ;;  %vm571_vm7 = vcmp.lt.f32.partialorder %v6243_v12, 63.0  ;;  %v1257_v19 = vmul.f32 %v5832_v63, %v6187_v47 }
 0x15c   : > { %2368 = vrot.lane.b32.xlu1 %v2265_v49, %s4431_s17  ;;  %vm565_vm8 = vcmp.lt.f32.partialorder %v6267_v13, 63.0  ;;  %v495_v28 = vmul.f32 72.0, %v459_v41  ;;  %v390_v51 = vadd.f32 0.5, %v7965_v15  ;;  %v1481_v59 = vmul.f32 %v5813_v56, %v1432_v30 }
 0x15d   : > { %v1515_v14 = vadd.f32 %v1479_v46, %v1258_v44  ;;  %v1736_v21 = vmul.f32 %v5861_v39, %v1679_v26  ;;  %v6320_v10 = vsel %vm568_vm6, 1.0, %v8066_v55  ;;  %v1514_v47 = vadd.f32 %v1478_v1, %v1257_v19 }
 0x15e   : > { %v1480_v49 = vmul.f32 %v5813_v56, %v1427_v5  ;;  %v1735_v32 = vmul.f32 %v5861_v39, %v1674_v43  ;;  %v461_v41 = vfloor.f32 %v425_v34  ;;  %v1260_v25 = vmul.f32 %v5832_v63, %v6221_v0  ;;  %v1689_v5 = vpop.permute.xlu1 %1688  ;;  %v1684_v15 = vpop.permute.xlu0 %1683 }
 0x15f   : > { %v1772_v46 = vadd.f32 %v1736_v21, %v1515_v14  ;;  %v6329_v30 = vsel %vm571_vm7, 1.0, %v8066_v55  ;;  %v6332_v44 = vsel %vm565_vm8, 1.0, %v8066_v55  ;;  %v1259_v1 = vmul.f32 %v5832_v63, %v6234_v4 }
 0x160   : > { %v1771_v19 = vadd.f32 %v1735_v32, %v1514_v47  ;;  %v8206_v26 = vcvt.s32.f32 %v6171_v38  ;;  %v426_v43 = vmul.f32 0.013888889, %v390_v51  ;;  %v1483_v0 = vmul.f32 %v5813_v56, %v1442_v7 }
 0x161   : > { %v1517_v14 = vadd.f32 %v1481_v59, %v1260_v25  ;;  %v1815_v21 = vadd.f32 %v6021_v53, %v1772_v46  ;;  %v1738_v45 = vmul.f32 %v5861_v39, %v1689_v5  ;;  %v1516_v48 = vadd.f32 %v1480_v49, %v1259_v1 }
 0x162   : > { %v6338_v34 = vsub.f32 %v8206_v26, %v495_v28  ;;  %v1814_v35 = vadd.f32 %v6021_v53, %v1771_v19  ;;  %v1737_v4 = vmul.f32 %v5861_v39, %v1684_v15  ;;  %v497_v32 = vmul.f32 72.0, %v461_v41  ;;  %v1216_v59 = vpop.permute.xlu1 %1215  ;;  %v1699_v1 = vpop.permute.xlu0 %1698 }
 0x163   : > { %v1262_v38 = vmul.f32 %v5832_v63, %v6249_v36  ;;  %vm1851_vm9 = vcmp.gt.f32.partialorder %v1815_v21, 0.0  ;;  %v1887_v28 = vmul.f32 0.01, %v1815_v21  ;;  %v1774_v51 = vadd.f32 %v1738_v45, %v1517_v14 }
 0x164   : > { %8207 = vst [vmem:[#allocation17_spill] sm:$0xff] %v6338_v34  ;;  %vm1850_vm10 = vcmp.gt.f32.partialorder %v1814_v35, 0.0  ;;  %v1886_v7 = vmul.f32 0.01, %v1814_v35  ;;  %v1773_v25 = vadd.f32 %v1737_v4, %v1516_v48  ;;  %v462_v47 = vfloor.f32 %v426_v43 }
 0x165   : > { %v1519_v46 = vadd.f32 %v1483_v0, %v1262_v38  ;;  %v1923_v5 = vsel %vm1851_vm9, %v1815_v21, %v1887_v28  ;;  %v1817_v49 = vadd.f32 %v6021_v53, %v1774_v51  ;;  %vm567_vm11 = vcmp.lt.f32.partialorder %v6338_v34, 63.0 }
 0x166   : > { %v1959_v15 = vrot.slane %v1923_v5, 1  ;;  %v1922_v41 = vsel %vm1850_vm10, %v1814_v35, %v1886_v7  ;;  %v1816_v19 = vadd.f32 %v6021_v53, %v1773_v25  ;;  %v1740_v36 = vmul.f32 %v5861_v39, %v1699_v1  ;;  %v1694_v21 = vpop.permute.xlu1 %1693  ;;  %v1437_v7 = vpop.permute.xlu0 %1436 }
 0x167   : > { %v1958_v26 = vrot.slane %v1922_v41, 1  ;;  %vm1853_vm12 = vcmp.gt.f32.partialorder %v1817_v49, 0.0  ;;  %v1889_v45 = vmul.f32 0.01, %v1817_v49  ;;  %v8208_v48 = vcvt.s32.f32 %v6208_v3 }
 0x168   : > { %vm1852_vm13 = vcmp.gt.f32.partialorder %v1816_v19, 0.0  ;;  %v1888_v43 = vmul.f32 0.01, %v1816_v19  ;;  %v1776_v0 = vadd.f32 %v1740_v36, %v1519_v46  ;;  %v498_v4 = vmul.f32 72.0, %v462_v47 }
 0x169   : > { %v6353_v14 = vsub.f32 %v8208_v48, %v497_v32  ;;  %v1968_v38 = vsel %vm1005_vm1, %v1958_v26, %v1959_v15  ;;  %v8210_v35 = vrot.slane %v6205_v6, 1  ;;  %v6361_v51 = vsel %vm1853_vm12, %v1817_v49, %v1889_v45 }
 0x16a   : > { %v4101_v3 = vsel %vm567_vm11, 1.0, %v8066_v55  ;;  %v2030_v32 = vmax.f32 %v1922_v41, %v1968_v38  ;;  %v7969_v25 = vrot.slane %v6361_v51, 1  ;;  %v1924_v46 = vsel %vm1852_vm13, %v1816_v19, %v1888_v43 }
 0x16b   : > { %8209 = vst [vmem:[#allocation45_spill] sm:$0xff] %v6353_v14  ;;  %v1969_v28 = vsel %vm1005_vm1, %v8210_v35, %v1958_v26  ;;  %v1819_v47 = vadd.f32 %v6021_v53, %v1776_v0  ;;  %v1960_v1 = vrot.slane %v1924_v46, 1  ;;  %v1261_v36 = vmul.f32 %v5832_v63, %v1216_v59  ;;  %v6373_v35 = vpop.permute.xlu1 %2290 }
 0x16c   : > { %v1482_v48 = vmul.f32 %v5813_v56, %v1437_v7  ;;  %v2029_v26 = vmax.f32 %v6205_v6, %v1969_v28  ;;  %vm569_vm14 = vcmp.lt.f32.partialorder %v6353_v14, 63.0  ;;  %v2066_v49 = vmul.f32 %v6304_v24, %v2030_v32  ;;  %v6386_v24 = vpop.permute.xlu0 %2288 }
 0x16d   : > { %vm1855_vm15 = vcmp.gt.f32.partialorder %v1819_v47, 0.0  ;;  %v1891_v45 = vmul.f32 0.01, %v1819_v47  ;;  %v8211_v41 = vcvt.s32.f32 %v6246_v54  ;;  %v1966_v63 = vsel %vm1005_vm1, %v1960_v1, %v7969_v25 }
 0x16e   : > { %v1967_v56 = vsel %vm1005_vm1, %v1959_v15, %v1960_v1  ;;  %v1739_v6 = vmul.f32 %v5861_v39, %v1694_v21  ;;  %v1518_v59 = vadd.f32 %v1482_v48, %v1261_v36  ;;  %v2032_v43 = vmax.f32 %v1924_v46, %v1966_v63  ;;  %v8213_v21 = vld [vmem:[#allocation4_spill] sm:$0xff] }
 0x16f   : > { %v6377_v19 = vsub.f32 %v8211_v41, %v498_v4  ;;  %v1927_v0 = vsel %vm1855_vm15, %v1819_v47, %v1891_v45  ;;  %v2065_v38 = vmul.f32 %v6332_v44, %v2029_v26  ;;  %v2210_v54 = vrot.slane %v2066_v49, 1  ;;  %v2345_v15 = vpop.permute.xlu1 %2344 }
 0x170   : > { %v1963_v4 = vrot.slane %v1927_v0, 1  ;;  %v1775_v28 = vadd.f32 %v1739_v6, %v1518_v59  ;;  %v2031_v7 = vmax.f32 %v1923_v5, %v1967_v56  ;;  %v2102_v32 = vrot.slane %v2066_v49, 7  ;;  %v2343_v47 = vpop.permute.xlu0 %2342 }
 0x171   : > { %8212 = vst [vmem:[#allocation46_spill] sm:$0xff] %v6377_v19  ;;  %v6390_v41 = vmul.f32 %v6320_v10, %v2032_v43  ;;  %v2176_v25 = vpack.c.bf16 %v2065_v38, %v6239_v8  ;;  %v2209_v1 = vrot.slane %v2065_v38, 1  ;;  %v2101_v39 = vrot.slane %v2065_v38, 7 }
 0x172   : > { %v8214_v36 = vrot.slane %v8213_v21, 1  ;;  %v1818_v44 = vadd.f32 %v6021_v53, %v1775_v28  ;;  %v2067_v48 = vmul.f32 %v4101_v3, %v2031_v7  ;;  %vm570_vm2 = vcmp.lt.f32.partialorder %v6377_v19, 63.0 }
 0x173   : > { %2316 = vrot.lane.b32.xlu0 %v2176_v25, %s4430_s16  ;;  %v2221_v10 = vsel %vm1005_vm1, %v2209_v1, %v2210_v54  ;;  %v8215_v26 = vrot.slane %v6239_v8, 1  ;;  %v2212_v63 = vrot.slane %v6390_v41, 1  ;;  %v6408_v59 = vpop.permute.xlu1 %2294  ;;  %v8216_v25 = vrot.slane %v6239_v8, 7 }
 0x174   : > { %v1999_v46 = vsel %vm1005_vm1, %v1963_v4, %v8214_v36  ;;  %vm1854_vm3 = vcmp.gt.f32.partialorder %v1818_v44, 0.0  ;;  %v1890_v56 = vmul.f32 0.01, %v1818_v44  ;;  %v2177_v6 = vpack.c.bf16 %v2067_v48, %v2066_v49  ;;  %v2293_v7 = vpop.permute.xlu0 %2292 }
 0x175   : > { %v2035_v5 = vmax.f32 %v1927_v0, %v1999_v46  ;;  %v2222_v45 = vsel %vm1005_vm1, %v8215_v26, %v2209_v1  ;;  %v2211_v43 = vrot.slane %v2067_v48, 1  ;;  %v6414_v0 = vsel %vm932_vm0, %v8216_v25, %v2101_v39 }
 0x176   : > { %v2266_v53 = vpack.c.bf16 %v2221_v10, %v2222_v45  ;;  %v6418_v38 = vsel %vm932_vm0, %v2101_v39, %v2102_v32  ;;  %v1926_v28 = vsel %vm1854_vm3, %v1818_v44, %v1890_v56  ;;  %2318 = vrot.lane.b32.xlu1 %v2177_v6, %s4430_s16  ;;  %v2103_v49 = vrot.slane %v2067_v48, 7 }
 0x177   : > { %v2071_v3 = vmul.f32 %v6329_v30, %v2035_v5  ;;  %v2158_v30 = vpack.c.bf16 %v6414_v0, %v6297_v57  ;;  %v1962_v1 = vrot.slane %v1926_v28, 1  ;;  %v2219_v8 = vsel %vm1005_vm1, %v2211_v43, %v2212_v63 }
 0x178   : > { %2370 = vrot.lane.b32.xlu0 %v2266_v53, %s4431_s17  ;;  %v4103_v39 = vsel %vm569_vm14, 1.0, %v8066_v55  ;;  %v2220_v36 = vsel %vm1005_vm1, %v2210_v54, %v2211_v43  ;;  %v4104_v46 = vsel %vm570_vm2, 1.0, %v8066_v55  ;;  %v6436_v44 = vsel %vm932_vm0, %v2102_v32, %v2103_v49  ;;  %v2347_v6 = vpop.permute.xlu0 %2346 }
 0x179   : > { %v2107_v21 = vrot.slane %v2071_v3, 7  ;;  %v2104_v48 = vrot.slane %v6390_v41, 7  ;;  %v1964_v5 = vsel %vm1005_vm1, %v1962_v1, %v1963_v4  ;;  %v8217_v10 = vrot.slane %v5396_v50, 7  ;;  %v2349_v4 = vpop.permute.xlu1 %2348 }
 0x17a   : > { %v2267_v45 = vpack.c.bf16 %v2219_v8, %v2220_v36  ;;  %v8218_v54 = vrot.slane %v6361_v51, 1  ;;  %v2034_v53 = vmax.f32 %v1926_v28, %v1964_v5  ;;  %vm2378_vm4 = vcmask 130048  }
 0x17b   : > { %v2143_v26 = vsel %vm932_vm0, %v2107_v21, %v8217_v10  ;;  %vm2433_vm5 = vcmask 261120   ;;  %vm2501_vm6 = vcmask 392192   ;;  %v2159_v25 = vpack.c.bf16 %v6436_v44, %v6418_v38 }
 0x17c   : > { %v1965_v56 = vsel %vm1005_vm1, %v8218_v54, %v1962_v1  ;;  %v2144_v32 = vpack.c.bf16 %v5696_v52, %v2143_v26  ;;  %2372 = vrot.lane.b32.xlu1 %v2267_v45, %s4431_s17  ;;  %v6456_v8 = vsel %vm932_vm0, %v2103_v49, %v2104_v48  ;;  %v2070_v52 = vmul.f32 %v4104_v46, %v2034_v53  ;;  %v2297_v49 = vpop.permute.xlu0 %2296 }
 0x17d   : > { %v2033_v43 = vmax.f32 %v6361_v51, %v1965_v56  ;;  %v2215_v36 = vrot.slane %v2071_v3, 1  ;;  %v8219_v51 = vpack.c.bf16 %v5690_v11, %v5648_v62 }
 0x17e   : > { %v2381_v28 = vsel %vm2378_vm4, %v2144_v32, %v6386_v24  ;;  %v2179_v54 = vpack.c.bf16 %v2071_v3, %v2070_v52  ;;  %v2214_v62 = vrot.slane %v2070_v52, 1 }
 0x17f   : > { %v2069_v1 = vmul.f32 %v4103_v39, %v2033_v43  ;;  %v2384_v5 = vsel %vm2378_vm4, %v8219_v51, %v6373_v35  ;;  %v2435_v10 = vsel %vm2433_vm5, %v2381_v28, %v2343_v47  ;;  %v8220_v39 = vpack.c.bf16 %v5848_v37, %v5854_v58  ;;  %v2299_v58 = vpop.permute.xlu1 %2298 }
 0x180   : > { %v2437_v26 = vsel %vm2433_vm5, %v2384_v5, %v2345_v15  ;;  %4284 = vmatprep.mubr.msk.bf16.mxu0 %vm2501_vm6, %v2435_v10  ;;  %v2106_v35 = vrot.slane %v2070_v52, 7  ;;  %2322 = vrot.lane.b32.xlu1 %v2179_v54, %s4430_s16  ;;  %v8221_v15 = vrot.slane %v5396_v50, 1  ;;  %v2351_v50 = vpop.permute.xlu0 %2350  ;;  %v8222_v28 = vpack.c.bf16 %v5826_v17, %v5805_v61  ;;  %v8224_v61 = vld [vmem:[#allocation11_spill] sm:$0xff] }
 0x181   : > { %v2178_v45 = vpack.c.bf16 %v2069_v1, %v6390_v41  ;;  %v2213_v24 = vrot.slane %v2069_v1, 1  ;;  %v2387_v46 = vsel %vm2378_vm4, %v8220_v39, %v2293_v7  ;;  %4285 = vmatmul.mubr.msk.bf16.vlgmr.msra.gmra.mxu0 %vm2501_vm6, %v2437_v26  ;;  %v2105_v11 = vrot.slane %v2069_v1, 7 }
 0x182   : > { %v2439_v47 = vsel %vm2433_vm5, %v2387_v46, %v2347_v6  ;;  %v2251_v37 = vsel %vm1005_vm1, %v2215_v36, %v8221_v15  ;;  %v2216_v7 = vsel %vm1005_vm1, %v2214_v62, %v2215_v36  ;;  %v6490_v56 = vsel %vm932_vm0, %v2106_v35, %v2107_v21  ;;  %v8229_v46 = vld [vmem:[#allocation29_spill] sm:$0xff] }
 0x183   : > { %2320 = vrot.lane.b32.xlu0 %v2178_v45, %s4430_s16  ;;  %v2218_v41 = vsel %vm1005_vm1, %v2212_v63, %v2213_v24  ;;  %4288 = vmatprep.mubr.msk.bf16.mxu0 %vm2501_vm6, %v2439_v47  ;;  %v2217_v3 = vsel %vm1005_vm1, %v2213_v24, %v2214_v62  ;;  %v6494_v63 = vsel %vm932_vm0, %v2105_v11, %v2106_v35  ;;  %v2353_v5 = vpop.permute.xlu1 %2352  ;;  %v8230_v62 = vld [vmem:[#allocation2_spill] sm:$0xff] }
 0x184   : > { %v2268_v53 = vpack.c.bf16 %v2217_v3, %v2218_v41  ;;  %v2269_v32 = vpack.c.bf16 %v2251_v37, %v2216_v7  ;;  %v2161_v6 = vpack.c.bf16 %v6490_v56, %v6494_v63  ;;  %v6500_v43 = vsel %vm932_vm0, %v2104_v48, %v2105_v11  ;;  %v2301_v51 = vpop.permute.xlu0 %2300  ;;  %v4397_v56 = vld [vmem:[%s7854_s5 + $0x38] sm:$0xff]  }
 0x185   : > { %v2160_v21 = vpack.c.bf16 %v6500_v43, %v6456_v8  ;;  %v2390_v1 = vsel %vm2378_vm4, %v8222_v28, %v6408_v59  ;;  %v8223_v36 = vpack.c.bf16 %v5940_v60, %v5957_v16  ;;  %v8225_v17 = vpack.c.bf16 %v5918_v9, %v8224_v61  ;;  %v8226_v16 = vld [vmem:[#allocation30_spill] sm:$0xff]  ;;  %v8227_v60 = vld [vmem:[#allocation32_spill] sm:$0xff]  ;;  %3365 = vmatpush1.bf16.msra.mxu1 %v4397_v56 }
 0x186   : > { %2376 = vrot.lane.b32.xlu1 %v2269_v32, %s4431_s17  ;;  %v2441_v52 = vsel %vm2433_vm5, %v2390_v1, %v2349_v4  ;;  %v8231_v9 = vpack.c.bf16 %v8229_v46, %v8230_v62  ;;  %v8232_v41 = vpack.c.bf16 %v6089_v33, %v6095_v31  ;;  %v8233_v7 = vpack.c.bf16 %v6130_v18, %v6124_v42  ;;  %v8234_v33 = vld [vmem:[#allocation36_spill] sm:$0xff]  ;;  %v8236_v42 = vld [vmem:[#allocation38_spill] sm:$0xff]  ;;  %v8237_v18 = vld [vmem:[#allocation37_spill] sm:$0xff] }
 0x187   : > { %2374 = vrot.lane.b32.xlu0 %v2268_v53, %s4431_s17  ;;  %v2393_v48 = vsel %vm2378_vm4, %v8223_v36, %v2297_v49  ;;  %v2396_v59 = vsel %vm2378_vm4, %v8225_v17, %v2299_v58  ;;  %v2303_v4 = vpop.permute.xlu1 %2302  ;;  %v8228_v49 = vpack.c.bf16 %v8226_v16, %v8227_v60  ;;  %v8235_v31 = vpack.c.bf16 %v6134_v23, %v8234_v33  ;;  %v4389_v23 = vld [vmem:[%s7854_s5 + $0xb8] sm:$0xff]   ;;  %v4390_v60 = vld [vmem:[%s7854_s5 + $0xb0] sm:$0xff]   ;;  %v4395_v46 = vld [vmem:[%s7854_s5 + $0x88] sm:$0xff]  }
 0x188   : > { %v2443_v10 = vsel %vm2433_vm5, %v2393_v48, %v2351_v50  ;;  %v2355_v26 = vpop.permute.xlu0 %2354  ;;  %v2445_v45 = vsel %vm2433_vm5, %v2396_v59, %v2353_v5  ;;  %v2402_v11 = vsel %vm2378_vm4, %v8231_v9, %v2303_v4  ;;  %4320 = vmatprep.subr.bf16.mxu0 %v4389_v23  ;;  %v8239_v59 = vpack.c.bf16 %v6263_v20, %v6180_v29  ;;  %v4391_v29 = vld [vmem:[%s7854_s5 + $0xa8] sm:$0xff]   ;;  %v4398_v8 = vld [vmem:[%s7854_s5 + $0x30] sm:$0xff]   ;;  %v4400_v43 = vld [vmem:[%s7854_s5 + $0x20] sm:$0xff]  }
 0x189   : > { %4289 = vmatmul.mubr.msk.bf16.gmra.mxu0 %vm2501_vm6, %v2441_v52  ;;  %v2399_v54 = vsel %vm2378_vm4, %v8228_v49, %v2301_v51  ;;  %v8238_v51 = vpack.c.bf16 %v8236_v42, %v8237_v18  ;;  %v8240_v49 = vpack.c.bf16 %v6291_v27, %v6274_v22  ;;  %v4393_v22 = vld [vmem:[%s7854_s5 + $0x98] sm:$0xff]   ;;  %v4394_v27 = vld [vmem:[%s7854_s5 + $0x90] sm:$0xff]   ;;  %v8241_v63 = vmov 0   ;;  %v8248_v42 = vld [vmem:[#allocation35_spill] sm:$0xff] }
 0x18a   : > { %4292 = vmatprep.mubr.msk.bf16.mxu0 %vm2501_vm6, %v2443_v10  ;;  %v2447_v24 = vsel %vm2433_vm5, %v2399_v54, %v2355_v26  ;;  %4321 = vmatpush3.bf16.msra.mxu0 %v4389_v23  ;;  %v8243_v33 = vld [vmem:[#allocation9_spill] sm:$0xff]  ;;  %vm654_vm13 = vcmp.lt.f32.partialorder %v8248_v42, 62.0 }
 0x18b   : > { %v2357_v39 = vpop.permute.xlu1 %2356  ;;  %4322 = vmatprep.subr.bf16.mxu0 %v4390_v60  ;;  %3366 = vmatprep.subr.bf16.mxu1 %v8241_v63  ;;  %vm647_vm8 = vcmp.lt.f32.partialorder %v8243_v33, 62.0  ;;  %v8249_v18 = vld [vmem:[#allocation5_spill] sm:$0xff] }
 0x18c   : > { %v2449_v35 = vsel %vm2433_vm5, %v2402_v11, %v2357_v39  ;;  %v4392_v39 = vld [vmem:[%s7854_s5 + $0xa0] sm:$0xff]   ;;  %3367 = vmatpush1.bf16.msra.mxu1 %v4398_v8  ;;  %vm644_vm14 = vcmp.lt.f32.partialorder %v8249_v18, 62.0 }
 0x18d   : > { %3368 = vmatprep.subr.bf16.mxu1 %v8241_v63 }
 0x18e   : > { %4323 = vmatpush3.bf16.msra.mxu0 %v4390_v60 }
 0x18f   : > { %4324 = vmatprep.subr.bf16.mxu0 %v4391_v29 }
 0x191   : > { %4293 = vmatmul.mubr.msk.bf16.gmra.mxu0 %vm2501_vm6, %v2445_v45 }
 0x192   : > { %4296 = vmatprep.mubr.msk.bf16.mxu0 %vm2501_vm6, %v2447_v24  ;;  %4325 = vmatpush3.bf16.msra.mxu0 %v4391_v29 }
 0x193   : > { %v2305_v47 = vpop.permute.xlu0 %2304  ;;  %4326 = vmatprep.subr.bf16.mxu0 %v4392_v39 }
 0x194   : > { %v2405_v15 = vsel %vm2378_vm4, %v8232_v41, %v2305_v47  ;;  %v4396_v41 = vld [vmem:[%s7854_s5 + $0x80] sm:$0xff]  }
 0x196   : > { %4327 = vmatpush3.bf16.msra.mxu0 %v4392_v39  ;;  %v8255_v39 = vld [vmem:[#allocation34_spill] sm:$0xff] }
 0x197   : > { %4328 = vmatprep.subr.bf16.mxu0 %v4393_v22 }
 0x199   : > { %4297 = vmatmul.mubr.msk.bf16.gmra.mxu0 %vm2501_vm6, %v2449_v35  ;;  %v2359_v37 = vpop.permute.xlu0 %2358 }
 0x19a   : > { %v2451_v58 = vsel %vm2433_vm5, %v2405_v15, %v2359_v37  ;;  %v2307_v3 = vpop.permute.xlu1 %2306  ;;  %4329 = vmatpush3.bf16.msra.mxu0 %v4393_v22  ;;  %v8256_v22 = vld [vmem:[#allocation41_spill] sm:$0xff] }
 0x19b   : > { %4300 = vmatprep.mubr.msk.bf16.mxu0 %vm2501_vm6, %v2451_v58  ;;  %v2408_v50 = vsel %vm2378_vm4, %v8233_v7, %v2307_v3  ;;  %4330 = vmatprep.subr.bf16.mxu0 %v4394_v27 }
 0x19e   : > { %v2361_v53 = vpop.permute.xlu1 %2360  ;;  %4331 = vmatpush3.bf16.msra.mxu0 %v4394_v27  ;;  %v4406_v27 = vld [vmem:[%s7854_s5 + $0x70] sm:$0xff]  }
 0x19f   : > { %v2453_v32 = vsel %vm2433_vm5, %v2408_v50, %v2361_v53  ;;  %4332 = vmatprep.subr.bf16.mxu0 %v4395_v46  ;;  %v4402_v50 = vld [vmem:[%s7854_s5 + $0x10] sm:$0xff]   ;;  %v4403_v53 = vld [vmem:[%s7854_s5 + $0x8] sm:$0xff]  }
 0x1a1   : > { %4301 = vmatmul.mubr.msk.bf16.gmra.mxu0 %vm2501_vm6, %v2453_v32  ;;  %v4404_v32 = vld [vmem:[%s7854_s5] sm:$0xff]  }
 0x1a2   : > { %4333 = vmatpush3.bf16.msra.mxu0 %v4395_v46 }
 0x1a3   : > { %4334 = vmatprep.subr.bf16.mxu0 %v4396_v41 }
 0x1a6   : > { %4335 = vmatpush3.bf16.msra.mxu0 %v4396_v41 }
 0x1ad   : > { %v2309_v28 = vpop.permute.xlu0 %2308 }
 0x1ae   : > { %v2411_v1 = vsel %vm2378_vm4, %v8235_v31, %v2309_v28  ;;  %v8242_v28 = vld [vmem:[#allocation7_spill] sm:$0xff]  ;;  %v8244_v31 = vld [vmem:[#allocation24_spill] sm:$0xff] }
 0x1af   : > { %vm646_vm7 = vcmp.lt.f32.partialorder %v8242_v28, 62.0  ;;  %vm650_vm9 = vcmp.lt.f32.partialorder %v8244_v31, 62.0 }
 0x1b2   : > { %v2363_v52 = vpop.permute.xlu0 %2362  ;;  %v2311_v48 = vpop.permute.xlu1 %2310 }
 0x1b3   : > { %v2455_v36 = vsel %vm2433_vm5, %v2411_v1, %v2363_v52  ;;  %v2414_v5 = vsel %vm2378_vm4, %v8238_v51, %v2311_v48  ;;  %v8245_v1 = vld [vmem:[#allocation8_spill] sm:$0xff]  ;;  %v6658_v52 = vsel %vm646_vm7, 1.0, %v8066_v55  ;;  %v8247_v48 = vld [vmem:[#allocation25_spill] sm:$0xff]  ;;  %vm657_vm7 = vcmp.lt.f32.partialorder %v8256_v22, 62.0 }
 0x1b4   : > { %4304 = vmatprep.mubr.msk.bf16.mxu0 %vm2501_vm6, %v2455_v36  ;;  %vm648_vm10 = vcmp.lt.f32.partialorder %v8245_v1, 62.0  ;;  %v8246_v36 = vld [vmem:[#allocation23_spill] sm:$0xff]  ;;  %vm651_vm12 = vcmp.lt.f32.partialorder %v8247_v48, 62.0  ;;  %v4405_v51 = vld [vmem:[%s7854_s5 + $0x78] sm:$0xff]  }
 0x1b5   : > { %vm649_vm11 = vcmp.lt.f32.partialorder %v8246_v36, 62.0  ;;  %v6679_v23 = vsel %vm648_vm10, 1.0, %v8066_v55 }
 0x1b6   : > { %v2365_v10 = vpop.permute.xlu1 %2364  ;;  %v6689_v60 = vsel %vm649_vm11, 1.0, %v8066_v55 }
 0x1b7   : > { %v2457_v26 = vsel %vm2433_vm5, %v2414_v5, %v2365_v10  ;;  %v6670_v5 = vld [vmem:[%s7853_s4] ss:$0 sm:$0xff]  ;;  %v6673_v10 = vsel %vm647_vm8, 1.0, %v8066_v55 }
 0x1b8   : > { %4305 = vmatmul.mubr.msk.bf16.gmra.mxu0 %vm2501_vm6, %v2457_v26  ;;  %v6676_v26 = vsel %vm650_vm9, 1.0, %v8066_v55 }
 0x1c6   : > { %v2313_v61 = vpop.permute.xlu0 %2312 }
 0x1c7   : > { %v2417_v4 = vsel %vm2378_vm4, %v8239_v59, %v2313_v61  ;;  %v8250_v61 = vld [vmem:[#allocation6_spill] sm:$0xff]  ;;  %v8252_v59 = vld [vmem:[#allocation33_spill] sm:$0xff] }
 0x1c8   : > { %vm645_vm15 = vcmp.lt.f32.partialorder %v8250_v61, 62.0  ;;  %vm653_vm3 = vcmp.lt.f32.partialorder %v8252_v59, 62.0 }
 0x1c9   : > { %v2315_v17 = vpop.permute.xlu1 %2314 }
 0x1ca   : > { %v2420_v54 = vsel %vm2378_vm4, %v8240_v49, %v2315_v17  ;;  %v8251_v17 = vld [vmem:[#allocation22_spill] sm:$0xff]  ;;  %v6694_v49 = vsel %vm651_vm12, 1.0, %v8066_v55 }
 0x1cb   : > { %v2367_v45 = vpop.permute.xlu0 %2366  ;;  %vm652_vm2 = vcmp.lt.f32.partialorder %v8251_v17, 62.0 }
 0x1cc   : > { %v2459_v16 = vsel %vm2433_vm5, %v2417_v4, %v2367_v45  ;;  %v8253_v4 = vld [vmem:[#allocation40_spill] sm:$0xff]  ;;  %v8254_v45 = vld [vmem:[#allocation39_spill] sm:$0xff] }
 0x1cd   : > { %4308 = vmatprep.mubr.msk.bf16.mxu0 %vm2501_vm6, %v2459_v16 }
 0x1ce   : > { %v2369_v24 = vpop.permute.xlu1 %2368 }
 0x1cf   : > { %v2461_v20 = vsel %vm2433_vm5, %v2420_v54, %v2369_v24  ;;  %v6699_v54 = vsel %vm654_vm13, 1.0, %v8066_v55  ;;  %v6704_v24 = vsel %vm644_vm14, 1.0, %v8066_v55 }
 0x1d0   : > { %4309 = vmatmul.mubr.msk.bf16.gmra.mxu0 %vm2501_vm6, %v2461_v20  ;;  %v6709_v20 = vsel %vm645_vm15, 1.0, %v8066_v55 }
 0x1e5   : > { %v2317_v62 = vpop.permute.xlu0 %2316 }
 0x1e6   : > { %v2423_v11 = vsel %vm2378_vm4, %v2158_v30, %v2317_v62  ;;  %v6719_v62 = vsel %vm652_vm2, 1.0, %v8066_v55 }
 0x1e8   : > { %v2319_v9 = vpop.permute.xlu1 %2318 }
 0x1e9   : > { %v2426_v15 = vsel %vm2378_vm4, %v2159_v25, %v2319_v9  ;;  %v6724_v9 = vsel %vm653_vm3, 1.0, %v8066_v55 }
 0x1ea   : > { %v2371_v35 = vpop.permute.xlu0 %2370 }
 0x1eb   : > { %v2463_v47 = vsel %vm2433_vm5, %v2423_v11, %v2371_v35 }
 0x1ec   : > { %4312 = vmatprep.mubr.msk.bf16.mxu0 %vm2501_vm6, %v2463_v47 }
 0x1ee   : > { %v2373_v37 = vpop.permute.xlu1 %2372 }
 0x1ef   : > { %v2465_v57 = vsel %vm2433_vm5, %v2426_v15, %v2373_v37  ;;  %v8257_v15 = vld [vmem:[#allocation43_spill] sm:$0xff]  ;;  %v8258_v37 = vld [vmem:[#allocation44_spill] sm:$0xff] }
 0x1f0   : > { %4313 = vmatmul.mubr.msk.bf16.gmra.mxu0 %vm2501_vm6, %v2465_v57  ;;  %vm659_vm8 = vcmp.lt.f32.partialorder %v8257_v15, 62.0  ;;  %vm662_vm9 = vcmp.lt.f32.partialorder %v8258_v37, 62.0  ;;  %v4407_v57 = vld [vmem:[%s7854_s5 + $0x68] sm:$0xff]  }
 0x1f1   : > { %v6757_v56 = vsel %vm659_vm8, 1.0, %v8066_v55  ;;  %v6760_v8 = vsel %vm662_vm9, 1.0, %v8066_v55 }
 0x1f2   : > { %v2323_v0 = vpop.permute.xlu1 %2322 }
 0x1f3   : > { %v2432_v58 = vsel %vm2378_vm4, %v2161_v6, %v2323_v0  ;;  %v4399_v6 = vld [vmem:[%s7854_s5 + $0x28] sm:$0xff]  }
 0x1f4   : > { %3369 = vmatpush1.bf16.msra.mxu1 %v4399_v6  ;;  %v8261_v6 = vld [vmem:[#allocation19_spill] sm:$0xff] }
 0x1f5   : > { %v2321_v30 = vpop.permute.xlu0 %2320  ;;  %3370 = vmatprep.subr.bf16.mxu1 %v8241_v63  ;;  %vm663_vm14 = vcmp.lt.f32.partialorder %v8261_v6, 62.0 }
 0x1f6   : > { %v2429_v38 = vsel %vm2378_vm4, %v2160_v21, %v2321_v30  ;;  %v4401_v21 = vld [vmem:[%s7854_s5 + $0x18] sm:$0xff]   ;;  %vm655_vm4 = vcmp.lt.f32.partialorder %v8253_v4, 62.0  ;;  %v6787_v37 = vsel %vm663_vm14, 1.0, %v8066_v55 }
 0x1f7   : > { %v6729_v11 = vsel %vm655_vm4, 1.0, %v8066_v55 }
 0x1f8   : > { %v2377_v44 = vpop.permute.xlu1 %2376  ;;  %3371 = vmatpush1.bf16.msra.mxu1 %v4400_v43  ;;  %v8262_v43 = vld [vmem:[#allocation27_spill] sm:$0xff] }
 0x1f9   : > { %v2375_v25 = vpop.permute.xlu0 %2374  ;;  %v2469_v3 = vsel %vm2433_vm5, %v2432_v58, %v2377_v44  ;;  %3372 = vmatprep.subr.bf16.mxu1 %v8241_v63  ;;  %v6750_v58 = vsel %vm657_vm7, 1.0, %v8066_v55  ;;  %vm666_vm15 = vcmp.lt.f32.partialorder %v8262_v43, 62.0 }
 0x1fa   : > { %v2467_v7 = vsel %vm2433_vm5, %v2429_v38, %v2375_v25  ;;  %vm658_vm5 = vcmp.lt.f32.partialorder %v8254_v45, 62.0  ;;  %v8259_v38 = vld [vmem:[#allocation42_spill] sm:$0xff] }
 0x1fb   : > { %4316 = vmatprep.mubr.msk.bf16.mxu0 %vm2501_vm6, %v2467_v7  ;;  %v6734_v35 = vsel %vm658_vm5, 1.0, %v8066_v55  ;;  %vm660_vm11 = vcmp.lt.f32.partialorder %v8259_v38, 62.0 }
 0x1fc   : > { %4317 = vmatmul.mubr.msk.bf16.gmra.mxu0 %vm2501_vm6, %v2469_v3  ;;  %3373 = vmatpush1.bf16.msra.mxu1 %v4401_v21  ;;  %vm656_vm6 = vcmp.lt.f32.partialorder %v8255_v39, 62.0  ;;  %v8260_v3 = vld [vmem:[#allocation10_spill] sm:$0xff] }
 0x1fd   : > { %3374 = vmatprep.subr.bf16.mxu1 %v8241_v63  ;;  %v6745_v30 = vsel %vm656_vm6, 1.0, %v8066_v55  ;;  %vm661_vm13 = vcmp.lt.f32.partialorder %v8260_v3, 62.0  ;;  %v6792_v3 = vsel %vm666_vm15, 1.0, %v8066_v55 }
 0x200   : > { %3375 = vmatpush1.bf16.msra.mxu1 %v4402_v50 }
 0x201   : > { %3376 = vmatprep.subr.bf16.mxu1 %v8241_v63 }
 0x204   : > { %3377 = vmatpush1.bf16.msra.mxu1 %v4403_v53 }
 0x205   : > { %3378 = vmatprep.subr.bf16.mxu1 %v8241_v63 }
 0x208   : > { %3379 = vmatpush1.bf16.msra.mxu1 %v4404_v32 }
 0x209   : > { %3380 = vmatprep.subr.bf16.mxu1 %v8241_v63 }
 0x20c   : > { %3381 = vmatpush2.bf16.msra.mxu1 %v4405_v51 }
 0x20d   : > { %3382 = vmatprep.subr.bf16.mxu1 %v8241_v63 }
 0x210   : > { %3383 = vmatpush2.bf16.msra.mxu1 %v4406_v27  ;;  %v6773_v27 = vsel %vm661_vm13, 1.0, %v8066_v55 }
 0x211   : > { %3384 = vmatprep.subr.bf16.mxu1 %v8241_v63 }
 0x214   : > { %3385 = vmatpush2.bf16.msra.mxu1 %v4407_v57 }
 0x215   : > { %3386 = vmatprep.subr.bf16.mxu1 %v8241_v63 }
 0x241   : > { %v4286_v16 = vpop.f32.mrf.mxu0 }
 0x242   : > { %v2581_v29 = vadd.f32 %v4286_v16, %v6670_v5  ;;  %v6770_v16 = vsel %vm660_vm11, 1.0, %v8066_v55 }
 0x243   : > { %v2572_v46 = vpop.f32.mrf.mxu0 }
 0x244   : > { %v2753_v47 = vmul.f32 0.01, %v2581_v29  ;;  %v2573_v41 = vadd.f32 %v6670_v5, %v2572_v46  ;;  %vm2717_vm10 = vcmp.gt.f32.partialorder %v2581_v29, 0.0  ;;  %v8263_v46 = vld [vmem:[#allocation3_spill] sm:$0xff] }
 0x245   : > { %v4287_v0 = vpop.f32.mrf.mxu0  ;;  %vm664_vm3 = vcmp.lt.f32.partialorder %v8263_v46, 62.0 }
 0x246   : > { %vm2715_vm12 = vcmp.gt.f32.partialorder %v2573_v41, 0.0  ;;  %v2751_v44 = vmul.f32 0.01, %v2573_v41  ;;  %v2584_v25 = vadd.f32 %v4287_v0, %v6670_v5  ;;  %v2789_v21 = vsel %vm2717_vm10, %v2581_v29, %v2753_v47  ;;  %v4408_v29 = vld [vmem:[%s7854_s5 + $0x60] sm:$0xff]  }
 0x247   : > { %v2575_v7 = vpop.f32.mrf.mxu0  ;;  %v2825_v0 = vrot.slane %v2789_v21, 1  ;;  %3387 = vmatpush2.bf16.msra.mxu1 %v4408_v29  ;;  %v6801_v22 = vsel %vm664_vm3, 1.0, %v8066_v55 }
 0x248   : > { %vm2718_vm2 = vcmp.gt.f32.partialorder %v2584_v25, 0.0  ;;  %v2754_v50 = vmul.f32 0.01, %v2584_v25  ;;  %v2576_v53 = vadd.f32 %v6670_v5, %v2575_v7  ;;  %v6765_v32 = vsel %vm2715_vm12, %v2573_v41, %v2751_v44  ;;  %3388 = vmatprep.subr.bf16.mxu1 %v8241_v63 }
 0x249   : > { %v4290_v51 = vpop.f32.mrf.mxu0  ;;  %v8264_v46 = vrot.slane %v6765_v32, 1 }
 0x24a   : > { %v6780_v47 = vsel %vm2718_vm2, %v2584_v25, %v2754_v50  ;;  %vm2716_vm4 = vcmp.gt.f32.partialorder %v2576_v53, 0.0  ;;  %v2752_v41 = vmul.f32 0.01, %v2576_v53  ;;  %v2597_v57 = vadd.f32 %v4290_v51, %v6670_v5 }
 0x24b   : > { %v2826_v44 = vrot.slane %v6780_v47, 1  ;;  %v2588_v7 = vpop.f32.mrf.mxu0 }
 0x24c   : > { %v2788_v25 = vsel %vm2716_vm4, %v2576_v53, %v2752_v41  ;;  %vm2721_vm5 = vcmp.gt.f32.partialorder %v2597_v57, 0.0  ;;  %v2757_v50 = vmul.f32 0.01, %v2597_v57  ;;  %v2589_v38 = vadd.f32 %v6670_v5, %v2588_v7  ;;  %v4409_v53 = vld [vmem:[%s7854_s5 + $0x58] sm:$0xff]  }
 0x24d   : > { %v2891_v15 = vsel %vm1005_vm1, %v2825_v0, %v2826_v44  ;;  %v2824_v45 = vrot.slane %v2788_v25, 1  ;;  %v4291_v6 = vpop.f32.mrf.mxu0  ;;  %3389 = vmatpush2.bf16.msra.mxu1 %v4409_v53 }
 0x24e   : > { %v2897_v41 = vmax.f32 %v2789_v21, %v2891_v15  ;;  %v2793_v29 = vsel %vm2721_vm5, %v2597_v57, %v2757_v50  ;;  %vm2719_vm6 = vcmp.gt.f32.partialorder %v2589_v38, 0.0  ;;  %v2755_v7 = vmul.f32 0.01, %v2589_v38  ;;  %v4410_v57 = vld [vmem:[%s7854_s5 + $0x50] sm:$0xff]   ;;  %3390 = vmatprep.subr.bf16.mxu1 %v8241_v63 }
 0x24f   : > { %v2892_v51 = vsel %vm1005_vm1, %v2824_v45, %v2825_v0  ;;  %v2829_v43 = vrot.slane %v2793_v29, 1  ;;  %v2600_v39 = vadd.f32 %v4291_v6, %v6670_v5  ;;  %v2591_v4 = vpop.f32.mrf.mxu0  ;;  %v2893_v42 = vsel %vm1005_vm1, %v8264_v46, %v2824_v45 }
 0x250   : > { %v6815_v59 = vmul.f32 %v6658_v52, %v2897_v41  ;;  %v2896_v17 = vmax.f32 %v2788_v25, %v2892_v51  ;;  %v2791_v15 = vsel %vm2719_vm6, %v2589_v38, %v2755_v7  ;;  %v2592_v21 = vadd.f32 %v6670_v5, %v2591_v4 }
 0x251   : > { %v2827_v0 = vrot.slane %v2791_v15, 1  ;;  %vm2722_vm7 = vcmp.gt.f32.partialorder %v2600_v39, 0.0  ;;  %v2758_v6 = vmul.f32 0.01, %v2600_v39  ;;  %v4294_v50 = vpop.f32.mrf.mxu0  ;;  %v2895_v48 = vmax.f32 %v6765_v32, %v2893_v42  ;;  %3391 = vmatpush2.bf16.msra.mxu1 %v4410_v57 }
 0x252   : > { %vm2720_vm8 = vcmp.gt.f32.partialorder %v2592_v21, 0.0  ;;  %v2756_v52 = vmul.f32 0.01, %v2592_v21  ;;  %v2613_v45 = vadd.f32 %v4294_v50, %v6670_v5  ;;  %v6825_v38 = vmul.f32 %v6709_v20, %v2896_v17  ;;  %v4411_v17 = vld [vmem:[%s7854_s5 + $0x48] sm:$0xff]   ;;  %3392 = vmatprep.subr.bf16.mxu1 %v8241_v63 }
 0x253   : > { %v2890_v4 = vsel %vm1005_vm1, %v2826_v44, %v2827_v0  ;;  %v6829_v46 = vsel %vm2722_vm7, %v2600_v39, %v2758_v6  ;;  %v2604_v25 = vpop.f32.mrf.mxu0  ;;  %v6832_v51 = vmul.f32 %v6704_v24, %v2895_v48 }
 0x254   : > { %v2898_v53 = vmax.f32 %v6780_v47, %v2890_v4  ;;  %v2830_v41 = vrot.slane %v6829_v46, 1  ;;  %v2792_v7 = vsel %vm2720_vm8, %v2592_v21, %v2756_v52  ;;  %vm2725_vm9 = vcmp.gt.f32.partialorder %v2613_v45, 0.0 }
 0x255   : > { %v2828_v20 = vrot.slane %v2792_v7, 1  ;;  %v2761_v39 = vmul.f32 0.01, %v2613_v45  ;;  %v2605_v44 = vadd.f32 %v6670_v5, %v2604_v25  ;;  %v4295_v6 = vpop.f32.mrf.mxu0  ;;  %3393 = vmatpush2.bf16.msra.mxu1 %v4411_v17 }
 0x256   : > { %v6844_v24 = vmul.f32 %v6673_v10, %v2898_v53  ;;  %v2887_v47 = vsel %vm1005_vm1, %v2829_v43, %v2830_v41  ;;  %v2616_v21 = vadd.f32 %v4295_v6, %v6670_v5  ;;  %v4412_v6 = vld [vmem:[%s7854_s5 + $0x40] sm:$0xff]   ;;  %3394 = vmatprep.subr.bf16.mxu1 %v8241_v63 }
 0x257   : > { %v2901_v50 = vmax.f32 %v2793_v29, %v2887_v47  ;;  %v2888_v52 = vsel %vm1005_vm1, %v2828_v20, %v2829_v43  ;;  %v2889_v4 = vsel %vm1005_vm1, %v2827_v0, %v2828_v20  ;;  %v2797_v25 = vsel %vm2725_vm9, %v2613_v45, %v2761_v39  ;;  %v2607_v48 = vpop.f32.mrf.mxu0 }
 0x258   : > { %v2899_v42 = vmax.f32 %v2791_v15, %v2889_v4  ;;  %v2900_v10 = vmax.f32 %v2792_v7, %v2888_v52  ;;  %v2833_v53 = vrot.slane %v2797_v25, 1  ;;  %vm2723_vm10 = vcmp.gt.f32.partialorder %v2605_v44, 0.0 }
 0x259   : > { %v6859_v29 = vmul.f32 %v6676_v26, %v2901_v50  ;;  %v2759_v47 = vmul.f32 0.01, %v2605_v44  ;;  %vm2726_vm11 = vcmp.gt.f32.partialorder %v2616_v21, 0.0  ;;  %v2762_v43 = vmul.f32 0.01, %v2616_v21  ;;  %v4298_v57 = vpop.f32.mrf.mxu0  ;;  %3395 = vmatpush2.bf16.msra.mxu1 %v4412_v6 }
 0x25a   : > { %v6863_v0 = vmul.f32 %v6679_v23, %v2899_v42  ;;  %v6866_v15 = vmul.f32 %v6689_v60, %v2900_v10  ;;  %v3057_v45 = vpack.c.bf16 %v6825_v38, %v6832_v51  ;;  %v7983_v7 = vrot.slane %v6832_v51, 1 }
 0x25b   : > { %v2795_v17 = vsel %vm2723_vm10, %v2605_v44, %v2759_v47  ;;  %v2798_v26 = vsel %vm2726_vm11, %v2616_v21, %v2762_v43  ;;  %v3076_v20 = vrot.slane %v6825_v38, 1  ;;  %v2608_v39 = vadd.f32 %v6670_v5, %v2607_v48  ;;  %v2620_v50 = vpop.f32.mrf.mxu0 }
 0x25c   : > { %v2831_v52 = vrot.slane %v2795_v17, 1  ;;  %v2834_v63 = vrot.slane %v2798_v26, 1  ;;  %3396 = vmatprep.mubr.bf16.mxu1 %v3057_v45  ;;  %v2629_v23 = vadd.f32 %v4298_v57, %v6670_v5  ;;  %v2621_v60 = vadd.f32 %v6670_v5, %v2620_v50 }
 0x25d   : > { %vm2724_vm12 = vcmp.gt.f32.partialorder %v2608_v39, 0.0  ;;  %v2760_v42 = vmul.f32 0.01, %v2608_v39  ;;  %v8265_v4 = vrot.slane %v6815_v59, 1  ;;  %v3145_v48 = vsel %vm1005_vm1, %v7983_v7, %v3076_v20  ;;  %v4299_v21 = vpop.f32.mrf.mxu0 }
 0x25e   : > { %v2886_v10 = vsel %vm1005_vm1, %v2830_v41, %v2831_v52  ;;  %v2883_v57 = vsel %vm1005_vm1, %v2833_v53, %v2834_v63  ;;  %vm2729_vm13 = vcmp.gt.f32.partialorder %v2629_v23, 0.0  ;;  %v2765_v6 = vmul.f32 0.01, %v2629_v23 }
 0x25f   : > { %v3144_v44 = vsel %vm1005_vm1, %v3076_v20, %v8265_v4  ;;  %v2902_v47 = vmax.f32 %v6829_v46, %v2886_v10  ;;  %v2905_v43 = vmax.f32 %v2797_v25, %v2883_v57  ;;  %v2796_v45 = vsel %vm2724_vm12, %v2608_v39, %v2760_v42  ;;  %v2623_v4 = vpop.f32.mrf.mxu0 }
 0x260   : > { %v3147_v50 = vpack.c.bf16 %v3144_v44, %v3145_v48  ;;  %v2832_v31 = vrot.slane %v2796_v45, 1  ;;  %v2801_v36 = vsel %vm2729_vm13, %v2629_v23, %v2765_v6  ;;  %vm2727_vm14 = vcmp.gt.f32.partialorder %v2621_v60, 0.0 }
 0x261   : > { %v2763_v1 = vmul.f32 0.01, %v2621_v60  ;;  %v6889_v20 = vmul.f32 %v6694_v49, %v2902_v47  ;;  %v6892_v41 = vmul.f32 %v6699_v54, %v2905_v43  ;;  %v2837_v7 = vrot.slane %v2801_v36, 1 }
 0x262   : > { %4336 = vmatprep.mubr.bf16.mxu0 %v3147_v50  ;;  %v2632_v33 = vadd.f32 %v4299_v21, %v6670_v5  ;;  %v2884_v46 = vsel %vm1005_vm1, %v2832_v31, %v2833_v53  ;;  %v2885_v25 = vsel %vm1005_vm1, %v2831_v52, %v2832_v31  ;;  %v2624_v23 = vadd.f32 %v6670_v5, %v2623_v4 }
 0x263   : > { %v2799_v39 = vsel %vm2727_vm14, %v2621_v60, %v2763_v1  ;;  %v2903_v42 = vmax.f32 %v2795_v17, %v2885_v25  ;;  %v2904_v44 = vmax.f32 %v2796_v45, %v2884_v46  ;;  %v3078_v10 = vrot.slane %v6844_v24, 1  ;;  %v4302_v17 = vpop.f32.mrf.mxu0 }
 0x264   : > { %v2835_v49 = vrot.slane %v2799_v39, 1  ;;  %vm2730_vm15 = vcmp.gt.f32.partialorder %v2632_v33, 0.0  ;;  %v2766_v48 = vmul.f32 0.01, %v2632_v33  ;;  %vm2728_vm2 = vcmp.gt.f32.partialorder %v2624_v23, 0.0 }
 0x265   : > { %v2764_v54 = vmul.f32 0.01, %v2624_v23  ;;  %v6902_v21 = vmul.f32 %v6719_v62, %v2903_v42  ;;  %v6905_v53 = vmul.f32 %v6724_v9, %v2904_v44  ;;  %v3079_v1 = vrot.slane %v6863_v0, 1  ;;  %v2636_v45 = vpop.f32.mrf.mxu0 }
 0x266   : > { %v2882_v31 = vsel %vm1005_vm1, %v2834_v63, %v2835_v49  ;;  %v6910_v60 = vsel %vm2730_vm15, %v2632_v33, %v2766_v48  ;;  %v8266_v6 = vrot.slane %v6815_v59, 1  ;;  %v3080_v63 = vrot.slane %v6866_v15, 1 }
 0x267   : > { %v2906_v52 = vmax.f32 %v2798_v26, %v2882_v31  ;;  %v2800_v57 = vsel %vm2728_vm2, %v2624_v23, %v2764_v54  ;;  %v2838_v62 = vrot.slane %v6910_v60, 1  ;;  %v3142_v9 = vsel %vm1005_vm1, %v3078_v10, %v3079_v1  ;;  %v4303_v44 = vpop.f32.mrf.mxu0 }
 0x268   : > { %v3143_v47 = vsel %vm1005_vm1, %v8266_v6, %v3078_v10  ;;  %v2836_v43 = vrot.slane %v2800_v57, 1  ;;  %v3081_v26 = vrot.slane %v6859_v29, 1  ;;  %v2645_v4 = vadd.f32 %v4302_v17, %v6670_v5 }
 0x269   : > { %v6921_v50 = vmul.f32 %v6729_v11, %v2906_v52  ;;  %v3148_v33 = vpack.c.bf16 %v3142_v9, %v3143_v47  ;;  %v2879_v46 = vsel %vm1005_vm1, %v2837_v7, %v2838_v62  ;;  %v3141_v42 = vsel %vm1005_vm1, %v3079_v1, %v3080_v63 }
 0x26a   : > { %v2880_v25 = vsel %vm1005_vm1, %v2836_v43, %v2837_v7  ;;  %v2881_v23 = vsel %vm1005_vm1, %v2835_v49, %v2836_v43  ;;  %v2909_v11 = vmax.f32 %v2801_v36, %v2879_v46  ;;  %v3140_v10 = vsel %vm1005_vm1, %v3080_v63, %v3081_v26  ;;  %v2639_v7 = vpop.f32.mrf.mxu0  ;;  %v8268_v43 = vld [vmem:[#allocation12_spill] sm:$0xff] }
 0x26b   : > { %v2907_v48 = vmax.f32 %v2799_v39, %v2881_v23  ;;  %v2908_v54 = vmax.f32 %v2800_v57, %v2880_v25  ;;  %4337 = vmatmul.mubr.bf16.vlgmr.msra.gmra.mxu0 %v3148_v33  ;;  %v3149_v31 = vpack.c.bf16 %v3140_v10, %v3141_v42  ;;  %vm2733_vm3 = vcmp.gt.f32.partialorder %v2645_v4, 0.0 }
 0x26c   : > { %v2769_v17 = vmul.f32 0.01, %v2645_v4  ;;  %v2637_v52 = vadd.f32 %v6670_v5, %v2636_v45  ;;  %v6937_v6 = vmul.f32 %v6734_v35, %v2909_v11  ;;  %v2648_v39 = vadd.f32 %v4303_v44, %v6670_v5 }
 0x26d   : > { %v6940_v49 = vmul.f32 %v6745_v30, %v2907_v48  ;;  %v6943_v36 = vmul.f32 %v6750_v58, %v2908_v54  ;;  %4340 = vmatprep.mubr.bf16.mxu0 %v3149_v31  ;;  %v2640_v47 = vadd.f32 %v6670_v5, %v2639_v7  ;;  %vm665_vm5 = vcmp.lt.f32.partialorder %v8268_v43, 62.0 }
 0x26e   : > { %8267 = vst [vmem:[#allocation4_spill] sm:$0xff] %v6937_v6  ;;  %v2805_v1 = vsel %vm2733_vm3, %v2645_v4, %v2769_v17  ;;  %vm2731_vm4 = vcmp.gt.f32.partialorder %v2637_v52, 0.0  ;;  %v2767_v57 = vmul.f32 0.01, %v2637_v52  ;;  %vm2734_vm6 = vcmp.gt.f32.partialorder %v2648_v39, 0.0 }
 0x26f   : > { %v2841_v9 = vrot.slane %v2805_v1, 1  ;;  %v2770_v35 = vmul.f32 0.01, %v2648_v39  ;;  %v3082_v63 = vrot.slane %v6889_v20, 1  ;;  %vm2732_vm7 = vcmp.gt.f32.partialorder %v2640_v47, 0.0 }
 0x270   : > { %v2803_v30 = vsel %vm2731_vm4, %v2637_v52, %v2767_v57  ;;  %v2768_v45 = vmul.f32 0.01, %v2640_v47  ;;  %v3083_v58 = vrot.slane %v6902_v21, 1  ;;  %v3084_v25 = vrot.slane %v6905_v53, 1 }
 0x271   : > { %v2839_v33 = vrot.slane %v2803_v30, 1  ;;  %v6950_v46 = vsel %vm2734_vm6, %v2648_v39, %v2770_v35  ;;  %v3139_v4 = vsel %vm1005_vm1, %v3081_v26, %v3082_v63  ;;  %v3085_v11 = vrot.slane %v6892_v41, 1 }
 0x272   : > { %v7985_v23 = vrot.slane %v6950_v46, 1  ;;  %v2804_v42 = vsel %vm2732_vm7, %v2640_v47, %v2768_v45  ;;  %v3138_v44 = vsel %vm1005_vm1, %v3082_v63, %v3083_v58  ;;  %v3137_v31 = vsel %vm1005_vm1, %v3083_v58, %v3084_v25 }
 0x273   : > { %v2878_v48 = vsel %vm1005_vm1, %v2838_v62, %v2839_v33  ;;  %v2840_v54 = vrot.slane %v2804_v42, 1  ;;  %v3150_v10 = vpack.c.bf16 %v3138_v44, %v3139_v4  ;;  %v3136_v52 = vsel %vm1005_vm1, %v3084_v25, %v3085_v11 }
 0x274   : > { %v2910_v26 = vmax.f32 %v6910_v60, %v2878_v48  ;;  %v2875_v17 = vsel %vm1005_vm1, %v2841_v9, %v7985_v23  ;;  %v3086_v7 = vrot.slane %v6921_v50, 1  ;;  %v3151_v47 = vpack.c.bf16 %v3136_v52, %v3137_v31 }
 0x275   : > { %v2913_v39 = vmax.f32 %v2805_v1, %v2875_v17  ;;  %v2876_v62 = vsel %vm1005_vm1, %v2840_v54, %v2841_v9  ;;  %v2877_v57 = vsel %vm1005_vm1, %v2839_v33, %v2840_v54  ;;  %4341 = vmatmul.mubr.bf16.gmra.mxu0 %v3150_v10  ;;  %v3087_v45 = vrot.slane %v6940_v49, 1 }
 0x276   : > { %v6976_v60 = vmul.f32 %v6757_v56, %v2910_v26  ;;  %v2911_v35 = vmax.f32 %v2803_v30, %v2877_v57  ;;  %v2912_v63 = vmax.f32 %v2804_v42, %v2876_v62  ;;  %4344 = vmatprep.mubr.bf16.mxu0 %v3151_v47  ;;  %v3135_v1 = vsel %vm1005_vm1, %v3085_v11, %v3086_v7 }
 0x277   : > { %v6980_v58 = vmul.f32 %v6760_v8, %v2913_v39  ;;  %v3088_v9 = vrot.slane %v6943_v36, 1  ;;  %v3089_v33 = vrot.slane %v6937_v6, 1  ;;  %v3134_v30 = vsel %vm1005_vm1, %v3086_v7, %v3087_v45 }
 0x278   : > { %8269 = vst [vmem:[#allocation11_spill] sm:$0xff] %v6976_v60  ;;  %v6987_v4 = vmul.f32 %v6770_v16, %v2911_v35  ;;  %v6990_v56 = vmul.f32 %v6773_v27, %v2912_v63  ;;  %v3090_v8 = vrot.slane %v6976_v60, 1  ;;  %v3152_v25 = vpack.c.bf16 %v3134_v30, %v3135_v1 }
 0x279   : > { %8270 = vst [vmem:[#allocation30_spill] sm:$0xff] %v6980_v58  ;;  %v3132_v42 = vsel %vm1005_vm1, %v3088_v9, %v3089_v33  ;;  %v3133_v44 = vsel %vm1005_vm1, %v3087_v45, %v3088_v9  ;;  %v7002_v16 = vsel %vm665_vm5, 1.0, %v8066_v55  ;;  %v7984_v54 = vrot.slane %v6980_v58, 1 }
 0x27a   : > { %8271 = vst [vmem:[#allocation32_spill] sm:$0xff] %v6987_v4  ;;  %8272 = vst [vmem:[#allocation29_spill] sm:$0xff] %v6990_v56  ;;  %v3153_v11 = vpack.c.bf16 %v3132_v42, %v3133_v44  ;;  %v3091_v27 = vrot.slane %v6987_v4, 1  ;;  %v3092_v48 = vrot.slane %v6990_v56, 1  ;;  %v3131_v10 = vsel %vm1005_vm1, %v3089_v33, %v3090_v8  ;;  %v4306_v33 = vpop.f32.mrf.mxu0 }
 0x27b   : > { %v8273_v31 = vrot.slane %v6825_v38, 7  ;;  %v8274_v26 = vrot.slane %v6832_v51, 7  ;;  %v2969_v7 = vrot.slane %v6815_v59, 7  ;;  %v2970_v47 = vrot.slane %v6844_v24, 7 }
 0x27c   : > { %v3130_v39 = vsel %vm1005_vm1, %v3090_v8, %v3091_v27  ;;  %v3128_v62 = vsel %vm1005_vm1, %v3092_v48, %v7984_v54  ;;  %v3129_v57 = vsel %vm1005_vm1, %v3091_v27, %v3092_v48  ;;  %v2971_v8 = vrot.slane %v6863_v0, 7  ;;  %v2652_v48 = vpop.f32.mrf.mxu0 }
 0x27d   : > { %v7015_v17 = vsel %vm932_vm0, %v8274_v26, %v8273_v31  ;;  %4345 = vmatmul.mubr.bf16.gmra.mxu0 %v3152_v25  ;;  %v3154_v35 = vpack.c.bf16 %v3130_v39, %v3131_v10  ;;  %v3155_v63 = vpack.c.bf16 %v3128_v62, %v3129_v57  ;;  %v8275_v45 = vmov %v8273_v31 }
 0x27e   : > { %v7033_v1 = vsel %vm932_vm0, %v8275_v45, %v2969_v7  ;;  %4348 = vmatprep.mubr.bf16.mxu0 %v3153_v11  ;;  %v7039_v30 = vsel %vm932_vm0, %v2969_v7, %v2970_v47  ;;  %v2972_v25 = vrot.slane %v6866_v15, 7  ;;  %v2661_v42 = vadd.f32 %v4306_v33, %v6670_v5  ;;  %v4307_v45 = vpop.f32.mrf.mxu0 }
 0x27f   : > { %v2973_v27 = vrot.slane %v6859_v29, 7  ;;  %v2974_v11 = vrot.slane %v6889_v20, 7  ;;  %v7056_v31 = vsel %vm932_vm0, %v2970_v47, %v2971_v8  ;;  %v2975_v7 = vrot.slane %v6902_v21, 7 }
 0x280   : > { %v7052_v10 = vsel %vm932_vm0, %v2971_v8, %v2972_v25  ;;  %vm2737_vm8 = vcmp.gt.f32.partialorder %v2661_v42, 0.0  ;;  %v2773_v39 = vmul.f32 0.01, %v2661_v42  ;;  %v2653_v62 = vadd.f32 %v6670_v5, %v2652_v48  ;;  %v2655_v44 = vpop.f32.mrf.mxu0 }
 0x281   : > { %v7066_v33 = vsel %vm932_vm0, %v2973_v27, %v2974_v11  ;;  %v7070_v47 = vsel %vm932_vm0, %v2972_v25, %v2973_v27  ;;  %v2976_v8 = vrot.slane %v6905_v53, 7  ;;  %v7075_v26 = vsel %vm932_vm0, %v2974_v11, %v2975_v7 }
 0x282   : > { %v2809_v38 = vsel %vm2737_vm8, %v2661_v42, %v2773_v39  ;;  %vm2735_vm9 = vcmp.gt.f32.partialorder %v2653_v62, 0.0  ;;  %v2771_v48 = vmul.f32 0.01, %v2653_v62  ;;  %v2664_v57 = vadd.f32 %v4307_v45, %v6670_v5 }
 0x283   : > { %v2845_v9 = vrot.slane %v2809_v38, 1  ;;  %v7082_v25 = vsel %vm932_vm0, %v2975_v7, %v2976_v8  ;;  %v2656_v39 = vadd.f32 %v6670_v5, %v2655_v44  ;;  %v2977_v52 = vrot.slane %v6892_v41, 7 }
 0x284   : > { %v2807_v11 = vsel %vm2735_vm9, %v2653_v62, %v2771_v48  ;;  %vm2738_vm10 = vcmp.gt.f32.partialorder %v2664_v57, 0.0  ;;  %v2774_v42 = vmul.f32 0.01, %v2664_v57  ;;  %v2978_v23 = vrot.slane %v6921_v50, 7 }
 0x285   : > { %4349 = vmatmul.mubr.bf16.gmra.mxu0 %v3154_v35  ;;  %v2843_v45 = vrot.slane %v2807_v11, 1  ;;  %vm2736_vm11 = vcmp.gt.f32.partialorder %v2656_v39, 0.0  ;;  %v2772_v43 = vmul.f32 0.01, %v2656_v39  ;;  %v8276_v62 = vrot.slane %v6950_v46, 1 }
 0x286   : > { %4352 = vmatprep.mubr.bf16.mxu0 %v3155_v63  ;;  %v7091_v7 = vsel %vm2738_vm10, %v2664_v57, %v2774_v42  ;;  %v7102_v48 = vsel %vm932_vm0, %v2977_v52, %v2978_v23  ;;  %v7106_v57 = vsel %vm932_vm0, %v2976_v8, %v2977_v52  ;;  %v2979_v54 = vrot.slane %v6940_v49, 7 }
 0x287   : > { %v2874_v63 = vsel %vm1005_vm1, %v8276_v62, %v2843_v45  ;;  %v7987_v44 = vrot.slane %v7091_v7, 1  ;;  %v2808_v27 = vsel %vm2736_vm11, %v2656_v39, %v2772_v43  ;;  %v2980_v61 = vrot.slane %v6943_v36, 7 }
 0x288   : > { %v2914_v42 = vmax.f32 %v6950_v46, %v2874_v63  ;;  %v2844_v28 = vrot.slane %v2808_v27, 1  ;;  %v7124_v46 = vsel %vm932_vm0, %v2978_v23, %v2979_v54  ;;  %v2981_v39 = vrot.slane %v6937_v6, 7 }
 0x289   : > { %v2871_v62 = vsel %vm1005_vm1, %v2845_v9, %v7987_v44  ;;  %8278 = vst [vmem:[#allocation36_spill] sm:$0xff] %v7124_v46  ;;  %v7133_v44 = vsel %vm932_vm0, %v2979_v54, %v2980_v61  ;;  %vm674_vm7 = vcmp.lt.f32.partialorder %v6193_v40, 62.0  ;;  %vm673_vm10 = vcmp.lt.f32.partialorder %v6267_v13, 62.0 }
 0x28a   : > { %v7120_v8 = vmul.f32 %v6787_v37, %v2914_v42  ;;  %v2917_v43 = vmax.f32 %v2809_v38, %v2871_v62  ;;  %v2872_v63 = vsel %vm1005_vm1, %v2844_v28, %v2845_v9  ;;  %v2873_v35 = vsel %vm1005_vm1, %v2843_v45, %v2844_v28  ;;  %8279 = vst [vmem:[#allocation38_spill] sm:$0xff] %v7133_v44 }
 0x28b   : > { %v2982_v37 = vrot.slane %v6976_v60, 7  ;;  %v2915_v42 = vmax.f32 %v2807_v11, %v2873_v35  ;;  %v2916_v23 = vmax.f32 %v2808_v27, %v2872_v63  ;;  %v7148_v28 = vsel %vm932_vm0, %v2980_v61, %v2981_v39 }
 0x28c   : > { %8277 = vst [vmem:[#allocation2_spill] sm:$0xff] %v7120_v8  ;;  %v7137_v38 = vmul.f32 %v6792_v3, %v2917_v43  ;;  %v3094_v62 = vrot.slane %v7120_v8, 1  ;;  %8282 = vst [vmem:[#allocation48_spill] sm:$0xff] %v7148_v28  ;;  %v8285_v11 = vrot.slane %v6980_v58, 1  ;;  %v2983_v43 = vrot.slane %v6987_v4, 7 }
 0x28d   : > { %v7144_v9 = vsel %vm932_vm0, %v2981_v39, %v2982_v37  ;;  %v7153_v3 = vmul.f32 %v6801_v22, %v2915_v42  ;;  %v7156_v27 = vmul.f32 %v7002_v16, %v2916_v23  ;;  %v2984_v39 = vrot.slane %v6990_v56, 7 }
 0x28e   : > { %8280 = vst [vmem:[#allocation37_spill] sm:$0xff] %v7137_v38  ;;  %8281 = vst [vmem:[#allocation47_spill] sm:$0xff] %v7144_v9  ;;  %v3127_v45 = vsel %vm1005_vm1, %v8285_v11, %v3094_v62  ;;  %v7993_v35 = vrot.slane %v7137_v38, 1  ;;  %v2985_v42 = vrot.slane %v6980_v58, 7  ;;  %v2986_v23 = vrot.slane %v7120_v8, 7 }
 0x28f   : > { %8283 = vst [vmem:[#allocation49_spill] sm:$0xff] %v7153_v3  ;;  %8284 = vst [vmem:[#allocation50_spill] sm:$0xff] %v7156_v27  ;;  %v3095_v16 = vrot.slane %v7153_v3, 1  ;;  %v3096_v63 = vrot.slane %v7156_v27, 1  ;;  %v7175_v11 = vsel %vm932_vm0, %v2983_v43, %v2984_v39  ;;  %v7179_v54 = vsel %vm932_vm0, %v2982_v37, %v2983_v43 }
 0x290   : > { %8286 = vst [vmem:[#allocation51_spill] sm:$0xff] %v7175_v11  ;;  %8287 = vst [vmem:[#allocation52_spill] sm:$0xff] %v7179_v54  ;;  %v2987_v22 = vrot.slane %v7153_v3, 7  ;;  %v4310_v43 = vpop.f32.mrf.mxu0  ;;  %v7196_v61 = vsel %vm932_vm0, %v2985_v42, %v2986_v23  ;;  %v8294_v54 = vld [vmem:[#allocation15_spill] sm:$0xff] }
 0x291   : > { %v3126_v52 = vsel %vm1005_vm1, %v3094_v62, %v3095_v16  ;;  %v3124_v18 = vsel %vm1005_vm1, %v3096_v63, %v7993_v35  ;;  %v3125_v58 = vsel %vm1005_vm1, %v3095_v16, %v3096_v63  ;;  %8288 = vst [vmem:[#allocation53_spill] sm:$0xff] %v7196_v61  ;;  %v7200_v62 = vsel %vm932_vm0, %v2984_v39, %v2985_v42 }
 0x292   : > { %v3156_v8 = vpack.c.bf16 %v3126_v52, %v3127_v45  ;;  %v3157_v4 = vpack.c.bf16 %v3124_v18, %v3125_v58  ;;  %8289 = vst [vmem:[#allocation54_spill] sm:$0xff] %v7200_v62  ;;  %v2677_v3 = vadd.f32 %v4310_v43, %v6670_v5  ;;  %v2988_v16 = vrot.slane %v7156_v27, 7  ;;  %v2668_v18 = vpop.f32.mrf.mxu0 }
 0x293   : > { %v7208_v63 = vsel %vm932_vm0, %v2986_v23, %v2987_v22  ;;  %v2989_v58 = vrot.slane %v7137_v38, 7  ;;  %v2669_v45 = vadd.f32 %v6670_v5, %v2668_v18  ;;  %vm670_vm2 = vcmp.lt.f32.partialorder %v8294_v54, 62.0 }
 0x294   : > { %8290 = vst [vmem:[#allocation55_spill] sm:$0xff] %v7208_v63  ;;  %4353 = vmatmul.mubr.bf16.gmra.mxu0 %v3156_v8  ;;  %vm2741_vm12 = vcmp.gt.f32.partialorder %v2677_v3, 0.0  ;;  %v2777_v52 = vmul.f32 0.01, %v2677_v3  ;;  %v7214_v39 = vsel %vm932_vm0, %v2987_v22, %v2988_v16  ;;  %v4311_v42 = vpop.f32.mrf.mxu0 }
 0x295   : > { %4356 = vmatprep.mubr.bf16.mxu0 %v3157_v4  ;;  %8291 = vst [vmem:[#allocation56_spill] sm:$0xff] %v7214_v39  ;;  %v7220_v23 = vsel %vm932_vm0, %v2988_v16, %v2989_v58  ;;  %vm2739_vm13 = vcmp.gt.f32.partialorder %v2669_v45, 0.0  ;;  %v2775_v8 = vmul.f32 0.01, %v2669_v45  ;;  %v2680_v35 = vadd.f32 %v4311_v42, %v6670_v5  ;;  %v8293_v4 = vld [vmem:[#allocation13_spill] sm:$0xff] }
 0x296   : > { %8292 = vst [vmem:[#allocation57_spill] sm:$0xff] %v7220_v23  ;;  %v2813_v37 = vsel %vm2741_vm12, %v2677_v3, %v2777_v52  ;;  %vm667_vm14 = vcmp.lt.f32.partialorder %v8293_v4, 62.0  ;;  %v2671_v18 = vpop.f32.mrf.mxu0  ;;  %v8295_v3 = vrot.slane %v7091_v7, 1  ;;  %vm675_vm12 = vcmp.lt.f32.partialorder %v6338_v34, 62.0  ;;  %v8307_v34 = vld [vmem:[#allocation20_spill] sm:$0xff] }
 0x297   : > { %v2811_v27 = vsel %vm2739_vm13, %v2669_v45, %v2775_v8  ;;  %vm2742_vm15 = vcmp.gt.f32.partialorder %v2680_v35, 0.0  ;;  %v2778_v22 = vmul.f32 0.01, %v2680_v35  ;;  %v2672_v62 = vadd.f32 %v6670_v5, %v2671_v18  ;;  %v8296_v8 = vld [vmem:[#allocation14_spill] sm:$0xff] }
 0x298   : > { %v2847_v61 = vrot.slane %v2811_v27, 1  ;;  %v2849_v63 = vrot.slane %v2813_v37, 1  ;;  %v4129_v39 = vsel %vm667_vm14, 1.0, %v8066_v55  ;;  %vm668_vm4 = vcmp.lt.f32.partialorder %v8296_v8, 62.0  ;;  %v8297_v18 = vld [vmem:[#allocation18_spill] sm:$0xff] }
 0x299   : > { %v7226_v43 = vsel %vm2742_vm15, %v2680_v35, %v2778_v22  ;;  %vm2740_vm3 = vcmp.gt.f32.partialorder %v2672_v62, 0.0  ;;  %v2776_v16 = vmul.f32 0.01, %v2672_v62  ;;  %vm669_vm5 = vcmp.lt.f32.partialorder %v8297_v18, 62.0 }
 0x29a   : > { %v2870_v52 = vsel %vm1005_vm1, %v8295_v3, %v2847_v61  ;;  %v8002_v45 = vrot.slane %v7226_v43, 1  ;;  %v4132_v22 = vsel %vm670_vm2, 1.0, %v8066_v55  ;;  %v4130_v56 = vsel %vm668_vm4, 1.0, %v8066_v55 }
 0x29b   : > { %v2918_v42 = vmax.f32 %v7091_v7, %v2870_v52  ;;  %v2812_v35 = vsel %vm2740_vm3, %v2672_v62, %v2776_v16  ;;  %v4131_v7 = vsel %vm669_vm5, 1.0, %v8066_v55  ;;  %vm678_vm13 = vcmp.lt.f32.partialorder %v6377_v19, 62.0 }
 0x29c   : > { %v2867_v54 = vsel %vm1005_vm1, %v2849_v63, %v8002_v45  ;;  %v2848_v4 = vrot.slane %v2812_v35, 1  ;;  %vm679_vm15 = vcmp.lt.f32.partialorder %v6243_v12, 62.0  ;;  %vm676_vm3 = vcmp.lt.f32.partialorder %v8307_v34, 62.0  ;;  %v4419_v34 = vld [vmem:[%s7853_s4] ss:$0 sm:$0xff] }
 0x29d   : > { %v7242_v11 = vmul.f32 %v4129_v39, %v2918_v42  ;;  %v2921_v3 = vmax.f32 %v2813_v37, %v2867_v54  ;;  %vm677_vm4 = vcmp.lt.f32.partialorder %v6353_v14, 62.0  ;;  %v4141_v19 = vsel %vm679_vm15, 1.0, %v8066_v55 }
 0x29e   : > { %v2868_v52 = vsel %vm1005_vm1, %v2848_v4, %v2849_v63  ;;  %v2869_v62 = vsel %vm1005_vm1, %v2847_v61, %v2848_v4  ;;  %v4139_v28 = vsel %vm677_vm4, 1.0, %v8066_v55 }
 0x29f   : > { %8298 = vst [vmem:[#allocation58_spill] sm:$0xff] %v7242_v11  ;;  %v7250_v16 = vmul.f32 %v4132_v22, %v2921_v3  ;;  %v2919_v18 = vmax.f32 %v2811_v27, %v2869_v62  ;;  %v2920_v8 = vmax.f32 %v2812_v35, %v2868_v52  ;;  %v3098_v45 = vrot.slane %v7242_v11, 1 }
 0x2a0   : > { %v2990_v54 = vrot.slane %v7242_v11, 7 }
 0x2a1   : > { %v7256_v37 = vmul.f32 %v4130_v56, %v2919_v18  ;;  %v7258_v42 = vmul.f32 %v4131_v7, %v2920_v8  ;;  %v8004_v63 = vrot.slane %v7250_v16, 1  ;;  %v8302_v56 = vrot.slane %v7137_v38, 1 }
 0x2a2   : > { %v7263_v61 = vsel %vm932_vm0, %v2989_v58, %v2990_v54  ;;  %v8003_v62 = vrot.slane %v7250_v16, 7  ;;  %v7344_v38 = vsel %vm676_vm3, 1.0, %v8066_v55 }
 0x2a3   : > { %8299 = vst [vmem:[#allocation59_spill] sm:$0xff] %v7256_v37  ;;  %8300 = vst [vmem:[#allocation60_spill] sm:$0xff] %v7258_v42  ;;  %v3099_v27 = vrot.slane %v7256_v37, 1  ;;  %v3100_v4 = vrot.slane %v7258_v42, 1  ;;  %v3123_v8 = vsel %vm1005_vm1, %v8302_v56, %v3098_v45  ;;  %v2991_v18 = vrot.slane %v7256_v37, 7 }
 0x2a4   : > { %8301 = vst [vmem:[#allocation61_spill] sm:$0xff] %v7263_v61  ;;  %v2992_v58 = vrot.slane %v7258_v42, 7  ;;  %v7331_v37 = vsel %vm678_vm13, 1.0, %v8066_v55  ;;  %vm3970_vm13 = vcmask 523264  }
 0x2a5   : > { %v3122_v3 = vsel %vm1005_vm1, %v3098_v45, %v3099_v27  ;;  %v3120_v7 = vsel %vm1005_vm1, %v3100_v4, %v8004_v63  ;;  %v3121_v52 = vsel %vm1005_vm1, %v3099_v27, %v3100_v4  ;;  %v7292_v39 = vsel %vm932_vm0, %v2990_v54, %v2991_v18 }
 0x2a6   : > { %v3158_v22 = vpack.c.bf16 %v3122_v3, %v3123_v8  ;;  %v3159_v35 = vpack.c.bf16 %v3120_v7, %v3121_v52  ;;  %v7288_v56 = vsel %vm932_vm0, %v2991_v18, %v2992_v58  ;;  %8304 = vst [vmem:[#allocation63_spill] sm:$0xff] %v7292_v39  ;;  %v7300_v27 = vsel %vm932_vm0, %v2992_v58, %v8003_v62  ;;  %v8305_v3 = vld [vmem:[#allocation31_spill] sm:$0xff]  ;;  %v8306_v52 = vld [vmem:[#allocation28_spill] sm:$0xff] }
 0x2a7   : > { %8303 = vst [vmem:[#allocation62_spill] sm:$0xff] %v7288_v56  ;;  %vm671_vm6 = vcmp.lt.f32.partialorder %v8305_v3, 62.0  ;;  %vm672_vm9 = vcmp.lt.f32.partialorder %v8306_v52, 62.0  ;;  %v4136_v62 = vsel %vm674_vm7, 1.0, %v8066_v55  ;;  %v4135_v39 = vsel %vm673_vm10, 1.0, %v8066_v55 }
 0x2a8   : > { %4357 = vmatmul.mubr.bf16.gmra.mxu0 %v3158_v22  ;;  %v4133_v45 = vsel %vm671_vm6, 1.0, %v8066_v55  ;;  %v4134_v63 = vsel %vm672_vm9, 1.0, %v8066_v55 }
 0x2a9   : > { %4360 = vmatprep.mubr.bf16.mxu0 %v3159_v35 }
 0x2b0   : > { %v4314_v4 = vpop.f32.mrf.mxu0 }
 0x2b1   : > { %v2693_v8 = vadd.f32 %v4314_v4, %v6670_v5 }
 0x2b2   : > { %v2684_v7 = vpop.f32.mrf.mxu0 }
 0x2b3   : > { %vm2745_vm8 = vcmp.gt.f32.partialorder %v2693_v8, 0.0  ;;  %v2781_v54 = vmul.f32 0.01, %v2693_v8  ;;  %v2685_v18 = vadd.f32 %v6670_v5, %v2684_v7 }
 0x2b4   : > { %v4315_v58 = vpop.f32.mrf.mxu0 }
 0x2b5   : > { %vm2743_vm11 = vcmp.gt.f32.partialorder %v2685_v18, 0.0  ;;  %v2779_v35 = vmul.f32 0.01, %v2685_v18  ;;  %v2696_v22 = vadd.f32 %v4315_v58, %v6670_v5  ;;  %v2817_v4 = vsel %vm2745_vm8, %v2693_v8, %v2781_v54 }
 0x2b6   : > { %v2687_v40 = vpop.f32.mrf.mxu0  ;;  %v7317_v58 = vsel %vm675_vm12, 1.0, %v8066_v55  ;;  %v2853_v56 = vrot.slane %v2817_v4, 1 }
 0x2b7   : > { %v2815_v7 = vsel %vm2743_vm11, %v2685_v18, %v2779_v35  ;;  %vm2746_vm14 = vcmp.gt.f32.partialorder %v2696_v22, 0.0  ;;  %v2782_v52 = vmul.f32 0.01, %v2696_v22  ;;  %v2688_v3 = vadd.f32 %v6670_v5, %v2687_v40 }
 0x2b8   : > { %v2851_v13 = vrot.slane %v2815_v7, 1  ;;  %v8308_v18 = vrot.slane %v7226_v43, 1 }
 0x2b9   : > { %v7320_v8 = vsel %vm2746_vm14, %v2696_v22, %v2782_v52  ;;  %vm2744_vm2 = vcmp.gt.f32.partialorder %v2688_v3, 0.0  ;;  %v2780_v54 = vmul.f32 0.01, %v2688_v3 }
 0x2ba   : > { %v2866_v40 = vsel %vm1005_vm1, %v8308_v18, %v2851_v13  ;;  %v2854_v5 = vrot.slane %v7320_v8, 1 }
 0x2bb   : > { %v2922_v52 = vmax.f32 %v7226_v43, %v2866_v40  ;;  %v2816_v22 = vsel %vm2744_vm2, %v2688_v3, %v2780_v54 }
 0x2bc   : > { %v4318_v35 = vpop.f32.mrf.mxu0  ;;  %v2863_v18 = vsel %vm1005_vm1, %v2853_v56, %v2854_v5  ;;  %v2852_v23 = vrot.slane %v2816_v22, 1 }
 0x2bd   : > { %v2709_v42 = vadd.f32 %v4419_v34, %v4318_v35  ;;  %v7346_v43 = vmul.f32 %v4133_v45, %v2922_v52  ;;  %v2925_v3 = vmax.f32 %v2817_v4, %v2863_v18 }
 0x2be   : > { %v2700_v61 = vpop.f32.mrf.mxu0  ;;  %v2864_v40 = vsel %vm1005_vm1, %v2852_v23, %v2853_v56  ;;  %v2865_v35 = vsel %vm1005_vm1, %v2851_v13, %v2852_v23 }
 0x2bf   : > { %vm2749_vm5 = vcmp.gt.f32.partialorder %v2709_v42, 0.0  ;;  %v2785_v54 = vmul.f32 0.01, %v2709_v42  ;;  %v2701_v14 = vadd.f32 %v4419_v34, %v2700_v61  ;;  %v7353_v12 = vmul.f32 %v4136_v62, %v2925_v3 }
 0x2c0   : > { %v4319_v11 = vpop.f32.mrf.mxu0  ;;  %v2923_v9 = vmax.f32 %v2815_v7, %v2865_v35  ;;  %v2924_v6 = vmax.f32 %v2816_v22, %v2864_v40  ;;  %v3102_v13 = vrot.slane %v7346_v43, 1 }
 0x2c1   : > { %v2821_v60 = vsel %vm2749_vm5, %v2709_v42, %v2785_v54  ;;  %vm2747_vm6 = vcmp.gt.f32.partialorder %v2701_v14, 0.0  ;;  %v2783_v4 = vmul.f32 0.01, %v2701_v14  ;;  %v2712_v52 = vadd.f32 %v4419_v34, %v4319_v11 }
 0x2c2   : > { %v2857_v45 = vrot.slane %v2821_v60, 1  ;;  %v2703_v18 = vpop.f32.mrf.mxu0  ;;  %v7355_v46 = vmul.f32 %v4134_v63, %v2923_v9  ;;  %v7357_v56 = vmul.f32 %v4135_v39, %v2924_v6  ;;  %v3105_v62 = vrot.slane %v7353_v12, 1 }
 0x2c3   : > { %v2704_v44 = vadd.f32 %v4419_v34, %v2703_v18  ;;  %v2819_v23 = vsel %vm2747_vm6, %v2701_v14, %v2783_v4  ;;  %vm2750_vm7 = vcmp.gt.f32.partialorder %v2712_v52, 0.0  ;;  %v2786_v61 = vmul.f32 0.01, %v2712_v52 }
 0x2c4   : > { %v2855_v7 = vrot.slane %v2819_v23, 1  ;;  %v3103_v22 = vrot.slane %v7355_v46, 1  ;;  %v8309_v11 = vrot.slane %v7250_v16, 1  ;;  %v3104_v34 = vrot.slane %v7357_v56, 1 }
 0x2c5   : > { %vm2748_vm8 = vcmp.gt.f32.partialorder %v2704_v44, 0.0  ;;  %v2784_v42 = vmul.f32 0.01, %v2704_v44  ;;  %v2822_v3 = vsel %vm2750_vm7, %v2712_v52, %v2786_v61  ;;  %v3070_v14 = vpack.c.bf16 %v7346_v43, %v7250_v16 }
 0x2c6   : > { %v3119_v6 = vsel %vm1005_vm1, %v8309_v11, %v3102_v13  ;;  %v2862_v9 = vsel %vm1005_vm1, %v2854_v5, %v2855_v7  ;;  %v2858_v39 = vrot.slane %v2822_v3, 1  ;;  %v3118_v54 = vsel %vm1005_vm1, %v3102_v13, %v3103_v22 }
 0x2c7   : > { %v2820_v63 = vsel %vm2748_vm8, %v2704_v44, %v2784_v42  ;;  %v2926_v40 = vmax.f32 %v7320_v8, %v2862_v9  ;;  %v3160_v4 = vpack.c.bf16 %v3118_v54, %v3119_v6  ;;  %v3116_v52 = vsel %vm1005_vm1, %v3104_v34, %v3105_v62 }
 0x2c8   : > { %v2856_v35 = vrot.slane %v2820_v63, 1  ;;  %v2859_v18 = vsel %vm1005_vm1, %v2857_v45, %v2858_v39  ;;  %v8310_v61 = vrot.slane %v6765_v32, 1  ;;  %v3117_v44 = vsel %vm1005_vm1, %v3103_v22, %v3104_v34 }
 0x2c9   : > { %v2994_v13 = vrot.slane %v7346_v43, 7  ;;  %v7386_v8 = vmul.f32 %v7317_v58, %v2926_v40  ;;  %v2929_v42 = vmax.f32 %v2821_v60, %v2859_v18  ;;  %4361 = vmatmul.mubr.bf16.gmra.mxu0 %v3160_v4  ;;  %v3161_v54 = vpack.c.bf16 %v3116_v52, %v3117_v44 }
 0x2ca   : > { %v2894_v5 = vsel %vm1005_vm1, %v2858_v39, %v8310_v61  ;;  %v2860_v6 = vsel %vm1005_vm1, %v2856_v35, %v2857_v45  ;;  %v2861_v32 = vsel %vm1005_vm1, %v2855_v7, %v2856_v35  ;;  %v8311_v39 = vrot.slane %v7250_v16, 7  ;;  %v7553_v16 = vld [vmem:[%s7855_s6] ss:$0 sm:$0xff] }
 0x2cb   : > { %v2930_v11 = vmax.f32 %v2822_v3, %v2894_v5  ;;  %v2928_v9 = vmax.f32 %v2820_v63, %v2860_v6  ;;  %v7399_v58 = vmul.f32 %v7331_v37, %v2929_v42  ;;  %v2927_v3 = vmax.f32 %v2819_v23, %v2861_v32  ;;  %4364 = vmatprep.mubr.bf16.mxu0 %v3161_v54 }
 0x2cc   : > { %v7396_v22 = vsel %vm932_vm0, %v8311_v39, %v2994_v13  ;;  %v3106_v45 = vrot.slane %v7386_v8, 1  ;;  %v3071_v63 = vpack.c.bf16 %v7357_v56, %v7355_v46  ;;  %v2995_v40 = vrot.slane %v7355_v46, 7 }
 0x2cd   : > { %v7401_v60 = vmul.f32 %v4141_v19, %v2930_v11  ;;  %v7404_v34 = vmul.f32 %v4139_v28, %v2928_v9  ;;  %v3052_v7 = vpack.c.bf16 %v7396_v22, %v7300_v27  ;;  %v7412_v35 = vmul.f32 %v7344_v38, %v2927_v3 }
 0x2ce   : > { %v3109_v23 = vrot.slane %v7399_v58, 1  ;;  %v2996_v28 = vrot.slane %v7357_v56, 7  ;;  %v7420_v4 = vsel %vm932_vm0, %v2994_v13, %v2995_v40  ;;  %v8312_v52 = vrot.slane %v6832_v51, 7 }
 0x2cf   : > { %v3002_v19 = vrot.slane %v7401_v60, 7  ;;  %v3108_v37 = vrot.slane %v7404_v34, 1  ;;  %v3107_v38 = vrot.slane %v7412_v35, 1  ;;  %v3072_v61 = vpack.c.bf16 %v7386_v8, %v7353_v12 }
 0x2d0   : > { %v3115_v44 = vsel %vm1005_vm1, %v3105_v62, %v3106_v45  ;;  %v3110_v13 = vrot.slane %v7401_v60, 1  ;;  %v3009_v32 = vsel %vm932_vm0, %v2995_v40, %v2996_v28  ;;  %v2997_v9 = vrot.slane %v7353_v12, 7 }
 0x2d1   : > { %v3038_v18 = vsel %vm932_vm0, %v3002_v19, %v8312_v52  ;;  %v3112_v42 = vsel %vm1005_vm1, %v3108_v37, %v3109_v23  ;;  %v3114_v11 = vsel %vm1005_vm1, %v3106_v45, %v3107_v38  ;;  %v3113_v6 = vsel %vm1005_vm1, %v3107_v38, %v3108_v37 }
 0x2d2   : > { %v3039_v5 = vpack.c.bf16 %v7015_v17, %v3038_v18  ;;  %v3162_v17 = vpack.c.bf16 %v3114_v11, %v3115_v44  ;;  %v3163_v54 = vpack.c.bf16 %v3112_v42, %v3113_v6  ;;  %v3053_v62 = vpack.c.bf16 %v3009_v32, %v7420_v4  ;;  %v8341_v6 = vld [vmem:[#allocation30_spill] sm:$0xff] }
 0x2d3   : > { %v2998_v39 = vrot.slane %v7386_v8, 7  ;;  %v8313_v3 = vpack.c.bf16 %v6844_v24, %v6815_v59  ;;  %v3008_v45 = vsel %vm932_vm0, %v2996_v28, %v2997_v9  ;;  %v3073_v37 = vpack.c.bf16 %v7404_v34, %v7412_v35 }
 0x2d4   : > { %3397 = vmatmul.mubr.bf16.vlgmr.msra.gmra.mxu1 %v3039_v5  ;;  %v2999_v40 = vrot.slane %v7412_v35, 7  ;;  %v3000_v12 = vrot.slane %v7404_v34, 7  ;;  %4365 = vmatmul.mubr.bf16.gmra.mxu0 %v3162_v17  ;;  %v3074_v8 = vpack.c.bf16 %v7401_v60, %v7399_v58  ;;  %v3001_v59 = vrot.slane %v7399_v58, 7  ;;  %v8344_v17 = vld [vmem:[#allocation54_spill] sm:$0xff] }
 0x2d5   : > { %3404 = vmatprep.mubr.bf16.mxu1 %v8313_v3  ;;  %v3007_v4 = vsel %vm932_vm0, %v2997_v9, %v2998_v39  ;;  %4368 = vmatprep.mubr.bf16.mxu0 %v3163_v54  ;;  %v3111_v60 = vsel %vm1005_vm1, %v3109_v23, %v3110_v13  ;;  %v8314_v58 = vrot.slane %v6832_v51, 1  ;;  %v8315_v44 = vpack.c.bf16 %v7039_v30, %v7033_v1  ;;  %v8325_v30 = vld [vmem:[#allocation38_spill] sm:$0xff]  ;;  %v8343_v9 = vld [vmem:[#allocation53_spill] sm:$0xff] }
 0x2d6   : > { %v3054_v24 = vpack.c.bf16 %v3007_v4, %v3008_v45  ;;  %v3005_v28 = vsel %vm932_vm0, %v2999_v40, %v3000_v12  ;;  %v3006_v52 = vsel %vm932_vm0, %v2998_v39, %v2999_v40  ;;  %v3003_v34 = vsel %vm932_vm0, %v3001_v59, %v3002_v19  ;;  %v8346_v39 = vld [vmem:[#allocation50_spill] sm:$0xff]  ;;  %v8347_v3 = vld [vmem:[#allocation49_spill] sm:$0xff]  ;;  %v8349_v40 = vld [vmem:[#allocation56_spill] sm:$0xff] }
 0x2d7   : > { %v3055_v35 = vpack.c.bf16 %v3005_v28, %v3006_v52  ;;  %v3004_v18 = vsel %vm932_vm0, %v3000_v12, %v3001_v59  ;;  %v3146_v38 = vsel %vm1005_vm1, %v3110_v13, %v8314_v58  ;;  %v8316_v19 = vpack.c.bf16 %v6866_v15, %v6863_v0  ;;  %v8338_v13 = vld [vmem:[#allocation52_spill] sm:$0xff]  ;;  %v8350_v12 = vld [vmem:[#allocation55_spill] sm:$0xff]  ;;  %v8352_v59 = vld [vmem:[#allocation58_spill] sm:$0xff] }
 0x2d8   : > { %v3056_v5 = vpack.c.bf16 %v3003_v34, %v3004_v18  ;;  %v3164_v42 = vpack.c.bf16 %v3146_v38, %v3111_v60  ;;  %v8317_v11 = vpack.c.bf16 %v7052_v10, %v7056_v31  ;;  %v8318_v51 = vpack.c.bf16 %v6889_v20, %v6859_v29  ;;  %v8326_v10 = vld [vmem:[#allocation36_spill] sm:$0xff]  ;;  %v8353_v28 = vld [vmem:[#allocation37_spill] sm:$0xff]  ;;  %v8359_v38 = vld [vmem:[#allocation59_spill] sm:$0xff] }
 0x2d9   : > { %v8319_v23 = vpack.c.bf16 %v7066_v33, %v7070_v47  ;;  %v8320_v1 = vpack.c.bf16 %v6905_v53, %v6902_v21  ;;  %v8321_v0 = vpack.c.bf16 %v7082_v25, %v7075_v26  ;;  %v8322_v15 = vpack.c.bf16 %v6921_v50, %v6892_v41  ;;  %v8328_v53 = vld [vmem:[#allocation11_spill] sm:$0xff]  ;;  %v8329_v31 = vld [vmem:[#allocation4_spill] sm:$0xff]  ;;  %v8334_v50 = vld [vmem:[#allocation29_spill] sm:$0xff] }
 0x2da   : > { %v8323_v29 = vpack.c.bf16 %v7102_v48, %v7106_v57  ;;  %v8324_v20 = vpack.c.bf16 %v6943_v36, %v6940_v49  ;;  %v8327_v21 = vpack.c.bf16 %v8325_v30, %v8326_v10  ;;  %v8330_v26 = vpack.c.bf16 %v8328_v53, %v8329_v31  ;;  %v8331_v33 = vld [vmem:[#allocation47_spill] sm:$0xff]  ;;  %v8332_v47 = vld [vmem:[#allocation48_spill] sm:$0xff]  ;;  %v8340_v36 = vld [vmem:[#allocation2_spill] sm:$0xff] }
 0x2db   : > { %v8333_v41 = vpack.c.bf16 %v8331_v33, %v8332_v47  ;;  %v8335_v25 = vld [vmem:[#allocation32_spill] sm:$0xff]  ;;  %v8337_v57 = vld [vmem:[#allocation51_spill] sm:$0xff]  ;;  %v8342_v32 = vpack.c.bf16 %v8340_v36, %v8341_v6  ;;  %v8345_v54 = vpack.c.bf16 %v8343_v9, %v8344_v17  ;;  %v8348_v45 = vpack.c.bf16 %v8346_v39, %v8347_v3  ;;  %v8355_v34 = vld [vmem:[#allocation61_spill] sm:$0xff] }
 0x2dc   : > { %3405 = vmatmul.mubr.bf16.gmra.mxu1 %v8315_v44  ;;  %4369 = vmatmul.mubr.bf16.gmra.mxu0 %v3164_v42  ;;  %v8336_v48 = vpack.c.bf16 %v8334_v50, %v8335_v25  ;;  %v8339_v49 = vpack.c.bf16 %v8337_v57, %v8338_v13  ;;  %v8351_v4 = vpack.c.bf16 %v8349_v40, %v8350_v12  ;;  %v8356_v18 = vld [vmem:[#allocation57_spill] sm:$0xff]  ;;  %v8358_v58 = vld [vmem:[#allocation60_spill] sm:$0xff]  ;;  %v8361_v42 = vld [vmem:[#allocation62_spill] sm:$0xff] }
 0x2dd   : > { %3412 = vmatprep.mubr.bf16.mxu1 %v8316_v19  ;;  %v8354_v52 = vpack.c.bf16 %v8352_v59, %v8353_v28  ;;  %v8357_v60 = vpack.c.bf16 %v8355_v34, %v8356_v18  ;;  %v8360_v44 = vpack.c.bf16 %v8358_v58, %v8359_v38  ;;  %v8362_v19 = vld [vmem:[#allocation63_spill] sm:$0xff]  ;;  %v8365_v25 = vld [vmem:[#allocation6_spill] sm:$0xff] }
 0x2de   : > { %vm753_vm12 = vcmp.lt.f32.partialorder %v8365_v25, 61.0 }
 0x2df   : > { %v4143_v17 = vsel %vm753_vm12, 1.0, %v8066_v55 }
 0x2e4   : > { %3413 = vmatmul.mubr.bf16.gmra.mxu1 %v8317_v11  ;;  %v8363_v11 = vpack.c.bf16 %v8361_v42, %v8362_v19  ;;  %v8367_v42 = vld [vmem:[#allocation9_spill] sm:$0xff] }
 0x2e5   : > { %3420 = vmatprep.mubr.bf16.mxu1 %v8318_v51  ;;  %vm755_vm3 = vcmp.lt.f32.partialorder %v8367_v42, 61.0 }
 0x2ec   : > { %3421 = vmatmul.mubr.bf16.gmra.mxu1 %v8319_v23 }
 0x2ed   : > { %3428 = vmatprep.mubr.bf16.mxu1 %v8320_v1 }
 0x2f4   : > { %3429 = vmatmul.mubr.bf16.gmra.mxu1 %v8321_v0 }
 0x2f5   : > { %3436 = vmatprep.mubr.bf16.mxu1 %v8322_v15  ;;  %v8364_v15 = vld [vmem:[#allocation5_spill] sm:$0xff] }
 0x2f6   : > { %vm752_vm10 = vcmp.lt.f32.partialorder %v8364_v15, 61.0 }
 0x2f7   : > { %v4142_v33 = vsel %vm752_vm10, 1.0, %v8066_v55 }
 0x2fc   : > { %3437 = vmatmul.mubr.bf16.gmra.mxu1 %v8323_v29 }
 0x2fd   : > { %3444 = vmatprep.mubr.bf16.mxu1 %v8324_v20 }
 0x304   : > { %3445 = vmatmul.mubr.bf16.gmra.mxu1 %v8327_v21 }
 0x305   : > { %3452 = vmatprep.mubr.bf16.mxu1 %v8330_v26 }
 0x30c   : > { %3453 = vmatmul.mubr.bf16.gmra.mxu1 %v8333_v41 }
 0x30d   : > { %3460 = vmatprep.mubr.bf16.mxu1 %v8336_v48 }
 0x314   : > { %3461 = vmatmul.mubr.bf16.gmra.mxu1 %v8339_v49 }
 0x315   : > { %3468 = vmatprep.mubr.bf16.mxu1 %v8342_v32 }
 0x31c   : > { %3469 = vmatmul.mubr.bf16.gmra.mxu1 %v8345_v54 }
 0x31d   : > { %3476 = vmatprep.mubr.bf16.mxu1 %v8348_v45  ;;  %v8366_v45 = vld [vmem:[#allocation7_spill] sm:$0xff] }
 0x31e   : > { %vm754_vm15 = vcmp.lt.f32.partialorder %v8366_v45, 61.0 }
 0x324   : > { %3477 = vmatmul.mubr.bf16.gmra.mxu1 %v8351_v4 }
 0x325   : > { %3484 = vmatprep.mubr.bf16.mxu1 %v8354_v52 }
 0x32b   : > { %v4338_v51 = vpop.f32.mrf.mxu0 }
 0x32c   : > { %3485 = vmatmul.mubr.bf16.gmra.mxu1 %v8357_v60  ;;  %v4144_v60 = vsel %vm754_vm15, 1.0, %v8066_v55 }
 0x32d   : > { %3492 = vmatprep.mubr.bf16.mxu1 %v8360_v44  ;;  %v3575_v23 = vpop.f32.mrf.mxu0 }
 0x334   : > { %3493 = vmatmul.mubr.bf16.gmra.mxu1 %v8363_v11 }
 0x335   : > { %3500 = vmatprep.mubr.bf16.mxu1 %v3070_v14  ;;  %v4339_v14 = vpop.f32.mrf.mxu0 }
 0x33c   : > { %3501 = vmatmul.mubr.bf16.gmra.mxu1 %v3052_v7 }
 0x33d   : > { %3508 = vmatprep.mubr.bf16.mxu1 %v3071_v63 }
 0x344   : > { %3509 = vmatmul.mubr.bf16.gmra.mxu1 %v3053_v62 }
 0x345   : > { %3516 = vmatprep.mubr.bf16.mxu1 %v3072_v61  ;;  %v3578_v61 = vpop.f32.mrf.mxu0 }
 0x347   : > { %v7560_v1 = vpop.f32.mrf.mxu0 }
 0x349   : > { %v3591_v26 = vpop.f32.mrf.mxu0 }
 0x34b   : > { %v4343_v9 = vpop.f32.mrf.mxu0 }
 0x34c   : > { %3517 = vmatmul.mubr.bf16.gmra.mxu1 %v3054_v24 }
 0x34d   : > { %3524 = vmatprep.mubr.bf16.mxu1 %v3073_v37  ;;  %v3594_v18 = vpop.f32.mrf.mxu0 }
 0x354   : > { %3525 = vmatmul.mubr.bf16.gmra.mxu1 %v3055_v35 }
 0x355   : > { %3532 = vmatprep.mubr.bf16.mxu1 %v3074_v8 }
 0x35c   : > { %3533 = vmatmul.mubr.bf16.gmra.mxu1 %v3056_v5 }
 0x394   : > { %v3398_v27 = vpop.f32.mrf.mxu1 }
 0x395   : > { %v3399_v43 = vadd.f32 %v7553_v16, %v3398_v27 }
 0x396   : > { %v3400_v46 = vpop.f32.mrf.mxu1 }
 0x397   : > { %v3576_v56 = vadd.f32 %v3575_v23, %v3399_v43  ;;  %v7594_v46 = vpop.f32.mrf.mxu0 }
 0x398   : > { %v3401_v22 = vpop.f32.mrf.mxu1 }
 0x399   : > { %v3754_v7 = vmul.f32 0.01, %v3576_v56  ;;  %v3402_v63 = vadd.f32 %v7553_v16, %v3401_v22  ;;  %vm3718_vm0 = vcmp.gt.f32.partialorder %v3576_v56, 0.0 }
 0x39a   : > { %v3403_v62 = vpop.f32.mrf.mxu1 }
 0x39b   : > { %v3579_v37 = vadd.f32 %v3578_v61, %v3402_v63  ;;  %v7557_v24 = vsel %vm3718_vm0, %v3576_v56, %v3754_v7  ;;  %v4145_v56 = vsel %vm755_vm3, 1.0, %v8066_v55  ;;  %v8368_v61 = vld [vmem:[#allocation8_spill] sm:$0xff] }
 0x39c   : > { %v3406_v8 = vpop.f32.mrf.mxu1  ;;  %v3826_v30 = vrot.slane %v7557_v24, 1  ;;  %vm756_vm5 = vcmp.lt.f32.partialorder %v8368_v61, 61.0 }
 0x39d   : > { %vm3719_vm9 = vcmp.gt.f32.partialorder %v3579_v37, 0.0  ;;  %v3755_v35 = vmul.f32 0.01, %v3579_v37  ;;  %v3407_v5 = vadd.f32 %v7553_v16, %v3406_v8 }
 0x39e   : > { %v3408_v0 = vpop.f32.mrf.mxu1 }
 0x39f   : > { %v3791_v29 = vsel %vm3719_vm9, %v3579_v37, %v3755_v35  ;;  %v3584_v20 = vadd.f32 %v4338_v51, %v3407_v5 }
 0x3a0   : > { %v3827_v10 = vrot.slane %v3791_v29, 1  ;;  %v3409_v21 = vpop.f32.mrf.mxu1 }
 0x3a1   : > { %vm3720_vm11 = vcmp.gt.f32.partialorder %v3584_v20, 0.0  ;;  %v3756_v53 = vmul.f32 0.01, %v3584_v20  ;;  %v3410_v31 = vadd.f32 %v7553_v16, %v3409_v21 }
 0x3a2   : > { %v3896_v47 = vsel %vm1005_vm1, %v3826_v30, %v3827_v10  ;;  %v3411_v41 = vpop.f32.mrf.mxu1 }
 0x3a3   : > { %v3898_v50 = vmax.f32 %v7557_v24, %v3896_v47  ;;  %v3792_v48 = vsel %vm3720_vm11, %v3584_v20, %v3756_v53  ;;  %v3587_v57 = vadd.f32 %v4339_v14, %v3410_v31  ;;  %v4146_v20 = vsel %vm756_vm5, 1.0, %v8066_v55  ;;  %v8369_v31 = vld [vmem:[#allocation23_spill] sm:$0xff] }
 0x3a4   : > { %v3828_v13 = vrot.slane %v3792_v48, 1  ;;  %v3414_v49 = vpop.f32.mrf.mxu1  ;;  %vm757_vm7 = vcmp.lt.f32.partialorder %v8369_v31, 61.0 }
 0x3a5   : > { %v3934_v36 = vmul.f32 %v4142_v33, %v3898_v50  ;;  %vm3721_vm14 = vcmp.gt.f32.partialorder %v3587_v57, 0.0  ;;  %v3757_v6 = vmul.f32 0.01, %v3587_v57  ;;  %v3415_v32 = vadd.f32 %v7553_v16, %v3414_v49 }
 0x3a6   : > { %v3895_v54 = vsel %vm1005_vm1, %v3827_v10, %v3828_v13  ;;  %v3416_v39 = vpop.f32.mrf.mxu1 }
 0x3a7   : > { %3971 = vst.msk [vmem:[%s7577_s8] sm:$0xff] %vm3970_vm13, %v3934_v36  ;;  %v3899_v3 = vmax.f32 %v3791_v29, %v3895_v54  ;;  %v3793_v40 = vsel %vm3721_vm14, %v3587_v57, %v3757_v6  ;;  %v3592_v12 = vadd.f32 %v3591_v26, %v3415_v32  ;;  %v3607_v29 = vpop.f32.mrf.mxu0  ;;  %v4147_v57 = vsel %vm757_vm7, 1.0, %v8066_v55  ;;  %v8370_v6 = vld [vmem:[#allocation24_spill] sm:$0xff] }
 0x3a8   : > { %v3829_v4 = vrot.slane %v3793_v40, 1  ;;  %v3417_v59 = vpop.f32.mrf.mxu1  ;;  %vm758_vm0 = vcmp.lt.f32.partialorder %v8370_v6, 61.0 }
 0x3a9   : > { %v3935_v28 = vmul.f32 %v4143_v17, %v3899_v3  ;;  %vm3722_vm2 = vcmp.gt.f32.partialorder %v3592_v12, 0.0  ;;  %v3758_v52 = vmul.f32 0.01, %v3592_v12  ;;  %v3418_v34 = vadd.f32 %v7553_v16, %v3417_v59 }
 0x3aa   : > { %v3894_v58 = vsel %vm1005_vm1, %v3828_v13, %v3829_v4  ;;  %v3419_v38 = vpop.f32.mrf.mxu1 }
 0x3ab   : > { %3972 = vst.msk [vmem:[%s7577_s8 + $0x8] sm:$0xff] %vm3970_vm13, %v3935_v28  ;;  %v3900_v44 = vmax.f32 %v3792_v48, %v3894_v58  ;;  %v3794_v19 = vsel %vm3722_vm2, %v3592_v12, %v3758_v52  ;;  %v3595_v11 = vadd.f32 %v3594_v18, %v3418_v34  ;;  %v4347_v48 = vpop.f32.mrf.mxu0  ;;  %v4148_v12 = vsel %vm758_vm0, 1.0, %v8066_v55  ;;  %v8371_v52 = vld [vmem:[#allocation25_spill] sm:$0xff] }
 0x3ac   : > { %v3830_v51 = vrot.slane %v3794_v19, 1  ;;  %v3422_v23 = vpop.f32.mrf.mxu1  ;;  %vm759_vm10 = vcmp.lt.f32.partialorder %v8371_v52, 61.0 }
 0x3ad   : > { %v3936_v27 = vmul.f32 %v4144_v60, %v3900_v44  ;;  %vm3723_vm4 = vcmp.gt.f32.partialorder %v3595_v11, 0.0  ;;  %v3759_v43 = vmul.f32 0.01, %v3595_v11  ;;  %v3423_v14 = vadd.f32 %v7553_v16, %v3422_v23 }
 0x3ae   : > { %v3893_v22 = vsel %vm1005_vm1, %v3829_v4, %v3830_v51  ;;  %v3424_v7 = vpop.f32.mrf.mxu1 }
 0x3af   : > { %3973 = vst.msk [vmem:[%s7577_s8 + $0x10] sm:$0xff] %vm3970_vm13, %v3936_v27  ;;  %v3901_v63 = vmax.f32 %v3793_v40, %v3893_v22  ;;  %v3795_v62 = vsel %vm3723_vm4, %v3595_v11, %v3759_v43  ;;  %v3600_v37 = vadd.f32 %v7560_v1, %v3423_v14  ;;  %v3610_v40 = vpop.f32.mrf.mxu0  ;;  %v4149_v11 = vsel %vm759_vm10, 1.0, %v8066_v55  ;;  %v8372_v43 = vld [vmem:[#allocation22_spill] sm:$0xff] }
 0x3b0   : > { %v3831_v8 = vrot.slane %v3795_v62, 1  ;;  %v3425_v35 = vpop.f32.mrf.mxu1  ;;  %vm760_vm12 = vcmp.lt.f32.partialorder %v8372_v43, 61.0 }
 0x3b1   : > { %v3937_v5 = vmul.f32 %v4145_v56, %v3901_v63  ;;  %vm3724_vm6 = vcmp.gt.f32.partialorder %v3600_v37, 0.0  ;;  %v3760_v0 = vmul.f32 0.01, %v3600_v37  ;;  %v3426_v15 = vadd.f32 %v7553_v16, %v3425_v35 }
 0x3b2   : > { %v3892_v10 = vsel %vm1005_vm1, %v3830_v51, %v3831_v8  ;;  %v3427_v21 = vpop.f32.mrf.mxu1 }
 0x3b3   : > { %3974 = vst.msk [vmem:[%s7577_s8 + $0x18] sm:$0xff] %vm3970_vm13, %v3937_v5  ;;  %v3902_v53 = vmax.f32 %v3794_v19, %v3892_v10  ;;  %v3796_v1 = vsel %vm3724_vm6, %v3600_v37, %v3760_v0  ;;  %v3603_v26 = vadd.f32 %v4343_v9, %v3426_v15  ;;  %v7625_v19 = vpop.f32.mrf.mxu0  ;;  %v8373_v15 = vld [vmem:[#allocation33_spill] sm:$0xff] }
 0x3b4   : > { %v3832_v33 = vrot.slane %v3796_v1, 1  ;;  %v3430_v47 = vpop.f32.mrf.mxu1  ;;  %vm761_vm15 = vcmp.lt.f32.partialorder %v8373_v15, 61.0 }
 0x3b5   : > { %v3938_v41 = vmul.f32 %v4146_v20, %v3902_v53  ;;  %vm3725_vm8 = vcmp.gt.f32.partialorder %v3603_v26, 0.0  ;;  %v3761_v50 = vmul.f32 0.01, %v3603_v26  ;;  %v3431_v25 = vadd.f32 %v7553_v16, %v3430_v47  ;;  %v3623_v37 = vpop.f32.mrf.mxu0 }
 0x3b6   : > { %v3891_v13 = vsel %vm1005_vm1, %v3831_v8, %v3832_v33  ;;  %v3432_v49 = vpop.f32.mrf.mxu1  ;;  %v4150_v8 = vsel %vm760_vm12, 1.0, %v8066_v55 }
 0x3b7   : > { %3975 = vst.msk [vmem:[%s7577_s8 + $0x20] sm:$0xff] %vm3970_vm13, %v3938_v41  ;;  %v3903_v36 = vmax.f32 %v3795_v62, %v3891_v13  ;;  %v3797_v32 = vsel %vm3725_vm8, %v3603_v26, %v3761_v50  ;;  %v3608_v9 = vadd.f32 %v3607_v29, %v3431_v25  ;;  %v4151_v26 = vsel %vm761_vm15, 1.0, %v8066_v55  ;;  %v8374_v50 = vld [vmem:[#allocation35_spill] sm:$0xff] }
 0x3b8   : > { %v3833_v17 = vrot.slane %v3797_v32, 1  ;;  %v3433_v54 = vpop.f32.mrf.mxu1  ;;  %vm762_vm3 = vcmp.lt.f32.partialorder %v8374_v50, 61.0 }
 0x3b9   : > { %v3939_v39 = vmul.f32 %v4147_v57, %v3903_v36  ;;  %vm3726_vm9 = vcmp.gt.f32.partialorder %v3608_v9, 0.0  ;;  %v3762_v3 = vmul.f32 0.01, %v3608_v9  ;;  %v3434_v45 = vadd.f32 %v7553_v16, %v3433_v54 }
 0x3ba   : > { %v3890_v4 = vsel %vm1005_vm1, %v3832_v33, %v3833_v17  ;;  %v3435_v59 = vpop.f32.mrf.mxu1 }
 0x3bb   : > { %3976 = vst.msk [vmem:[%s7577_s8 + $0x28] sm:$0xff] %vm3970_vm13, %v3939_v39  ;;  %v3904_v28 = vmax.f32 %v3796_v1, %v3890_v4  ;;  %v3798_v34 = vsel %vm3726_vm9, %v3608_v9, %v3762_v3  ;;  %v3611_v18 = vadd.f32 %v3610_v40, %v3434_v45  ;;  %v4351_v1 = vpop.f32.mrf.mxu0  ;;  %v4152_v9 = vsel %vm762_vm3, 1.0, %v8066_v55  ;;  %v8375_v3 = vld [vmem:[#allocation40_spill] sm:$0xff] }
 0x3bc   : > { %v3834_v60 = vrot.slane %v3798_v34, 1  ;;  %v3438_v58 = vpop.f32.mrf.mxu1  ;;  %vm763_vm5 = vcmp.lt.f32.partialorder %v8375_v3, 61.0 }
 0x3bd   : > { %v3940_v38 = vmul.f32 %v4148_v12, %v3904_v28  ;;  %vm3727_vm11 = vcmp.gt.f32.partialorder %v3611_v18, 0.0  ;;  %v3763_v44 = vmul.f32 0.01, %v3611_v18  ;;  %v3439_v42 = vadd.f32 %v7553_v16, %v3438_v58 }
 0x3be   : > { %v3889_v51 = vsel %vm1005_vm1, %v3833_v17, %v3834_v60  ;;  %v3440_v23 = vpop.f32.mrf.mxu1 }
 0x3bf   : > { %3977 = vst.msk [vmem:[%s7577_s8 + $0x30] sm:$0xff] %vm3970_vm13, %v3940_v38  ;;  %v3905_v27 = vmax.f32 %v3797_v32, %v3889_v51  ;;  %v3799_v14 = vsel %vm3727_vm11, %v3611_v18, %v3763_v44  ;;  %v3616_v56 = vadd.f32 %v7594_v46, %v3439_v42  ;;  %v3626_v32 = vpop.f32.mrf.mxu0  ;;  %v4153_v18 = vsel %vm763_vm5, 1.0, %v8066_v55  ;;  %v8376_v44 = vld [vmem:[#allocation34_spill] sm:$0xff] }
 0x3c0   : > { %v3835_v22 = vrot.slane %v3799_v14, 1  ;;  %v3441_v7 = vpop.f32.mrf.mxu1  ;;  %vm764_vm7 = vcmp.lt.f32.partialorder %v8376_v44, 61.0 }
 0x3c1   : > { %v3941_v63 = vmul.f32 %v4149_v11, %v3905_v27  ;;  %vm3728_vm14 = vcmp.gt.f32.partialorder %v3616_v56, 0.0  ;;  %v3764_v61 = vmul.f32 0.01, %v3616_v56  ;;  %v3442_v62 = vadd.f32 %v7553_v16, %v3441_v7 }
 0x3c2   : > { %v3888_v35 = vsel %vm1005_vm1, %v3834_v60, %v3835_v22  ;;  %v3443_v5 = vpop.f32.mrf.mxu1 }
 0x3c3   : > { %3978 = vst.msk [vmem:[%s7577_s8 + $0x38] sm:$0xff] %vm3970_vm13, %v3941_v63  ;;  %v3906_v0 = vmax.f32 %v3798_v34, %v3888_v35  ;;  %v3800_v46 = vsel %vm3728_vm14, %v3616_v56, %v3764_v61  ;;  %v3619_v29 = vadd.f32 %v4347_v48, %v3442_v62  ;;  %v7656_v34 = vpop.f32.mrf.mxu0  ;;  %v8377_v62 = vld [vmem:[#allocation41_spill] sm:$0xff] }
 0x3c4   : > { %v3836_v20 = vrot.slane %v3800_v46, 1  ;;  %v3446_v10 = vpop.f32.mrf.mxu1  ;;  %vm765_vm0 = vcmp.lt.f32.partialorder %v8377_v62, 61.0 }
 0x3c5   : > { %v3942_v21 = vmul.f32 %v4150_v8, %v3906_v0  ;;  %vm3729_vm2 = vcmp.gt.f32.partialorder %v3619_v29, 0.0  ;;  %v3765_v53 = vmul.f32 0.01, %v3619_v29  ;;  %v3447_v31 = vadd.f32 %v7553_v16, %v3446_v10  ;;  %v3639_v56 = vpop.f32.mrf.mxu0 }
 0x3c6   : > { %v3887_v33 = vsel %vm1005_vm1, %v3835_v22, %v3836_v20  ;;  %v3448_v47 = vpop.f32.mrf.mxu1  ;;  %v4154_v22 = vsel %vm764_vm7, 1.0, %v8066_v55 }
 0x3c7   : > { %3979 = vst.msk [vmem:[%s7577_s8 + $0x40] sm:$0xff] %vm3970_vm13, %v3942_v21  ;;  %v3907_v41 = vmax.f32 %v3799_v14, %v3887_v33  ;;  %v3801_v25 = vsel %vm3729_vm2, %v3619_v29, %v3765_v53  ;;  %v3624_v48 = vadd.f32 %v3623_v37, %v3447_v31  ;;  %v4155_v29 = vsel %vm765_vm0, 1.0, %v8066_v55  ;;  %v8378_v53 = vld [vmem:[#allocation39_spill] sm:$0xff] }
 0x3c8   : > { %v3837_v57 = vrot.slane %v3801_v25, 1  ;;  %v3449_v13 = vpop.f32.mrf.mxu1  ;;  %vm766_vm10 = vcmp.lt.f32.partialorder %v8378_v53, 61.0 }
 0x3c9   : > { %v3943_v49 = vmul.f32 %v4151_v26, %v3907_v41  ;;  %vm3730_vm4 = vcmp.gt.f32.partialorder %v3624_v48, 0.0  ;;  %v3766_v36 = vmul.f32 0.01, %v3624_v48  ;;  %v3450_v6 = vadd.f32 %v7553_v16, %v3449_v13 }
 0x3ca   : > { %v3886_v17 = vsel %vm1005_vm1, %v3836_v20, %v3837_v57  ;;  %v3451_v54 = vpop.f32.mrf.mxu1 }
 0x3cb   : > { %3980 = vst.msk [vmem:[%s7577_s8 + $0x48] sm:$0xff] %vm3970_vm13, %v3943_v49  ;;  %v3908_v39 = vmax.f32 %v3800_v46, %v3886_v17  ;;  %v3802_v45 = vsel %vm3730_vm4, %v3624_v48, %v3766_v36  ;;  %v3627_v40 = vadd.f32 %v3626_v32, %v3450_v6  ;;  %v4355_v46 = vpop.f32.mrf.mxu0  ;;  %v4156_v48 = vsel %vm766_vm10, 1.0, %v8066_v55  ;;  %v8379_v36 = vld [vmem:[#allocation43_spill] sm:$0xff] }
 0x3cc   : > { %v3838_v12 = vrot.slane %v3802_v45, 1  ;;  %v3454_v4 = vpop.f32.mrf.mxu1  ;;  %vm767_vm12 = vcmp.lt.f32.partialorder %v8379_v36, 61.0 }
 0x3cd   : > { %v3944_v59 = vmul.f32 %v4152_v9, %v3908_v39  ;;  %vm3731_vm6 = vcmp.gt.f32.partialorder %v3627_v40, 0.0  ;;  %v3767_v28 = vmul.f32 0.01, %v3627_v40  ;;  %v3455_v52 = vadd.f32 %v7553_v16, %v3454_v4 }
 0x3ce   : > { %v3885_v60 = vsel %vm1005_vm1, %v3837_v57, %v3838_v12  ;;  %v3456_v58 = vpop.f32.mrf.mxu1 }
 0x3cf   : > { %3981 = vst.msk [vmem:[%s7577_s8 + $0x50] sm:$0xff] %vm3970_vm13, %v3944_v59  ;;  %v3909_v38 = vmax.f32 %v3801_v25, %v3885_v60  ;;  %v3803_v42 = vsel %vm3731_vm6, %v3627_v40, %v3767_v28  ;;  %v3632_v11 = vadd.f32 %v7625_v19, %v3455_v52  ;;  %v3642_v25 = vpop.f32.mrf.mxu0  ;;  %v4157_v40 = vsel %vm767_vm12, 1.0, %v8066_v55  ;;  %v8380_v28 = vld [vmem:[#allocation42_spill] sm:$0xff] }
 0x3d0   : > { %v3839_v51 = vrot.slane %v3803_v42, 1  ;;  %v3457_v23 = vpop.f32.mrf.mxu1  ;;  %vm768_vm15 = vcmp.lt.f32.partialorder %v8380_v28, 61.0 }
 0x3d1   : > { %v3945_v27 = vmul.f32 %v4153_v18, %v3909_v38  ;;  %vm3732_vm8 = vcmp.gt.f32.partialorder %v3632_v11, 0.0  ;;  %v3768_v43 = vmul.f32 0.01, %v3632_v11  ;;  %v3458_v14 = vadd.f32 %v7553_v16, %v3457_v23 }
 0x3d2   : > { %v3884_v7 = vsel %vm1005_vm1, %v3838_v12, %v3839_v51  ;;  %v3459_v63 = vpop.f32.mrf.mxu1 }
 0x3d3   : > { %3982 = vst.msk [vmem:[%s7577_s8 + $0x58] sm:$0xff] %vm3970_vm13, %v3945_v27  ;;  %v3910_v61 = vmax.f32 %v3802_v45, %v3884_v7  ;;  %v3804_v19 = vsel %vm3732_vm8, %v3632_v11, %v3768_v43  ;;  %v3635_v37 = vadd.f32 %v4351_v1, %v3458_v14  ;;  %v7687_v45 = vpop.f32.mrf.mxu0  ;;  %v8381_v14 = vld [vmem:[#allocation10_spill] sm:$0xff] }
 0x3d4   : > { %v3840_v8 = vrot.slane %v3804_v19, 1  ;;  %v3462_v35 = vpop.f32.mrf.mxu1  ;;  %vm769_vm3 = vcmp.lt.f32.partialorder %v8381_v14, 61.0 }
 0x3d5   : > { %v3946_v5 = vmul.f32 %v4154_v22, %v3910_v61  ;;  %vm3733_vm9 = vcmp.gt.f32.partialorder %v3635_v37, 0.0  ;;  %v3769_v0 = vmul.f32 0.01, %v3635_v37  ;;  %v3463_v15 = vadd.f32 %v7553_v16, %v3462_v35  ;;  %v3655_v11 = vpop.f32.mrf.mxu0 }
 0x3d6   : > { %v3883_v20 = vsel %vm1005_vm1, %v3839_v51, %v3840_v8  ;;  %v3464_v10 = vpop.f32.mrf.mxu1  ;;  %v4158_v51 = vsel %vm768_vm15, 1.0, %v8066_v55 }
 0x3d7   : > { %3983 = vst.msk [vmem:[%s7577_s8 + $0x60] sm:$0xff] %vm3970_vm13, %v3946_v5  ;;  %v3911_v21 = vmax.f32 %v3803_v42, %v3883_v20  ;;  %v3805_v31 = vsel %vm3733_vm9, %v3635_v37, %v3769_v0  ;;  %v3640_v1 = vadd.f32 %v3639_v56, %v3463_v15  ;;  %v4159_v37 = vsel %vm769_vm3, 1.0, %v8066_v55  ;;  %v8382_v0 = vld [vmem:[#allocation44_spill] sm:$0xff] }
 0x3d8   : > { %v3841_v26 = vrot.slane %v3805_v31, 1  ;;  %v3465_v33 = vpop.f32.mrf.mxu1  ;;  %vm770_vm5 = vcmp.lt.f32.partialorder %v8382_v0, 61.0 }
 0x3d9   : > { %v3947_v47 = vmul.f32 %v4155_v29, %v3911_v21  ;;  %vm3734_vm11 = vcmp.gt.f32.partialorder %v3640_v1, 0.0  ;;  %v3770_v41 = vmul.f32 0.01, %v3640_v1  ;;  %v3466_v50 = vadd.f32 %v7553_v16, %v3465_v33 }
 0x3da   : > { %v3882_v57 = vsel %vm1005_vm1, %v3840_v8, %v3841_v26  ;;  %v3467_v13 = vpop.f32.mrf.mxu1 }
 0x3db   : > { %3984 = vst.msk [vmem:[%s7577_s8 + $0x68] sm:$0xff] %vm3970_vm13, %v3947_v47  ;;  %v3912_v49 = vmax.f32 %v3804_v19, %v3882_v57  ;;  %v3806_v6 = vsel %vm3734_vm11, %v3640_v1, %v3770_v41  ;;  %v3643_v32 = vadd.f32 %v3642_v25, %v3466_v50  ;;  %v4359_v19 = vpop.f32.mrf.mxu0  ;;  %v4160_v1 = vsel %vm770_vm5, 1.0, %v8066_v55  ;;  %v8383_v41 = vld [vmem:[#allocation19_spill] sm:$0xff] }
 0x3dc   : > { %v3842_v9 = vrot.slane %v3806_v6, 1  ;;  %v3470_v17 = vpop.f32.mrf.mxu1  ;;  %vm771_vm7 = vcmp.lt.f32.partialorder %v8383_v41, 61.0 }
 0x3dd   : > { %v3948_v54 = vmul.f32 %v4156_v48, %v3912_v49  ;;  %vm3735_vm14 = vcmp.gt.f32.partialorder %v3643_v32, 0.0  ;;  %v3771_v39 = vmul.f32 0.01, %v3643_v32  ;;  %v3471_v3 = vadd.f32 %v7553_v16, %v3470_v17 }
 0x3de   : > { %v3881_v12 = vsel %vm1005_vm1, %v3841_v26, %v3842_v9  ;;  %v3472_v4 = vpop.f32.mrf.mxu1 }
 0x3df   : > { %3985 = vst.msk [vmem:[%s7577_s8 + $0x70] sm:$0xff] %vm3970_vm13, %v3948_v54  ;;  %v3913_v59 = vmax.f32 %v3805_v31, %v3881_v12  ;;  %v3807_v52 = vsel %vm3735_vm14, %v3643_v32, %v3771_v39  ;;  %v3648_v18 = vadd.f32 %v7656_v34, %v3471_v3  ;;  %v3658_v31 = vpop.f32.mrf.mxu0  ;;  %v4161_v32 = vsel %vm771_vm7, 1.0, %v8066_v55  ;;  %v8384_v39 = vld [vmem:[#allocation3_spill] sm:$0xff] }
 0x3e0   : > { %v3843_v60 = vrot.slane %v3807_v52, 1  ;;  %v3473_v58 = vpop.f32.mrf.mxu1  ;;  %vm772_vm0 = vcmp.lt.f32.partialorder %v8384_v39, 61.0 }
 0x3e1   : > { %v3949_v38 = vmul.f32 %v4157_v40, %v3913_v59  ;;  %vm3736_vm2 = vcmp.gt.f32.partialorder %v3648_v18, 0.0  ;;  %v3772_v44 = vmul.f32 0.01, %v3648_v18  ;;  %v3474_v42 = vadd.f32 %v7553_v16, %v3473_v58 }
 0x3e2   : > { %v3880_v23 = vsel %vm1005_vm1, %v3842_v9, %v3843_v60  ;;  %v3475_v27 = vpop.f32.mrf.mxu1 }
 0x3e3   : > { %3986 = vst.msk [vmem:[%s7577_s8 + $0x78] sm:$0xff] %vm3970_vm13, %v3949_v38  ;;  %v3914_v43 = vmax.f32 %v3806_v6, %v3880_v23  ;;  %v3808_v34 = vsel %vm3736_vm2, %v3648_v18, %v3772_v44  ;;  %v3651_v56 = vadd.f32 %v4355_v46, %v3474_v42  ;;  %v7718_v6 = vpop.f32.mrf.mxu0  ;;  %v8385_v42 = vld [vmem:[#allocation12_spill] sm:$0xff] }
 0x3e4   : > { %v3844_v22 = vrot.slane %v3808_v34, 1  ;;  %v3478_v7 = vpop.f32.mrf.mxu1  ;;  %vm773_vm10 = vcmp.lt.f32.partialorder %v8385_v42, 61.0 }
 0x3e5   : > { %v3950_v63 = vmul.f32 %v4158_v51, %v3914_v43  ;;  %vm3737_vm4 = vcmp.gt.f32.partialorder %v3651_v56, 0.0  ;;  %v3773_v61 = vmul.f32 0.01, %v3651_v56  ;;  %v3479_v62 = vadd.f32 %v7553_v16, %v3478_v7  ;;  %v3671_v18 = vpop.f32.mrf.mxu0 }
 0x3e6   : > { %v3879_v8 = vsel %vm1005_vm1, %v3843_v60, %v3844_v22  ;;  %v3480_v35 = vpop.f32.mrf.mxu1  ;;  %v4162_v60 = vsel %vm772_vm0, 1.0, %v8066_v55 }
 0x3e7   : > { %3987 = vst.msk [vmem:[%s7577_s8 + $0x80] sm:$0xff] %vm3970_vm13, %v3950_v63  ;;  %v3915_v5 = vmax.f32 %v3807_v52, %v3879_v8  ;;  %v3809_v15 = vsel %vm3737_vm4, %v3651_v56, %v3773_v61  ;;  %v3656_v46 = vadd.f32 %v3655_v11, %v3479_v62  ;;  %v4163_v56 = vsel %vm773_vm10, 1.0, %v8066_v55  ;;  %v8386_v61 = vld [vmem:[#allocation27_spill] sm:$0xff] }
 0x3e8   : > { %v3845_v29 = vrot.slane %v3809_v15, 1  ;;  %v3481_v20 = vpop.f32.mrf.mxu1  ;;  %vm774_vm12 = vcmp.lt.f32.partialorder %v8386_v61, 61.0 }
 0x3e9   : > { %v3951_v10 = vmul.f32 %v4159_v37, %v3915_v5  ;;  %vm3738_vm6 = vcmp.gt.f32.partialorder %v3656_v46, 0.0  ;;  %v3774_v21 = vmul.f32 0.01, %v3656_v46  ;;  %v3482_v53 = vadd.f32 %v7553_v16, %v3481_v20 }
 0x3ea   : > { %v3878_v26 = vsel %vm1005_vm1, %v3844_v22, %v3845_v29  ;;  %v3483_v33 = vpop.f32.mrf.mxu1 }
 0x3eb   : > { %3988 = vst.msk [vmem:[%s7577_s8 + $0x88] sm:$0xff] %vm3970_vm13, %v3951_v10  ;;  %v3916_v47 = vmax.f32 %v3808_v34, %v3878_v26  ;;  %v3810_v50 = vsel %vm3738_vm6, %v3656_v46, %v3774_v21  ;;  %v3659_v25 = vadd.f32 %v3658_v31, %v3482_v53  ;;  %v4363_v34 = vpop.f32.mrf.mxu0  ;;  %v4164_v46 = vsel %vm774_vm12, 1.0, %v8066_v55  ;;  %v8387_v21 = vld [vmem:[#allocation13_spill] sm:$0xff] }
 0x3ec   : > { %v3846_v48 = vrot.slane %v3810_v50, 1  ;;  %v3486_v57 = vpop.f32.mrf.mxu1  ;;  %vm775_vm15 = vcmp.lt.f32.partialorder %v8387_v21, 61.0 }
 0x3ed   : > { %v3952_v13 = vmul.f32 %v4160_v1, %v3916_v47  ;;  %vm3739_vm8 = vcmp.gt.f32.partialorder %v3659_v25, 0.0  ;;  %v3775_v49 = vmul.f32 0.01, %v3659_v25  ;;  %v3487_v36 = vadd.f32 %v7553_v16, %v3486_v57 }
 0x3ee   : > { %v3877_v9 = vsel %vm1005_vm1, %v3845_v29, %v3846_v48  ;;  %v3488_v17 = vpop.f32.mrf.mxu1 }
 0x3ef   : > { %3989 = vst.msk [vmem:[%s7577_s8 + $0x90] sm:$0xff] %vm3970_vm13, %v3952_v13  ;;  %v3917_v54 = vmax.f32 %v3809_v15, %v3877_v9  ;;  %v3811_v3 = vsel %vm3739_vm8, %v3659_v25, %v3775_v49  ;;  %v3664_v40 = vadd.f32 %v7687_v45, %v3487_v36  ;;  %v3674_v15 = vpop.f32.mrf.mxu0  ;;  %v4165_v25 = vsel %vm775_vm15, 1.0, %v8066_v55  ;;  %v8388_v49 = vld [vmem:[#allocation14_spill] sm:$0xff] }
 0x3f0   : > { %v3847_v12 = vrot.slane %v3811_v3, 1  ;;  %v3489_v4 = vpop.f32.mrf.mxu1  ;;  %vm776_vm3 = vcmp.lt.f32.partialorder %v8388_v49, 61.0 }
 0x3f1   : > { %v3953_v59 = vmul.f32 %v4161_v32, %v3917_v54  ;;  %vm3740_vm9 = vcmp.gt.f32.partialorder %v3664_v40, 0.0  ;;  %v3776_v28 = vmul.f32 0.01, %v3664_v40  ;;  %v3490_v52 = vadd.f32 %v7553_v16, %v3489_v4 }
 0x3f2   : > { %v3876_v58 = vsel %vm1005_vm1, %v3846_v48, %v3847_v12  ;;  %v3491_v38 = vpop.f32.mrf.mxu1 }
 0x3f3   : > { %3990 = vst.msk [vmem:[%s7577_s8 + $0x98] sm:$0xff] %vm3970_vm13, %v3953_v59  ;;  %v3918_v44 = vmax.f32 %v3810_v50, %v3876_v58  ;;  %v3812_v45 = vsel %vm3740_vm9, %v3664_v40, %v3776_v28  ;;  %v3667_v11 = vadd.f32 %v4359_v19, %v3490_v52  ;;  %v7749_v50 = vpop.f32.mrf.mxu0  ;;  %v8389_v52 = vld [vmem:[#allocation18_spill] sm:$0xff] }
 0x3f4   : > { %v3848_v51 = vrot.slane %v3812_v45, 1  ;;  %v3494_v23 = vpop.f32.mrf.mxu1  ;;  %vm777_vm5 = vcmp.lt.f32.partialorder %v8389_v52, 61.0 }
 0x3f5   : > { %v3954_v27 = vmul.f32 %v4162_v60, %v3918_v44  ;;  %vm3741_vm11 = vcmp.gt.f32.partialorder %v3667_v11, 0.0  ;;  %v3777_v43 = vmul.f32 0.01, %v3667_v11  ;;  %v3495_v14 = vadd.f32 %v7553_v16, %v3494_v23  ;;  %v3687_v40 = vpop.f32.mrf.mxu0 }
 0x3f6   : > { %v3875_v22 = vsel %vm1005_vm1, %v3847_v12, %v3848_v51  ;;  %v3496_v7 = vpop.f32.mrf.mxu1  ;;  %v4166_v12 = vsel %vm776_vm3, 1.0, %v8066_v55 }
 0x3f7   : > { %3991 = vst.msk [vmem:[%s7577_s8 + $0xa0] sm:$0xff] %vm3970_vm13, %v3954_v27  ;;  %v3919_v63 = vmax.f32 %v3811_v3, %v3875_v22  ;;  %v3813_v62 = vsel %vm3741_vm11, %v3667_v11, %v3777_v43  ;;  %v3672_v19 = vadd.f32 %v3671_v18, %v3495_v14  ;;  %v4167_v11 = vsel %vm777_vm5, 1.0, %v8066_v55  ;;  %v8390_v43 = vld [vmem:[#allocation15_spill] sm:$0xff] }
 0x3f8   : > { %v3849_v37 = vrot.slane %v3813_v62, 1  ;;  %v3497_v8 = vpop.f32.mrf.mxu1  ;;  %vm778_vm7 = vcmp.lt.f32.partialorder %v8390_v43, 61.0 }
 0x3f9   : > { %v3955_v35 = vmul.f32 %v4163_v56, %v3919_v63  ;;  %vm3742_vm14 = vcmp.gt.f32.partialorder %v3672_v19, 0.0  ;;  %v3778_v5 = vmul.f32 0.01, %v3672_v19  ;;  %v3498_v0 = vadd.f32 %v7553_v16, %v3497_v8 }
 0x3fa   : > { %v3874_v29 = vsel %vm1005_vm1, %v3848_v51, %v3849_v37  ;;  %v3499_v20 = vpop.f32.mrf.mxu1 }
 0x3fb   : > { %3992 = vst.msk [vmem:[%s7577_s8 + $0xa8] sm:$0xff] %vm3970_vm13, %v3955_v35  ;;  %v3920_v10 = vmax.f32 %v3812_v45, %v3874_v29  ;;  %v3814_v53 = vsel %vm3742_vm14, %v3672_v19, %v3778_v5  ;;  %v3675_v31 = vadd.f32 %v3674_v15, %v3498_v0  ;;  %v4367_v45 = vpop.f32.mrf.mxu0  ;;  %v4168_v19 = vsel %vm778_vm7, 1.0, %v8066_v55  ;;  %v8391_v5 = vld [vmem:[#allocation31_spill] sm:$0xff] }
 0x3fc   : > { %v3850_v1 = vrot.slane %v3814_v53, 1  ;;  %v3502_v26 = vpop.f32.mrf.mxu1  ;;  %vm779_vm0 = vcmp.lt.f32.partialorder %v8391_v5, 61.0 }
 0x3fd   : > { %v3956_v33 = vmul.f32 %v4164_v46, %v3920_v10  ;;  %vm3743_vm2 = vcmp.gt.f32.partialorder %v3675_v31, 0.0  ;;  %v3779_v47 = vmul.f32 0.01, %v3675_v31  ;;  %v3503_v41 = vadd.f32 %v7553_v16, %v3502_v26 }
 0x3fe   : > { %v3873_v48 = vsel %vm1005_vm1, %v3849_v37, %v3850_v1  ;;  %v3504_v57 = vpop.f32.mrf.mxu1 }
 0x3ff   : > { %3993 = vst.msk [vmem:[%s7577_s8 + $0xb0] sm:$0xff] %vm3970_vm13, %v3956_v33  ;;  %v3921_v13 = vmax.f32 %v3813_v62, %v3873_v48  ;;  %v3815_v36 = vsel %vm3743_vm2, %v3675_v31, %v3779_v47  ;;  %v3680_v32 = vadd.f32 %v7718_v6, %v3503_v41  ;;  %v3690_v62 = vpop.f32.mrf.mxu0  ;;  %v4169_v31 = vsel %vm779_vm0, 1.0, %v8066_v55  ;;  %v8392_v47 = vld [vmem:[#allocation28_spill] sm:$0xff] }
 0x400   : > { %v3851_v9 = vrot.slane %v3815_v36, 1  ;;  %v3505_v17 = vpop.f32.mrf.mxu1  ;;  %vm780_vm10 = vcmp.lt.f32.partialorder %v8392_v47, 61.0 }
 0x401   : > { %v3957_v54 = vmul.f32 %v4165_v25, %v3921_v13  ;;  %vm3744_vm4 = vcmp.gt.f32.partialorder %v3680_v32, 0.0  ;;  %v3780_v39 = vmul.f32 0.01, %v3680_v32  ;;  %v3506_v3 = vadd.f32 %v7553_v16, %v3505_v17 }
 0x402   : > { %v3872_v4 = vsel %vm1005_vm1, %v3850_v1, %v3851_v9  ;;  %v3507_v59 = vpop.f32.mrf.mxu1 }
 0x403   : > { %3994 = vst.msk [vmem:[%s7577_s8 + $0xb8] sm:$0xff] %vm3970_vm13, %v3957_v54  ;;  %v3922_v28 = vmax.f32 %v3814_v53, %v3872_v4  ;;  %v3816_v6 = vsel %vm3744_vm4, %v3680_v32, %v3780_v39  ;;  %v3683_v18 = vadd.f32 %v4363_v34, %v3506_v3  ;;  %v7780_v53 = vpop.f32.mrf.mxu0  ;;  %v8393_v3 = vld [vmem:[#allocation26_spill] sm:$0xff] }
 0x404   : > { %v3852_v60 = vrot.slane %v3816_v6, 1  ;;  %v3510_v58 = vpop.f32.mrf.mxu1  ;;  %vm781_vm12 = vcmp.lt.f32.partialorder %v8393_v3, 61.0  ;;  %v8399_v3 = vld [vmem:[#allocation21_spill] sm:$0xff] }
 0x405   : > { %v3958_v38 = vmul.f32 %v4166_v12, %v3922_v28  ;;  %vm3745_vm6 = vcmp.gt.f32.partialorder %v3683_v18, 0.0  ;;  %v3781_v44 = vmul.f32 0.01, %v3683_v18  ;;  %v3511_v42 = vadd.f32 %v7553_v16, %v3510_v58  ;;  %v3703_v32 = vpop.f32.mrf.mxu0 }
 0x406   : > { %v3871_v51 = vsel %vm1005_vm1, %v3851_v9, %v3852_v60  ;;  %v3512_v23 = vpop.f32.mrf.mxu1  ;;  %v4170_v9 = vsel %vm780_vm10, 1.0, %v8066_v55 }
 0x407   : > { %3995 = vst.msk [vmem:[%s7577_s8 + $0xc0] sm:$0xff] %vm3970_vm13, %v3958_v38  ;;  %v3923_v27 = vmax.f32 %v3815_v36, %v3871_v51  ;;  %v3817_v14 = vsel %vm3745_vm6, %v3683_v18, %v3781_v44  ;;  %v3688_v34 = vadd.f32 %v3687_v40, %v3511_v42  ;;  %v4171_v18 = vsel %vm781_vm12, 1.0, %v8066_v55  ;;  %v8394_v44 = vld [vmem:[#allocation16_spill] sm:$0xff] }
 0x408   : > { %v3853_v56 = vrot.slane %v3817_v14, 1  ;;  %v3513_v22 = vpop.f32.mrf.mxu1  ;;  %vm782_vm15 = vcmp.lt.f32.partialorder %v8394_v44, 61.0 }
 0x409   : > { %v3959_v7 = vmul.f32 %v4167_v11, %v3923_v27  ;;  %vm3746_vm8 = vcmp.gt.f32.partialorder %v3688_v34, 0.0  ;;  %v3782_v63 = vmul.f32 0.01, %v3688_v34  ;;  %v3514_v61 = vadd.f32 %v7553_v16, %v3513_v22 }
 0x40a   : > { %v3870_v37 = vsel %vm1005_vm1, %v3852_v60, %v3853_v56  ;;  %v3515_v8 = vpop.f32.mrf.mxu1 }
 0x40b   : > { %3996 = vst.msk [vmem:[%s7577_s8 + $0xc8] sm:$0xff] %vm3970_vm13, %v3959_v7  ;;  %v3924_v35 = vmax.f32 %v3816_v6, %v3870_v37  ;;  %v3818_v0 = vsel %vm3746_vm8, %v3688_v34, %v3782_v63  ;;  %v3691_v15 = vadd.f32 %v3690_v62, %v3514_v61  ;;  %v4371_v6 = vpop.f32.mrf.mxu0  ;;  %v4172_v34 = vsel %vm782_vm15, 1.0, %v8066_v55  ;;  %v8395_v63 = vld [vmem:[#allocation17_spill] sm:$0xff] }
 0x40c   : > { %v3854_v46 = vrot.slane %v3818_v0, 1  ;;  %v3518_v29 = vpop.f32.mrf.mxu1  ;;  %vm783_vm3 = vcmp.lt.f32.partialorder %v8395_v63, 61.0 }
 0x40d   : > { %v3960_v20 = vmul.f32 %v4168_v19, %v3924_v35  ;;  %vm3747_vm9 = vcmp.gt.f32.partialorder %v3691_v15, 0.0  ;;  %v3783_v10 = vmul.f32 0.01, %v3691_v15  ;;  %v3519_v21 = vadd.f32 %v7553_v16, %v3518_v29 }
 0x40e   : > { %v3869_v1 = vsel %vm1005_vm1, %v3853_v56, %v3854_v46  ;;  %v3520_v26 = vpop.f32.mrf.mxu1 }
 0x40f   : > { %3997 = vst.msk [vmem:[%s7577_s8 + $0xd0] sm:$0xff] %vm3970_vm13, %v3960_v20  ;;  %v3925_v33 = vmax.f32 %v3817_v14, %v3869_v1  ;;  %v3819_v41 = vsel %vm3747_vm9, %v3691_v15, %v3783_v10  ;;  %v3696_v25 = vadd.f32 %v7749_v50, %v3519_v21  ;;  %v3706_v14 = vpop.f32.mrf.mxu0  ;;  %v8396_v20 = vld [vmem:[#allocation20_spill] sm:$0xff]  ;;  %vm787_vm9 = vcmp.lt.f32.partialorder %v8399_v3, 61.0 }
 0x410   : > { %v3855_v48 = vrot.slane %v3819_v41, 1  ;;  %v3521_v57 = vpop.f32.mrf.mxu1  ;;  %vm784_vm5 = vcmp.lt.f32.partialorder %v8396_v20, 61.0 }
 0x411   : > { %v3961_v13 = vmul.f32 %v4169_v31, %v3925_v33  ;;  %vm3748_vm11 = vcmp.gt.f32.partialorder %v3696_v25, 0.0  ;;  %v3784_v49 = vmul.f32 0.01, %v3696_v25  ;;  %v3522_v36 = vadd.f32 %v7553_v16, %v3521_v57 }
 0x412   : > { %v3868_v17 = vsel %vm1005_vm1, %v3854_v46, %v3855_v48  ;;  %v3523_v54 = vpop.f32.mrf.mxu1 }
 0x413   : > { %3998 = vst.msk [vmem:[%s7577_s8 + $0xd8] sm:$0xff] %vm3970_vm13, %v3961_v13  ;;  %v3926_v39 = vmax.f32 %v3818_v0, %v3868_v17  ;;  %v3820_v50 = vsel %vm3748_vm11, %v3696_v25, %v3784_v49  ;;  %v3699_v40 = vadd.f32 %v4367_v45, %v3522_v36  ;;  %v4173_v0 = vsel %vm783_vm3, 1.0, %v8066_v55  ;;  %v8397_v13 = vld [vmem:[#allocation45_spill] sm:$0xff] }
 0x414   : > { %v3856_v12 = vrot.slane %v3820_v50, 1  ;;  %v3526_v4 = vpop.f32.mrf.mxu1  ;;  %vm785_vm7 = vcmp.lt.f32.partialorder %v8397_v13, 61.0 }
 0x415   : > { %v3962_v59 = vmul.f32 %v4170_v9, %v3926_v39  ;;  %vm3749_vm14 = vcmp.gt.f32.partialorder %v3699_v40, 0.0  ;;  %v3785_v28 = vmul.f32 0.01, %v3699_v40  ;;  %v3527_v52 = vadd.f32 %v7553_v16, %v3526_v4  ;;  %v8398_v39 = vld [vmem:[#allocation46_spill] sm:$0xff] }
 0x416   : > { %v3867_v60 = vsel %vm1005_vm1, %v3855_v48, %v3856_v12  ;;  %v3528_v58 = vpop.f32.mrf.mxu1  ;;  %vm786_vm0 = vcmp.lt.f32.partialorder %v8398_v39, 61.0 }
 0x417   : > { %3999 = vst.msk [vmem:[%s7577_s8 + $0xe0] sm:$0xff] %vm3970_vm13, %v3962_v59  ;;  %v3927_v38 = vmax.f32 %v3819_v41, %v3867_v60  ;;  %v3821_v42 = vsel %vm3749_vm14, %v3699_v40, %v3785_v28  ;;  %v3704_v45 = vadd.f32 %v3703_v32, %v3527_v52  ;;  %v4174_v41 = vsel %vm784_vm5, 1.0, %v8066_v55 }
 0x418   : > { %v3857_v11 = vrot.slane %v3821_v42, 1  ;;  %v3529_v51 = vpop.f32.mrf.mxu1  ;;  %v4176_v4 = vsel %vm786_vm0, 1.0, %v8066_v55  ;;  %v4177_v59 = vsel %vm787_vm9, 1.0, %v8066_v55 }
 0x419   : > { %v3963_v23 = vmul.f32 %v4171_v18, %v3927_v38  ;;  %vm3750_vm2 = vcmp.gt.f32.partialorder %v3704_v45, 0.0  ;;  %v3786_v27 = vmul.f32 0.01, %v3704_v45  ;;  %v3530_v43 = vadd.f32 %v7553_v16, %v3529_v51 }
 0x41a   : > { %v3866_v56 = vsel %vm1005_vm1, %v3856_v12, %v3857_v11  ;;  %v3531_v22 = vpop.f32.mrf.mxu1 }
 0x41b   : > { %4000 = vst.msk [vmem:[%s7577_s8 + $0xe8] sm:$0xff] %vm3970_vm13, %v3963_v23  ;;  %v3928_v7 = vmax.f32 %v3820_v50, %v3866_v56  ;;  %v3822_v61 = vsel %vm3750_vm2, %v3704_v45, %v3786_v27  ;;  %v3707_v62 = vadd.f32 %v3706_v14, %v3530_v43 }
 0x41c   : > { %v3858_v19 = vrot.slane %v3822_v61, 1  ;;  %v3534_v37 = vpop.f32.mrf.mxu1 }
 0x41d   : > { %v3964_v8 = vmul.f32 %v4172_v34, %v3928_v7  ;;  %vm3751_vm4 = vcmp.gt.f32.partialorder %v3707_v62, 0.0  ;;  %v3787_v35 = vmul.f32 0.01, %v3707_v62  ;;  %v3535_v5 = vadd.f32 %v7553_v16, %v3534_v37 }
 0x41e   : > { %v3865_v15 = vsel %vm1005_vm1, %v3857_v11, %v3858_v19  ;;  %v3536_v46 = vpop.f32.mrf.mxu1 }
 0x41f   : > { %4001 = vst.msk [vmem:[%s7577_s8 + $0xf0] sm:$0xff] %vm3970_vm13, %v3964_v8  ;;  %v3929_v29 = vmax.f32 %v3821_v42, %v3865_v15  ;;  %v3823_v10 = vsel %vm3751_vm4, %v3707_v62, %v3787_v35  ;;  %v3712_v21 = vadd.f32 %v7780_v53, %v3535_v5 }
 0x420   : > { %v3859_v31 = vrot.slane %v3823_v10, 1  ;;  %v3537_v1 = vpop.f32.mrf.mxu1 }
 0x421   : > { %v3965_v26 = vmul.f32 %v4173_v0, %v3929_v29  ;;  %vm3752_vm6 = vcmp.gt.f32.partialorder %v3712_v21, 0.0  ;;  %v3788_v33 = vmul.f32 0.01, %v3712_v21  ;;  %v3538_v47 = vadd.f32 %v7553_v16, %v3537_v1 }
 0x422   : > { %v3864_v25 = vsel %vm1005_vm1, %v3858_v19, %v3859_v31  ;;  %v3539_v48 = vpop.f32.mrf.mxu1  ;;  %v4175_v16 = vsel %vm785_vm7, 1.0, %v8066_v55 }
 0x423   : > { %4002 = vst.msk [vmem:[%s7577_s8 + $0xf8] sm:$0xff] %vm3970_vm13, %v3965_v26  ;;  %v3930_v57 = vmax.f32 %v3822_v61, %v3864_v25  ;;  %v3824_v53 = vsel %vm3752_vm6, %v3712_v21, %v3788_v33  ;;  %v3715_v49 = vadd.f32 %v4371_v6, %v3538_v47 }
 0x424   : > { %v3860_v36 = vrot.slane %v3824_v53, 1 }
 0x425   : > { %v3966_v32 = vmul.f32 %v4174_v41, %v3930_v57  ;;  %vm3753_vm8 = vcmp.gt.f32.partialorder %v3715_v49, 0.0  ;;  %v3789_v9 = vmul.f32 0.01, %v3715_v49 }
 0x426   : > { %v3863_v17 = vsel %vm1005_vm1, %v3859_v31, %v3860_v36 }
 0x427   : > { %4003 = vst.msk [vmem:[%s7577_s8 + $0x100] sm:$0xff] %vm3970_vm13, %v3966_v32  ;;  %v3931_v54 = vmax.f32 %v3823_v10, %v3863_v17  ;;  %v3825_v50 = vsel %vm3753_vm8, %v3715_v49, %v3789_v9 }
 0x428   : > { %v3861_v40 = vrot.slane %v3825_v50, 1 }
 0x429   : > { %v3967_v12 = vmul.f32 %v4175_v16, %v3931_v54 }
 0x42a   : > { %v3862_v28 = vsel %vm1005_vm1, %v3860_v36, %v3861_v40  ;;  %v3897_v52 = vsel %vm1005_vm1, %v3861_v40, %v3826_v30 }
 0x42b   : > { %4004 = vst.msk [vmem:[%s7577_s8 + $0x108] sm:$0xff] %vm3970_vm13, %v3967_v12  ;;  %v3932_v6 = vmax.f32 %v3824_v53, %v3862_v28  ;;  %v3933_v18 = vmax.f32 %v3825_v50, %v3897_v52 }
 0x42d   : > { %v3968_v60 = vmul.f32 %v4176_v4, %v3932_v6  ;;  %v3969_v58 = vmul.f32 %v4177_v59, %v3933_v18 }
 0x42f   : > { %4005 = vst.msk [vmem:[%s7577_s8 + $0x110] sm:$0xff] %vm3970_vm13, %v3968_v60  ;;  %4006 = vst.msk [vmem:[%s7577_s8 + $0x118] sm:$0xff] %vm3970_vm13, %v3969_v58 }
 0x430 PF: > { %s17_s24 = sadd.s32 1, %s4426_s24  }
 0x431   : > { %p14_p4 = scmp.ge.s32.totalorder %s17_s24, 4  }
 0x433   :  { %16 = sbr.rel (!%p14_p4) target bundleno = 1 (0x1), region = 78 }

</bundles_post_ra>
